<compile_context>
chip_gen: v6e
topology: v6e:2x2x1
jax: 0.10.0
libtpu: 0.0.40
codegen_flags: <defaults>
</compile_context>

<pallas_src>
import math
import jax
import jax.numpy as jnp
from jax.experimental import pallas as pl
from jax.experimental.pallas import tpu as pltpu


def _round_up(x, m):
    return ((x + m - 1) // m) * m


# ---------------------------------------------------------------------------
# Fused kernel factory (static shape info is closed over)
# ---------------------------------------------------------------------------
def _make_kernel(chans, groups, group_geo, offs):
    ns = len(chans)
    ng = len(groups)

    def kernel(*args):
        i0 = 0
        t_refs = args[i0:i0 + ns]; i0 += ns          # (1, C_i, HW_i) inputs
        w_refs = args[i0:i0 + ng]; i0 += ng          # (7G, 14G) conv2d blocks
        m_ref = args[i0]; i0 += 1                    # (cs, cs) fused heads
        bcol_ref = args[i0]; i0 += 1                 # (cs, 1) head biases
        b2d_ref = args[i0]; i0 += 1                  # (1,) SMEM conv2d bias
        o_refs = args[i0:i0 + ns]; i0 += ns          # (1, C_i, HW_i) outputs
        scr_refs = args[i0:i0 + ng]; i0 += ng        # (2G, L) padded planes
        rbuf_refs = args[i0:i0 + ng]; i0 += ng       # (14G, HW+18) row shifts
        s_refs = args[i0:i0 + ng]; i0 += ng          # (G, HW) staged satt
        p_scr = args[i0]                             # (cs, 1) pooled column

        # ---------------- Phase A: spatial attention (per resolution) -------
        for gi, grp in enumerate(groups):
            G = len(grp)
            W, HW, PADL, L = group_geo[gi]
            scr = scr_refs[gi]

            # Zero only the pad regions; the interior is fully overwritten.
            scr[:, 0:PADL] = jnp.zeros((2 * G, PADL), jnp.float32)
            scr[:, PADL + HW:L] = jnp.zeros((2 * G, L - PADL - HW), jnp.float32)

            # channel-avg / channel-max planes for every scale of the group
            for g, si in enumerate(grp):
                t = t_refs[si][...]                               # (1, C, HW)
                scr[2 * g:2 * g + 1, PADL:PADL + HW] = jnp.mean(t, axis=1)
                scr[2 * g + 1:2 * g + 2, PADL:PADL + HW] = jnp.max(t, axis=1)

            # Dilated 7x7 conv (pad=9, dil=3), factorized:
            #   7 row-shifted windows -> one MXU matmul -> 7 column shifts.
            rbuf = rbuf_refs[gi]
            for ky in range(7):
                dy = 3 * ky - 9
                start = PADL + dy * W - 9
                rbuf[ky * 2 * G:(ky + 1) * 2 * G, :] = (
                    scr[:, start:start + HW + 18])
            q = jnp.dot(w_refs[gi][...], rbuf[...],
                        preferred_element_type=jnp.float32)       # (7G, HW+18)

            colx = jax.lax.broadcasted_iota(jnp.int32, (1, HW), 1)
            colx = (colx & (W - 1)) if (W & (W - 1)) == 0 else (colx % W)
            acc = jnp.zeros((G, HW), jnp.float32)
            for kx in range(7):
                dx = 3 * kx - 9
                sl = q[kx * G:(kx + 1) * G, 3 * kx:3 * kx + HW]   # (G, HW)
                if dx == 0:
                    acc = acc + sl
                else:
                    ok = jnp.logical_and(colx + dx >= 0, colx + dx < W)
                    acc = acc + jnp.where(ok, sl, 0.0)

            s_all = jax.nn.sigmoid(acc + b2d_ref[0])              # (G, HW)
            s_refs[gi][...] = s_all                               # stage in VMEM

            # avgpool(v) with v = (1+s)*t  ->  (C,1) column at sublane offsets
            for g, si in enumerate(grp):
                t = t_refs[si][...]                               # (1, C, HW)
                s_row = s_all[g:g + 1, :]                         # (1, HW)
                pooled = jnp.sum((1.0 + s_row)[:, None, :] * t,
                                 axis=2, keepdims=True) * (1.0 / HW)
                C = chans[si]
                p_scr[offs[si]:offs[si] + C, :] = pooled[0]       # (C, 1)

        # ------- Phase B: conv1d + 5 FC heads fused into one column matmul --
        catt = jax.nn.sigmoid(
            jnp.dot(m_ref[...], p_scr[...],
                    preferred_element_type=jnp.float32) + bcol_ref[...])

        # ---------------- Phase C: fused residual output ---------------------
        for gi, grp in enumerate(groups):
            for g, si in enumerate(grp):
                C = chans[si]
                a = catt[offs[si]:offs[si] + C, :].reshape(1, C, 1)
                s = s_refs[gi][g:g + 1, :]                        # (1, HW)
                t = t_refs[si][...]                               # (1, C, HW)
                # catt*(s*t + t) + s*t  ==  t * (s*(1+catt) + catt)
                o_refs[si][...] = t * (s[:, None, :] * (1.0 + a) + a)

    return kernel


# ---------------------------------------------------------------------------
# Wrapper: lane-dense reshapes, weight folding, single pallas_call
# ---------------------------------------------------------------------------
def sc_att_bridge(ts, w_conv2d, b_conv2d, w_conv1d, w_att, b_att):
    ns = len(ts)
    N = int(ts[0].shape[0])
    chans = [int(t.shape[1]) for t in ts]
    hw_list = [(int(t.shape[2]), int(t.shape[3])) for t in ts]
    cs = sum(chans)
    offs = [0]
    for c in chans[:-1]:
        offs.append(offs[-1] + c)

    # Group scales that share a spatial resolution (and the shared conv2d).
    groups, group_geo, seen = [], [], {}
    for i, (h, w) in enumerate(hw_list):
        if (h, w) in seen:
            groups[seen[(h, w)]].append(i)
        else:
            seen[(h, w)] = len(groups)
            groups.append([i])
    for grp in groups:
        h, w = hw_list[grp[0]]
        hw = h * w
        padl = _round_up(9 * w + 9, 128)
        group_geo.append((w, hw, padl, padl + hw + 9 * w + 9))

    # lane-dense (N, C, H*W) activation views
    t_flat = [t.reshape(N, chans[i], hw_list[i][0] * hw_list[i][1])
              .astype(jnp.float32) for i, t in enumerate(ts)]

    # conv2d weights per resolution group, laid out for the factorized conv:
    #   wfull[kx*G+g, ky*2G + 2g' + c] = w_conv2d[0, c, ky, kx] * (g == g')
    w_t = jnp.transpose(w_conv2d.reshape(2, 7, 7).astype(jnp.float32),
                        (1, 2, 0))                                # (ky, kx, c)
    wfulls = []
    for grp in groups:
        G = len(grp)
        eye = jnp.eye(G, dtype=jnp.float32)
        wfulls.append(jnp.einsum('yxc,gh->xgyhc', w_t, eye)
                      .reshape(7 * G, 14 * G))
    b2d = b_conv2d.reshape(-1).astype(jnp.float32)                # (1,) SMEM

    # conv1d (k=3, pad=1, no bias) composed with the 5 FC heads -> one matrix:
    #   catt = sigmoid(W_all @ (Cmat @ p) + b) = sigmoid((W_all @ Cmat) @ p + b)
    w1 = w_conv1d.reshape(3).astype(jnp.float32)
    cmat = (w1[0] * jnp.eye(cs, k=-1, dtype=jnp.float32)
            + w1[1] * jnp.eye(cs, dtype=jnp.float32)
            + w1[2] * jnp.eye(cs, k=1, dtype=jnp.float32))
    w_all = jnp.concatenate([w.astype(jnp.float32) for w in w_att], axis=0)
    m_mat = jnp.dot(w_all, cmat)                                  # (cs, cs)
    b_col = jnp.concatenate([b.astype(jnp.float32) for b in b_att]
                            ).reshape(cs, 1)

    kernel = _make_kernel(chans, groups, group_geo, offs)

    in_specs = (
        [pl.BlockSpec((1, chans[i], hw_list[i][0] * hw_list[i][1]),
                      lambda n: (n, 0, 0)) for i in range(ns)]
        + [pl.BlockSpec(w.shape, lambda n: (0, 0)) for w in wfulls]
        + [pl.BlockSpec((cs, cs), lambda n: (0, 0)),
           pl.BlockSpec((cs, 1), lambda n: (0, 0)),
           pl.BlockSpec(memory_space=pltpu.MemorySpace.SMEM)]
    )
    out_specs = tuple(
        pl.BlockSpec((1, chans[i], hw_list[i][0] * hw_list[i][1]),
                     lambda n: (n, 0, 0)) for i in range(ns))
    out_shape = tuple(
        jax.ShapeDtypeStruct((N, chans[i], hw_list[i][0] * hw_list[i][1]),
                             jnp.float32) for i in range(ns))
    scratch_shapes = (
        [pltpu.VMEM((2 * len(grp), group_geo[gi][3]), jnp.float32)
         for gi, grp in enumerate(groups)]
        + [pltpu.VMEM((14 * len(grp), group_geo[gi][1] + 18), jnp.float32)
           for gi, grp in enumerate(groups)]
        + [pltpu.VMEM((len(grp), group_geo[gi][1]), jnp.float32)
           for gi, grp in enumerate(groups)]
        + [pltpu.VMEM((cs, 1), jnp.float32)]
    )

    outs = pl.pallas_call(
        kernel,
        out_shape=out_shape,
        grid=(N,),
        in_specs=in_specs,
        out_specs=out_specs,
        scratch_shapes=scratch_shapes,
        compiler_params=pltpu.CompilerParams(
            dimension_semantics=("parallel",)),
    )(*t_flat, *wfulls, m_mat, b_col, b2d)

    return [outs[i].reshape(N, chans[i], hw_list[i][0], hw_list[i][1])
            for i in range(ns)]


# ---------------------------------------------------------------------------
# Pure-JAX reference (for verification)
# ---------------------------------------------------------------------------
def reference(ts, w_conv2d, b_conv2d, w_conv1d, w_att, b_att):
    def spatial(t):
        avg = jnp.mean(t, axis=1, keepdims=True)
        mx = jnp.max(t, axis=1, keepdims=True)
        x = jnp.concatenate([avg, mx], axis=1)
        y = jax.lax.conv_general_dilated(
            x, w_conv2d, window_strides=(1, 1),
            padding=((9, 9), (9, 9)), rhs_dilation=(3, 3),
            dimension_numbers=("NCHW", "OIHW", "NCHW"))
        return jax.nn.sigmoid(y + b_conv2d.reshape(1, 1, 1, 1))

    us, vs = [], []
    for t in ts:
        s = spatial(t)
        u = s * t
        us.append(u)
        vs.append(u + t)
    p = jnp.concatenate([jnp.mean(v, axis=(2, 3)) for v in vs], axis=1)
    wg = w_conv1d.reshape(3)
    pp = jnp.pad(p, ((0, 0), (1, 1)))
    g = wg[0] * pp[:, :-2] + wg[1] * pp[:, 1:-1] + wg[2] * pp[:, 2:]
    outs = []
    for i, (u, v) in enumerate(zip(us, vs)):
        a = jax.nn.sigmoid(g @ w_att[i].T + b_att[i][None, :])
        outs.append(a[:, :, None, None] * v + u)
    return outs


if __name__ == "__main__":
    # c_list has 6 entries (6 encoder stages); the bridge uses the first 5.
    c_list = [8, 16, 24, 32, 48, 64]
    hw_sizes = [32, 16, 16, 8, 8]
    N = 2
    csum = sum(c_list) - c_list[-1]                  # 128

    keys = jax.random.split(jax.random.PRNGKey(0), 18)
    ts = [jax.random.normal(keys[i], (N, c_list[i], hw_sizes[i], hw_sizes[i]),
                            jnp.float32) for i in range(5)]
    w_conv2d = jax.random.normal(keys[5], (1, 2, 7, 7), jnp.float32) * 0.2
    b_conv2d = jax.random.normal(keys[6], (1,), jnp.float32) * 0.1
    w_conv1d = jax.random.normal(keys[7], (1, 1, 3), jnp.float32) * 0.5
    w_att = [jax.random.normal(keys[8 + i], (c_list[i], csum), jnp.float32)
             * (1.0 / math.sqrt(csum)) for i in range(5)]
    b_att = [jax.random.normal(keys[13 + i], (c_list[i],), jnp.float32) * 0.1
             for i in range(5)]

    outs = sc_att_bridge(ts, w_conv2d, b_conv2d, w_conv1d, w_att, b_att)
    outs = jax.block_until_ready(outs)

    refs = reference(ts, w_conv2d, b_conv2d, w_conv1d, w_att, b_att)
    for o, r in zip(outs, refs):
        assert o.shape == r.shape
        err = float(jnp.max(jnp.abs(o - r)))
        assert jnp.allclose(o, r, atol=3e-3, rtol=3e-3), err

    print("KERNEL_OK")
</pallas_src>

<mosaic_0001>
module attributes {stable_mosaic.version = 11 : i64} {
  func.func @kernel(%arg0: i32, %arg1: memref<1x8x1024xf32, #tpu.memory_space<vmem>>, %arg2: memref<1x16x256xf32, #tpu.memory_space<vmem>>, %arg3: memref<1x24x256xf32, #tpu.memory_space<vmem>>, %arg4: memref<1x32x64xf32, #tpu.memory_space<vmem>>, %arg5: memref<1x48x64xf32, #tpu.memory_space<vmem>>, %arg6: memref<7x14xf32, #tpu.memory_space<vmem>>, %arg7: memref<14x28xf32, #tpu.memory_space<vmem>>, %arg8: memref<14x28xf32, #tpu.memory_space<vmem>>, %arg9: memref<128x128xf32, #tpu.memory_space<vmem>>, %arg10: memref<128x1xf32, #tpu.memory_space<vmem>>, %arg11: memref<1xf32, #tpu.memory_space<smem>>, %arg12: memref<1x8x1024xf32, #tpu.memory_space<vmem>>, %arg13: memref<1x16x256xf32, #tpu.memory_space<vmem>>, %arg14: memref<1x24x256xf32, #tpu.memory_space<vmem>>, %arg15: memref<1x32x64xf32, #tpu.memory_space<vmem>>, %arg16: memref<1x48x64xf32, #tpu.memory_space<vmem>>, %arg17: memref<2x1705xf32, #tpu.memory_space<vmem>>, %arg18: memref<4x665xf32, #tpu.memory_space<vmem>>, %arg19: memref<4x273xf32, #tpu.memory_space<vmem>>, %arg20: memref<14x1042xf32, #tpu.memory_space<vmem>>, %arg21: memref<28x274xf32, #tpu.memory_space<vmem>>, %arg22: memref<28x82xf32, #tpu.memory_space<vmem>>, %arg23: memref<1x1024xf32, #tpu.memory_space<vmem>>, %arg24: memref<2x256xf32, #tpu.memory_space<vmem>>, %arg25: memref<2x64xf32, #tpu.memory_space<vmem>>, %arg26: memref<128x1xf32, #tpu.memory_space<vmem>>) attributes {dimension_semantics = [#tpu.dimension_semantics<parallel>], iteration_bounds = array<i64: 2>, scalar_prefetch = 0 : i64, scratch_operands = 10 : i64, tpu.core_type = #tpu.core_type<tc>, window_params = [{transform_indices = @transform_0, window_bounds = array<i64: 1, 8, 1024>}, {transform_indices = @transform_1, window_bounds = array<i64: 1, 16, 256>}, {transform_indices = @transform_2, window_bounds = array<i64: 1, 24, 256>}, {transform_indices = @transform_3, window_bounds = array<i64: 1, 32, 64>}, {transform_indices = @transform_4, window_bounds = array<i64: 1, 48, 64>}, {pipeline_mode = #tpu.pipeline_mode<synchronous>, transform_indices = @transform_5, window_bounds = array<i64: 7, 14>}, {pipeline_mode = #tpu.pipeline_mode<synchronous>, transform_indices = @transform_6, window_bounds = array<i64: 14, 28>}, {pipeline_mode = #tpu.pipeline_mode<synchronous>, transform_indices = @transform_7, window_bounds = array<i64: 14, 28>}, {pipeline_mode = #tpu.pipeline_mode<synchronous>, transform_indices = @transform_8, window_bounds = array<i64: 128, 128>}, {pipeline_mode = #tpu.pipeline_mode<synchronous>, transform_indices = @transform_9, window_bounds = array<i64: 128, 1>}, {transform_indices = @transform_10, window_bounds = array<i64: 1>}, {transform_indices = @transform_11, window_bounds = array<i64: 1, 8, 1024>}, {transform_indices = @transform_12, window_bounds = array<i64: 1, 16, 256>}, {transform_indices = @transform_13, window_bounds = array<i64: 1, 24, 256>}, {transform_indices = @transform_14, window_bounds = array<i64: 1, 32, 64>}, {transform_indices = @transform_15, window_bounds = array<i64: 1, 48, 64>}]} {
    %cst = arith.constant 0.000000e+00 : f32
    %0 = vector.broadcast %cst : f32 to vector<2x384xf32>
    %c0 = arith.constant 0 : index
    %c0_0 = arith.constant 0 : index
    %1 = vector.load %arg17[%c0, %c0_0] : memref<2x1705xf32, #tpu.memory_space<vmem>>, vector<2x384xf32>
    tpu.vector_store %arg17[%c0, %c0_0], %0 {strides = array<i32>} : memref<2x1705xf32, #tpu.memory_space<vmem>>, vector<2x384xf32>,
    %cst_1 = arith.constant 0.000000e+00 : f32
    %2 = vector.broadcast %cst_1 : f32 to vector<2x297xf32>
    %c0_2 = arith.constant 0 : index
    %c1408 = arith.constant 1408 : index
    %3 = vector.load %arg17[%c0_2, %c1408] : memref<2x1705xf32, #tpu.memory_space<vmem>>, vector<2x297xf32>
    tpu.vector_store %arg17[%c0_2, %c1408], %2 {strides = array<i32>} : memref<2x1705xf32, #tpu.memory_space<vmem>>, vector<2x297xf32>,
    %c0_3 = arith.constant 0 : index
    %c0_4 = arith.constant 0 : index
    %c0_5 = arith.constant 0 : index
    %4 = vector.load %arg1[%c0_3, %c0_4, %c0_5] : memref<1x8x1024xf32, #tpu.memory_space<vmem>>, vector<1x8x1024xf32>
    %cst_6 = arith.constant dense<0.000000e+00> : vector<1x1024xf32>
    %5 = vector.multi_reduction <add>, %4, %cst_6 [1] : vector<1x8x1024xf32> to vector<1x1024xf32>
    %cst_7 = arith.constant 8.000000e+00 : f32
    %6 = vector.broadcast %cst_7 : f32 to vector<1x1024xf32>
    %7 = arith.divf %5, %6 : vector<1x1024xf32>
    %c0_8 = arith.constant 0 : index
    %c384 = arith.constant 384 : index
    %8 = vector.load %arg17[%c0_8, %c384] : memref<2x1705xf32, #tpu.memory_space<vmem>>, vector<1x1024xf32>
    tpu.vector_store %arg17[%c0_8, %c384], %7 {strides = array<i32>} : memref<2x1705xf32, #tpu.memory_space<vmem>>, vector<1x1024xf32>,
    %cst_9 = arith.constant dense<0xFF800000> : vector<1x1024xf32>
    %9 = vector.multi_reduction <maximumf>, %4, %cst_9 [1] : vector<1x8x1024xf32> to vector<1x1024xf32>
    %c1 = arith.constant 1 : index
    %c384_10 = arith.constant 384 : index
    %10 = vector.load %arg17[%c1, %c384_10] : memref<2x1705xf32, #tpu.memory_space<vmem>>, vector<1x1024xf32>
    tpu.vector_store %arg17[%c1, %c384_10], %9 {strides = array<i32>} : memref<2x1705xf32, #tpu.memory_space<vmem>>, vector<1x1024xf32>,
    %c0_11 = arith.constant 0 : index
    %c87 = arith.constant 87 : index
    %11 = vector.load %arg17[%c0_11, %c87] : memref<2x1705xf32, #tpu.memory_space<vmem>>, vector<2x1042xf32>
    %c0_12 = arith.constant 0 : index
    %c0_13 = arith.constant 0 : index
    %12 = vector.load %arg20[%c0_12, %c0_13] : memref<14x1042xf32, #tpu.memory_space<vmem>>, vector<2x1042xf32>
    tpu.vector_store %arg20[%c0_12, %c0_13], %11 {strides = array<i32>} : memref<14x1042xf32, #tpu.memory_space<vmem>>, vector<2x1042xf32>,
    %c0_14 = arith.constant 0 : index
    %c183 = arith.constant 183 : index
    %13 = vector.load %arg17[%c0_14, %c183] : memref<2x1705xf32, #tpu.memory_space<vmem>>, vector<2x1042xf32>
    %c2 = arith.constant 2 : index
    %c0_15 = arith.constant 0 : index
    %14 = vector.load %arg20[%c2, %c0_15] : memref<14x1042xf32, #tpu.memory_space<vmem>>, vector<2x1042xf32>
    tpu.vector_store %arg20[%c2, %c0_15], %13 {strides = array<i32>} : memref<14x1042xf32, #tpu.memory_space<vmem>>, vector<2x1042xf32>,
    %c0_16 = arith.constant 0 : index
    %c279 = arith.constant 279 : index
    %15 = vector.load %arg17[%c0_16, %c279] : memref<2x1705xf32, #tpu.memory_space<vmem>>, vector<2x1042xf32>
    %c4 = arith.constant 4 : index
    %c0_17 = arith.constant 0 : index
    %16 = vector.load %arg20[%c4, %c0_17] : memref<14x1042xf32, #tpu.memory_space<vmem>>, vector<2x1042xf32>
    tpu.vector_store %arg20[%c4, %c0_17], %15 {strides = array<i32>} : memref<14x1042xf32, #tpu.memory_space<vmem>>, vector<2x1042xf32>,
    %c0_18 = arith.constant 0 : index
    %c375 = arith.constant 375 : index
    %17 = vector.load %arg17[%c0_18, %c375] : memref<2x1705xf32, #tpu.memory_space<vmem>>, vector<2x1042xf32>
    %c6 = arith.constant 6 : index
    %c0_19 = arith.constant 0 : index
    %18 = vector.load %arg20[%c6, %c0_19] : memref<14x1042xf32, #tpu.memory_space<vmem>>, vector<2x1042xf32>
    tpu.vector_store %arg20[%c6, %c0_19], %17 {strides = array<i32>} : memref<14x1042xf32, #tpu.memory_space<vmem>>, vector<2x1042xf32>,
    %c0_20 = arith.constant 0 : index
    %c471 = arith.constant 471 : index
    %19 = vector.load %arg17[%c0_20, %c471] : memref<2x1705xf32, #tpu.memory_space<vmem>>, vector<2x1042xf32>
    %c8 = arith.constant 8 : index
    %c0_21 = arith.constant 0 : index
    %20 = vector.load %arg20[%c8, %c0_21] : memref<14x1042xf32, #tpu.memory_space<vmem>>, vector<2x1042xf32>
    tpu.vector_store %arg20[%c8, %c0_21], %19 {strides = array<i32>} : memref<14x1042xf32, #tpu.memory_space<vmem>>, vector<2x1042xf32>,
    %c0_22 = arith.constant 0 : index
    %c567 = arith.constant 567 : index
    %21 = vector.load %arg17[%c0_22, %c567] : memref<2x1705xf32, #tpu.memory_space<vmem>>, vector<2x1042xf32>
    %c10 = arith.constant 10 : index
    %c0_23 = arith.constant 0 : index
    %22 = vector.load %arg20[%c10, %c0_23] : memref<14x1042xf32, #tpu.memory_space<vmem>>, vector<2x1042xf32>
    tpu.vector_store %arg20[%c10, %c0_23], %21 {strides = array<i32>} : memref<14x1042xf32, #tpu.memory_space<vmem>>, vector<2x1042xf32>,
    %c0_24 = arith.constant 0 : index
    %c663 = arith.constant 663 : index
    %23 = vector.load %arg17[%c0_24, %c663] : memref<2x1705xf32, #tpu.memory_space<vmem>>, vector<2x1042xf32>
    %c12 = arith.constant 12 : index
    %c0_25 = arith.constant 0 : index
    %24 = vector.load %arg20[%c12, %c0_25] : memref<14x1042xf32, #tpu.memory_space<vmem>>, vector<2x1042xf32>
    tpu.vector_store %arg20[%c12, %c0_25], %23 {strides = array<i32>} : memref<14x1042xf32, #tpu.memory_space<vmem>>, vector<2x1042xf32>,
    %c0_26 = arith.constant 0 : index
    %c0_27 = arith.constant 0 : index
    %25 = vector.load %arg6[%c0_26, %c0_27] : memref<7x14xf32, #tpu.memory_space<vmem>>, vector<7x14xf32>
    %c0_28 = arith.constant 0 : index
    %c0_29 = arith.constant 0 : index
    %26 = vector.load %arg20[%c0_28, %c0_29] : memref<14x1042xf32, #tpu.memory_space<vmem>>, vector<14x1042xf32>
    %cst_30 = arith.constant dense<0.000000e+00> : vector<7x1042xf32>
    %27 = tpu.matmul %25, %26, %cst_30 {dimension_numbers = #tpu.dot_dimension_numbers<[1], [0], [0], [1], [0, 0, 1, 1], [], []>} : vector<7x14xf32>, vector<14x1042xf32>, vector<7x1042xf32> -> vector<7x1042xf32>
    %28 = tpu.iota {dimensions = array<i32: 1>} : vector<1x1024xi32>
    %c31_i32 = arith.constant 31 : i32
    %29 = vector.broadcast %c31_i32 : i32 to vector<1x1024xi32>
    %30 = arith.andi %28, %29 : vector<1x1024xi32>
    %cst_31 = arith.constant 0.000000e+00 : f32
    %31 = vector.broadcast %cst_31 : f32 to vector<1x1024xf32>
    %32 = vector.extract_strided_slice %27 {offsets = [0, 0], sizes = [1, 1024], strides = [1, 1]} : vector<7x1042xf32> to vector<1x1024xf32>
    %c-9_i32 = arith.constant -9 : i32
    %33 = vector.broadcast %c-9_i32 : i32 to vector<1x1024xi32>
    %34 = arith.addi %30, %33 : vector<1x1024xi32>
    %c0_i32 = arith.constant 0 : i32
    %35 = vector.broadcast %c0_i32 : i32 to vector<1x1024xi32>
    %36 = arith.cmpi sge, %34, %35 : vector<1x1024xi32>
    %c-9_i32_32 = arith.constant -9 : i32
    %37 = vector.broadcast %c-9_i32_32 : i32 to vector<1x1024xi32>
    %38 = arith.addi %30, %37 : vector<1x1024xi32>
    %c32_i32 = arith.constant 32 : i32
    %39 = vector.broadcast %c32_i32 : i32 to vector<1x1024xi32>
    %40 = arith.cmpi slt, %38, %39 : vector<1x1024xi32>
    %41 = arith.andi %36, %40 : vector<1x1024xi1>
    %cst_33 = arith.constant 0.000000e+00 : f32
    %42 = vector.broadcast %cst_33 : f32 to vector<1x1024xf32>
    %43 = arith.select %41, %32, %42 : vector<1x1024xi1>, vector<1x1024xf32>
    %44 = arith.addf %31, %43 : vector<1x1024xf32>
    %45 = vector.extract_strided_slice %27 {offsets = [1, 3], sizes = [1, 1024], strides = [1, 1]} : vector<7x1042xf32> to vector<1x1024xf32>
    %c-6_i32 = arith.constant -6 : i32
    %46 = vector.broadcast %c-6_i32 : i32 to vector<1x1024xi32>
    %47 = arith.addi %30, %46 : vector<1x1024xi32>
    %c0_i32_34 = arith.constant 0 : i32
    %48 = vector.broadcast %c0_i32_34 : i32 to vector<1x1024xi32>
    %49 = arith.cmpi sge, %47, %48 : vector<1x1024xi32>
    %c-6_i32_35 = arith.constant -6 : i32
    %50 = vector.broadcast %c-6_i32_35 : i32 to vector<1x1024xi32>
    %51 = arith.addi %30, %50 : vector<1x1024xi32>
    %c32_i32_36 = arith.constant 32 : i32
    %52 = vector.broadcast %c32_i32_36 : i32 to vector<1x1024xi32>
    %53 = arith.cmpi slt, %51, %52 : vector<1x1024xi32>
    %54 = arith.andi %49, %53 : vector<1x1024xi1>
    %cst_37 = arith.constant 0.000000e+00 : f32
    %55 = vector.broadcast %cst_37 : f32 to vector<1x1024xf32>
    %56 = arith.select %54, %45, %55 : vector<1x1024xi1>, vector<1x1024xf32>
    %57 = arith.addf %44, %56 : vector<1x1024xf32>
    %58 = vector.extract_strided_slice %27 {offsets = [2, 6], sizes = [1, 1024], strides = [1, 1]} : vector<7x1042xf32> to vector<1x1024xf32>
    %c-3_i32 = arith.constant -3 : i32
    %59 = vector.broadcast %c-3_i32 : i32 to vector<1x1024xi32>
    %60 = arith.addi %30, %59 : vector<1x1024xi32>
    %c0_i32_38 = arith.constant 0 : i32
    %61 = vector.broadcast %c0_i32_38 : i32 to vector<1x1024xi32>
    %62 = arith.cmpi sge, %60, %61 : vector<1x1024xi32>
    %c-3_i32_39 = arith.constant -3 : i32
    %63 = vector.broadcast %c-3_i32_39 : i32 to vector<1x1024xi32>
    %64 = arith.addi %30, %63 : vector<1x1024xi32>
    %c32_i32_40 = arith.constant 32 : i32
    %65 = vector.broadcast %c32_i32_40 : i32 to vector<1x1024xi32>
    %66 = arith.cmpi slt, %64, %65 : vector<1x1024xi32>
    %67 = arith.andi %62, %66 : vector<1x1024xi1>
    %cst_41 = arith.constant 0.000000e+00 : f32
    %68 = vector.broadcast %cst_41 : f32 to vector<1x1024xf32>
    %69 = arith.select %67, %58, %68 : vector<1x1024xi1>, vector<1x1024xf32>
    %70 = arith.addf %57, %69 : vector<1x1024xf32>
    %71 = vector.extract_strided_slice %27 {offsets = [3, 9], sizes = [1, 1024], strides = [1, 1]} : vector<7x1042xf32> to vector<1x1024xf32>
    %72 = arith.addf %70, %71 : vector<1x1024xf32>
    %73 = vector.extract_strided_slice %27 {offsets = [4, 12], sizes = [1, 1024], strides = [1, 1]} : vector<7x1042xf32> to vector<1x1024xf32>
    %c3_i32 = arith.constant 3 : i32
    %74 = vector.broadcast %c3_i32 : i32 to vector<1x1024xi32>
    %75 = arith.addi %30, %74 : vector<1x1024xi32>
    %c0_i32_42 = arith.constant 0 : i32
    %76 = vector.broadcast %c0_i32_42 : i32 to vector<1x1024xi32>
    %77 = arith.cmpi sge, %75, %76 : vector<1x1024xi32>
    %c3_i32_43 = arith.constant 3 : i32
    %78 = vector.broadcast %c3_i32_43 : i32 to vector<1x1024xi32>
    %79 = arith.addi %30, %78 : vector<1x1024xi32>
    %c32_i32_44 = arith.constant 32 : i32
    %80 = vector.broadcast %c32_i32_44 : i32 to vector<1x1024xi32>
    %81 = arith.cmpi slt, %79, %80 : vector<1x1024xi32>
    %82 = arith.andi %77, %81 : vector<1x1024xi1>
    %cst_45 = arith.constant 0.000000e+00 : f32
    %83 = vector.broadcast %cst_45 : f32 to vector<1x1024xf32>
    %84 = arith.select %82, %73, %83 : vector<1x1024xi1>, vector<1x1024xf32>
    %85 = arith.addf %72, %84 : vector<1x1024xf32>
    %86 = vector.extract_strided_slice %27 {offsets = [5, 15], sizes = [1, 1024], strides = [1, 1]} : vector<7x1042xf32> to vector<1x1024xf32>
    %c6_i32 = arith.constant 6 : i32
    %87 = vector.broadcast %c6_i32 : i32 to vector<1x1024xi32>
    %88 = arith.addi %30, %87 : vector<1x1024xi32>
    %c0_i32_46 = arith.constant 0 : i32
    %89 = vector.broadcast %c0_i32_46 : i32 to vector<1x1024xi32>
    %90 = arith.cmpi sge, %88, %89 : vector<1x1024xi32>
    %c6_i32_47 = arith.constant 6 : i32
    %91 = vector.broadcast %c6_i32_47 : i32 to vector<1x1024xi32>
    %92 = arith.addi %30, %91 : vector<1x1024xi32>
    %c32_i32_48 = arith.constant 32 : i32
    %93 = vector.broadcast %c32_i32_48 : i32 to vector<1x1024xi32>
    %94 = arith.cmpi slt, %92, %93 : vector<1x1024xi32>
    %95 = arith.andi %90, %94 : vector<1x1024xi1>
    %cst_49 = arith.constant 0.000000e+00 : f32
    %96 = vector.broadcast %cst_49 : f32 to vector<1x1024xf32>
    %97 = arith.select %95, %86, %96 : vector<1x1024xi1>, vector<1x1024xf32>
    %98 = arith.addf %85, %97 : vector<1x1024xf32>
    %99 = vector.extract_strided_slice %27 {offsets = [6, 18], sizes = [1, 1024], strides = [1, 1]} : vector<7x1042xf32> to vector<1x1024xf32>
    %c9_i32 = arith.constant 9 : i32
    %100 = vector.broadcast %c9_i32 : i32 to vector<1x1024xi32>
    %101 = arith.addi %30, %100 : vector<1x1024xi32>
    %c0_i32_50 = arith.constant 0 : i32
    %102 = vector.broadcast %c0_i32_50 : i32 to vector<1x1024xi32>
    %103 = arith.cmpi sge, %101, %102 : vector<1x1024xi32>
    %c9_i32_51 = arith.constant 9 : i32
    %104 = vector.broadcast %c9_i32_51 : i32 to vector<1x1024xi32>
    %105 = arith.addi %30, %104 : vector<1x1024xi32>
    %c32_i32_52 = arith.constant 32 : i32
    %106 = vector.broadcast %c32_i32_52 : i32 to vector<1x1024xi32>
    %107 = arith.cmpi slt, %105, %106 : vector<1x1024xi32>
    %108 = arith.andi %103, %107 : vector<1x1024xi1>
    %cst_53 = arith.constant 0.000000e+00 : f32
    %109 = vector.broadcast %cst_53 : f32 to vector<1x1024xf32>
    %110 = arith.select %108, %99, %109 : vector<1x1024xi1>, vector<1x1024xf32>
    %111 = arith.addf %98, %110 : vector<1x1024xf32>
    %c0_54 = arith.constant 0 : index
    %112 = memref.load %arg11[%c0_54] : memref<1xf32, #tpu.memory_space<smem>>
    %113 = vector.broadcast %112 : f32 to vector<1x1024xf32>
    %114 = arith.addf %111, %113 : vector<1x1024xf32>
    %115 = arith.negf %114 : vector<1x1024xf32>
    %116 = math.exp %115 : vector<1x1024xf32>
    %cst_55 = arith.constant 1.000000e+00 : f32
    %117 = vector.broadcast %cst_55 : f32 to vector<1x1024xf32>
    %118 = arith.addf %117, %116 : vector<1x1024xf32>
    %119 = arith.divf %117, %118 : vector<1x1024xf32>
    %c0_56 = arith.constant 0 : index
    %c0_57 = arith.constant 0 : index
    %120 = vector.load %arg23[%c0_56, %c0_57] : memref<1x1024xf32, #tpu.memory_space<vmem>>, vector<1x1024xf32>
    tpu.vector_store %arg23[%c0_56, %c0_57], %119 {strides = array<i32>} : memref<1x1024xf32, #tpu.memory_space<vmem>>, vector<1x1024xf32>,
    %c0_58 = arith.constant 0 : index
    %c0_59 = arith.constant 0 : index
    %c0_60 = arith.constant 0 : index
    %121 = vector.load %arg1[%c0_58, %c0_59, %c0_60] : memref<1x8x1024xf32, #tpu.memory_space<vmem>>, vector<1x8x1024xf32>
    %cst_61 = arith.constant 1.000000e+00 : f32
    %122 = vector.broadcast %cst_61 : f32 to vector<1x1024xf32>
    %123 = arith.addf %122, %119 : vector<1x1024xf32>
    %124 = vector.shape_cast %123 : vector<1x1024xf32> to vector<1x1x1024xf32>
    %125 = vector.broadcast %124 : vector<1x1x1024xf32> to vector<1x8x1024xf32>
    %126 = arith.mulf %125, %121 : vector<1x8x1024xf32>
    %cst_62 = arith.constant dense<0.000000e+00> : vector<1x8xf32>
    %127 = vector.multi_reduction <add>, %126, %cst_62 [2] : vector<1x8x1024xf32> to vector<1x8xf32>
    %128 = vector.shape_cast %127 : vector<1x8xf32> to vector<1x8x1xf32>
    %cst_63 = arith.constant 9.765625E-4 : f32
    %129 = vector.broadcast %cst_63 : f32 to vector<1x8x1xf32>
    %130 = arith.mulf %128, %129 : vector<1x8x1xf32>
    %131 = vector.shape_cast %130 : vector<1x8x1xf32> to vector<8x1xf32>
    %c0_64 = arith.constant 0 : index
    %c0_65 = arith.constant 0 : index
    %132 = vector.load %arg26[%c0_64, %c0_65] : memref<128x1xf32, #tpu.memory_space<vmem>>, vector<8x1xf32>
    tpu.vector_store %arg26[%c0_64, %c0_65], %131 {strides = array<i32>} : memref<128x1xf32, #tpu.memory_space<vmem>>, vector<8x1xf32>,
    %cst_66 = arith.constant 0.000000e+00 : f32
    %133 = vector.broadcast %cst_66 : f32 to vector<4x256xf32>
    %c0_67 = arith.constant 0 : index
    %c0_68 = arith.constant 0 : index
    %134 = vector.load %arg18[%c0_67, %c0_68] : memref<4x665xf32, #tpu.memory_space<vmem>>, vector<4x256xf32>
    tpu.vector_store %arg18[%c0_67, %c0_68], %133 {strides = array<i32>} : memref<4x665xf32, #tpu.memory_space<vmem>>, vector<4x256xf32>,
    %cst_69 = arith.constant 0.000000e+00 : f32
    %135 = vector.broadcast %cst_69 : f32 to vector<4x153xf32>
    %c0_70 = arith.constant 0 : index
    %c512 = arith.constant 512 : index
    %136 = vector.load %arg18[%c0_70, %c512] : memref<4x665xf32, #tpu.memory_space<vmem>>, vector<4x153xf32>
    tpu.vector_store %arg18[%c0_70, %c512], %135 {strides = array<i32>} : memref<4x665xf32, #tpu.memory_space<vmem>>, vector<4x153xf32>,
    %c0_71 = arith.constant 0 : index
    %c0_72 = arith.constant 0 : index
    %c0_73 = arith.constant 0 : index
    %137 = vector.load %arg2[%c0_71, %c0_72, %c0_73] : memref<1x16x256xf32, #tpu.memory_space<vmem>>, vector<1x16x256xf32>
    %cst_74 = arith.constant dense<0.000000e+00> : vector<1x256xf32>
    %138 = vector.multi_reduction <add>, %137, %cst_74 [1] : vector<1x16x256xf32> to vector<1x256xf32>
    %cst_75 = arith.constant 1.600000e+01 : f32
    %139 = vector.broadcast %cst_75 : f32 to vector<1x256xf32>
    %140 = arith.divf %138, %139 : vector<1x256xf32>
    %c0_76 = arith.constant 0 : index
    %c256 = arith.constant 256 : index
    %141 = vector.load %arg18[%c0_76, %c256] : memref<4x665xf32, #tpu.memory_space<vmem>>, vector<1x256xf32>
    tpu.vector_store %arg18[%c0_76, %c256], %140 {strides = array<i32>} : memref<4x665xf32, #tpu.memory_space<vmem>>, vector<1x256xf32>,
    %cst_77 = arith.constant dense<0xFF800000> : vector<1x256xf32>
    %142 = vector.multi_reduction <maximumf>, %137, %cst_77 [1] : vector<1x16x256xf32> to vector<1x256xf32>
    %c1_78 = arith.constant 1 : index
    %c256_79 = arith.constant 256 : index
    %143 = vector.load %arg18[%c1_78, %c256_79] : memref<4x665xf32, #tpu.memory_space<vmem>>, vector<1x256xf32>
    tpu.vector_store %arg18[%c1_78, %c256_79], %142 {strides = array<i32>} : memref<4x665xf32, #tpu.memory_space<vmem>>, vector<1x256xf32>,
    %c0_80 = arith.constant 0 : index
    %c0_81 = arith.constant 0 : index
    %c0_82 = arith.constant 0 : index
    %144 = vector.load %arg3[%c0_80, %c0_81, %c0_82] : memref<1x24x256xf32, #tpu.memory_space<vmem>>, vector<1x24x256xf32>
    %cst_83 = arith.constant dense<0.000000e+00> : vector<1x256xf32>
    %145 = vector.multi_reduction <add>, %144, %cst_83 [1] : vector<1x24x256xf32> to vector<1x256xf32>
    %cst_84 = arith.constant 2.400000e+01 : f32
    %146 = vector.broadcast %cst_84 : f32 to vector<1x256xf32>
    %147 = arith.divf %145, %146 : vector<1x256xf32>
    %c2_85 = arith.constant 2 : index
    %c256_86 = arith.constant 256 : index
    %148 = vector.load %arg18[%c2_85, %c256_86] : memref<4x665xf32, #tpu.memory_space<vmem>>, vector<1x256xf32>
    tpu.vector_store %arg18[%c2_85, %c256_86], %147 {strides = array<i32>} : memref<4x665xf32, #tpu.memory_space<vmem>>, vector<1x256xf32>,
    %cst_87 = arith.constant dense<0xFF800000> : vector<1x256xf32>
    %149 = vector.multi_reduction <maximumf>, %144, %cst_87 [1] : vector<1x24x256xf32> to vector<1x256xf32>
    %c3 = arith.constant 3 : index
    %c256_88 = arith.constant 256 : index
    %150 = vector.load %arg18[%c3, %c256_88] : memref<4x665xf32, #tpu.memory_space<vmem>>, vector<1x256xf32>
    tpu.vector_store %arg18[%c3, %c256_88], %149 {strides = array<i32>} : memref<4x665xf32, #tpu.memory_space<vmem>>, vector<1x256xf32>,
    %c0_89 = arith.constant 0 : index
    %c103 = arith.constant 103 : index
    %151 = vector.load %arg18[%c0_89, %c103] : memref<4x665xf32, #tpu.memory_space<vmem>>, vector<4x274xf32>
    %c0_90 = arith.constant 0 : index
    %c0_91 = arith.constant 0 : index
    %152 = vector.load %arg21[%c0_90, %c0_91] : memref<28x274xf32, #tpu.memory_space<vmem>>, vector<4x274xf32>
    tpu.vector_store %arg21[%c0_90, %c0_91], %151 {strides = array<i32>} : memref<28x274xf32, #tpu.memory_space<vmem>>, vector<4x274xf32>,
    %c0_92 = arith.constant 0 : index
    %c151 = arith.constant 151 : index
    %153 = vector.load %arg18[%c0_92, %c151] : memref<4x665xf32, #tpu.memory_space<vmem>>, vector<4x274xf32>
    %c4_93 = arith.constant 4 : index
    %c0_94 = arith.constant 0 : index
    %154 = vector.load %arg21[%c4_93, %c0_94] : memref<28x274xf32, #tpu.memory_space<vmem>>, vector<4x274xf32>
    tpu.vector_store %arg21[%c4_93, %c0_94], %153 {strides = array<i32>} : memref<28x274xf32, #tpu.memory_space<vmem>>, vector<4x274xf32>,
    %c0_95 = arith.constant 0 : index
    %c199 = arith.constant 199 : index
    %155 = vector.load %arg18[%c0_95, %c199] : memref<4x665xf32, #tpu.memory_space<vmem>>, vector<4x274xf32>
    %c8_96 = arith.constant 8 : index
    %c0_97 = arith.constant 0 : index
    %156 = vector.load %arg21[%c8_96, %c0_97] : memref<28x274xf32, #tpu.memory_space<vmem>>, vector<4x274xf32>
    tpu.vector_store %arg21[%c8_96, %c0_97], %155 {strides = array<i32>} : memref<28x274xf32, #tpu.memory_space<vmem>>, vector<4x274xf32>,
    %c0_98 = arith.constant 0 : index
    %c247 = arith.constant 247 : index
    %157 = vector.load %arg18[%c0_98, %c247] : memref<4x665xf32, #tpu.memory_space<vmem>>, vector<4x274xf32>
    %c12_99 = arith.constant 12 : index
    %c0_100 = arith.constant 0 : index
    %158 = vector.load %arg21[%c12_99, %c0_100] : memref<28x274xf32, #tpu.memory_space<vmem>>, vector<4x274xf32>
    tpu.vector_store %arg21[%c12_99, %c0_100], %157 {strides = array<i32>} : memref<28x274xf32, #tpu.memory_space<vmem>>, vector<4x274xf32>,
    %c0_101 = arith.constant 0 : index
    %c295 = arith.constant 295 : index
    %159 = vector.load %arg18[%c0_101, %c295] : memref<4x665xf32, #tpu.memory_space<vmem>>, vector<4x274xf32>
    %c16 = arith.constant 16 : index
    %c0_102 = arith.constant 0 : index
    %160 = vector.load %arg21[%c16, %c0_102] : memref<28x274xf32, #tpu.memory_space<vmem>>, vector<4x274xf32>
    tpu.vector_store %arg21[%c16, %c0_102], %159 {strides = array<i32>} : memref<28x274xf32, #tpu.memory_space<vmem>>, vector<4x274xf32>,
    %c0_103 = arith.constant 0 : index
    %c343 = arith.constant 343 : index
    %161 = vector.load %arg18[%c0_103, %c343] : memref<4x665xf32, #tpu.memory_space<vmem>>, vector<4x274xf32>
    %c20 = arith.constant 20 : index
    %c0_104 = arith.constant 0 : index
    %162 = vector.load %arg21[%c20, %c0_104] : memref<28x274xf32, #tpu.memory_space<vmem>>, vector<4x274xf32>
    tpu.vector_store %arg21[%c20, %c0_104], %161 {strides = array<i32>} : memref<28x274xf32, #tpu.memory_space<vmem>>, vector<4x274xf32>,
    %c0_105 = arith.constant 0 : index
    %c391 = arith.constant 391 : index
    %163 = vector.load %arg18[%c0_105, %c391] : memref<4x665xf32, #tpu.memory_space<vmem>>, vector<4x274xf32>
    %c24 = arith.constant 24 : index
    %c0_106 = arith.constant 0 : index
    %164 = vector.load %arg21[%c24, %c0_106] : memref<28x274xf32, #tpu.memory_space<vmem>>, vector<4x274xf32>
    tpu.vector_store %arg21[%c24, %c0_106], %163 {strides = array<i32>} : memref<28x274xf32, #tpu.memory_space<vmem>>, vector<4x274xf32>,
    %c0_107 = arith.constant 0 : index
    %c0_108 = arith.constant 0 : index
    %165 = vector.load %arg7[%c0_107, %c0_108] : memref<14x28xf32, #tpu.memory_space<vmem>>, vector<14x28xf32>
    %c0_109 = arith.constant 0 : index
    %c0_110 = arith.constant 0 : index
    %166 = vector.load %arg21[%c0_109, %c0_110] : memref<28x274xf32, #tpu.memory_space<vmem>>, vector<28x274xf32>
    %cst_111 = arith.constant dense<0.000000e+00> : vector<14x274xf32>
    %167 = tpu.matmul %165, %166, %cst_111 {dimension_numbers = #tpu.dot_dimension_numbers<[1], [0], [0], [1], [0, 0, 1, 1], [], []>} : vector<14x28xf32>, vector<28x274xf32>, vector<14x274xf32> -> vector<14x274xf32>
    %168 = tpu.iota {dimensions = array<i32: 1>} : vector<1x256xi32>
    %c15_i32 = arith.constant 15 : i32
    %169 = vector.broadcast %c15_i32 : i32 to vector<1x256xi32>
    %170 = arith.andi %168, %169 : vector<1x256xi32>
    %cst_112 = arith.constant 0.000000e+00 : f32
    %171 = vector.broadcast %cst_112 : f32 to vector<2x256xf32>
    %172 = vector.extract_strided_slice %167 {offsets = [0, 0], sizes = [2, 256], strides = [1, 1]} : vector<14x274xf32> to vector<2x256xf32>
    %c-9_i32_113 = arith.constant -9 : i32
    %173 = vector.broadcast %c-9_i32_113 : i32 to vector<1x256xi32>
    %174 = arith.addi %170, %173 : vector<1x256xi32>
    %c0_i32_114 = arith.constant 0 : i32
    %175 = vector.broadcast %c0_i32_114 : i32 to vector<1x256xi32>
    %176 = arith.cmpi sge, %174, %175 : vector<1x256xi32>
    %c-9_i32_115 = arith.constant -9 : i32
    %177 = vector.broadcast %c-9_i32_115 : i32 to vector<1x256xi32>
    %178 = arith.addi %170, %177 : vector<1x256xi32>
    %c16_i32 = arith.constant 16 : i32
    %179 = vector.broadcast %c16_i32 : i32 to vector<1x256xi32>
    %180 = arith.cmpi slt, %178, %179 : vector<1x256xi32>
    %181 = arith.andi %176, %180 : vector<1x256xi1>
    %cst_116 = arith.constant 0.000000e+00 : f32
    %182 = vector.shape_cast %181 : vector<1x256xi1> to vector<1x256xi1>
    %183 = vector.broadcast %182 : vector<1x256xi1> to vector<2x256xi1>
    %184 = vector.broadcast %cst_116 : f32 to vector<2x256xf32>
    %185 = arith.select %183, %172, %184 : vector<2x256xi1>, vector<2x256xf32>
    %186 = arith.addf %171, %185 : vector<2x256xf32>
    %187 = vector.extract_strided_slice %167 {offsets = [2, 3], sizes = [2, 256], strides = [1, 1]} : vector<14x274xf32> to vector<2x256xf32>
    %c-6_i32_117 = arith.constant -6 : i32
    %188 = vector.broadcast %c-6_i32_117 : i32 to vector<1x256xi32>
    %189 = arith.addi %170, %188 : vector<1x256xi32>
    %c0_i32_118 = arith.constant 0 : i32
    %190 = vector.broadcast %c0_i32_118 : i32 to vector<1x256xi32>
    %191 = arith.cmpi sge, %189, %190 : vector<1x256xi32>
    %c-6_i32_119 = arith.constant -6 : i32
    %192 = vector.broadcast %c-6_i32_119 : i32 to vector<1x256xi32>
    %193 = arith.addi %170, %192 : vector<1x256xi32>
    %c16_i32_120 = arith.constant 16 : i32
    %194 = vector.broadcast %c16_i32_120 : i32 to vector<1x256xi32>
    %195 = arith.cmpi slt, %193, %194 : vector<1x256xi32>
    %196 = arith.andi %191, %195 : vector<1x256xi1>
    %cst_121 = arith.constant 0.000000e+00 : f32
    %197 = vector.shape_cast %196 : vector<1x256xi1> to vector<1x256xi1>
    %198 = vector.broadcast %197 : vector<1x256xi1> to vector<2x256xi1>
    %199 = vector.broadcast %cst_121 : f32 to vector<2x256xf32>
    %200 = arith.select %198, %187, %199 : vector<2x256xi1>, vector<2x256xf32>
    %201 = arith.addf %186, %200 : vector<2x256xf32>
    %202 = vector.extract_strided_slice %167 {offsets = [4, 6], sizes = [2, 256], strides = [1, 1]} : vector<14x274xf32> to vector<2x256xf32>
    %c-3_i32_122 = arith.constant -3 : i32
    %203 = vector.broadcast %c-3_i32_122 : i32 to vector<1x256xi32>
    %204 = arith.addi %170, %203 : vector<1x256xi32>
    %c0_i32_123 = arith.constant 0 : i32
    %205 = vector.broadcast %c0_i32_123 : i32 to vector<1x256xi32>
    %206 = arith.cmpi sge, %204, %205 : vector<1x256xi32>
    %c-3_i32_124 = arith.constant -3 : i32
    %207 = vector.broadcast %c-3_i32_124 : i32 to vector<1x256xi32>
    %208 = arith.addi %170, %207 : vector<1x256xi32>
    %c16_i32_125 = arith.constant 16 : i32
    %209 = vector.broadcast %c16_i32_125 : i32 to vector<1x256xi32>
    %210 = arith.cmpi slt, %208, %209 : vector<1x256xi32>
    %211 = arith.andi %206, %210 : vector<1x256xi1>
    %cst_126 = arith.constant 0.000000e+00 : f32
    %212 = vector.shape_cast %211 : vector<1x256xi1> to vector<1x256xi1>
    %213 = vector.broadcast %212 : vector<1x256xi1> to vector<2x256xi1>
    %214 = vector.broadcast %cst_126 : f32 to vector<2x256xf32>
    %215 = arith.select %213, %202, %214 : vector<2x256xi1>, vector<2x256xf32>
    %216 = arith.addf %201, %215 : vector<2x256xf32>
    %217 = vector.extract_strided_slice %167 {offsets = [6, 9], sizes = [2, 256], strides = [1, 1]} : vector<14x274xf32> to vector<2x256xf32>
    %218 = arith.addf %216, %217 : vector<2x256xf32>
    %219 = vector.extract_strided_slice %167 {offsets = [8, 12], sizes = [2, 256], strides = [1, 1]} : vector<14x274xf32> to vector<2x256xf32>
    %c3_i32_127 = arith.constant 3 : i32
    %220 = vector.broadcast %c3_i32_127 : i32 to vector<1x256xi32>
    %221 = arith.addi %170, %220 : vector<1x256xi32>
    %c0_i32_128 = arith.constant 0 : i32
    %222 = vector.broadcast %c0_i32_128 : i32 to vector<1x256xi32>
    %223 = arith.cmpi sge, %221, %222 : vector<1x256xi32>
    %c3_i32_129 = arith.constant 3 : i32
    %224 = vector.broadcast %c3_i32_129 : i32 to vector<1x256xi32>
    %225 = arith.addi %170, %224 : vector<1x256xi32>
    %c16_i32_130 = arith.constant 16 : i32
    %226 = vector.broadcast %c16_i32_130 : i32 to vector<1x256xi32>
    %227 = arith.cmpi slt, %225, %226 : vector<1x256xi32>
    %228 = arith.andi %223, %227 : vector<1x256xi1>
    %cst_131 = arith.constant 0.000000e+00 : f32
    %229 = vector.shape_cast %228 : vector<1x256xi1> to vector<1x256xi1>
    %230 = vector.broadcast %229 : vector<1x256xi1> to vector<2x256xi1>
    %231 = vector.broadcast %cst_131 : f32 to vector<2x256xf32>
    %232 = arith.select %230, %219, %231 : vector<2x256xi1>, vector<2x256xf32>
    %233 = arith.addf %218, %232 : vector<2x256xf32>
    %234 = vector.extract_strided_slice %167 {offsets = [10, 15], sizes = [2, 256], strides = [1, 1]} : vector<14x274xf32> to vector<2x256xf32>
    %c6_i32_132 = arith.constant 6 : i32
    %235 = vector.broadcast %c6_i32_132 : i32 to vector<1x256xi32>
    %236 = arith.addi %170, %235 : vector<1x256xi32>
    %c0_i32_133 = arith.constant 0 : i32
    %237 = vector.broadcast %c0_i32_133 : i32 to vector<1x256xi32>
    %238 = arith.cmpi sge, %236, %237 : vector<1x256xi32>
    %c6_i32_134 = arith.constant 6 : i32
    %239 = vector.broadcast %c6_i32_134 : i32 to vector<1x256xi32>
    %240 = arith.addi %170, %239 : vector<1x256xi32>
    %c16_i32_135 = arith.constant 16 : i32
    %241 = vector.broadcast %c16_i32_135 : i32 to vector<1x256xi32>
    %242 = arith.cmpi slt, %240, %241 : vector<1x256xi32>
    %243 = arith.andi %238, %242 : vector<1x256xi1>
    %cst_136 = arith.constant 0.000000e+00 : f32
    %244 = vector.shape_cast %243 : vector<1x256xi1> to vector<1x256xi1>
    %245 = vector.broadcast %244 : vector<1x256xi1> to vector<2x256xi1>
    %246 = vector.broadcast %cst_136 : f32 to vector<2x256xf32>
    %247 = arith.select %245, %234, %246 : vector<2x256xi1>, vector<2x256xf32>
    %248 = arith.addf %233, %247 : vector<2x256xf32>
    %249 = vector.extract_strided_slice %167 {offsets = [12, 18], sizes = [2, 256], strides = [1, 1]} : vector<14x274xf32> to vector<2x256xf32>
    %c9_i32_137 = arith.constant 9 : i32
    %250 = vector.broadcast %c9_i32_137 : i32 to vector<1x256xi32>
    %251 = arith.addi %170, %250 : vector<1x256xi32>
    %c0_i32_138 = arith.constant 0 : i32
    %252 = vector.broadcast %c0_i32_138 : i32 to vector<1x256xi32>
    %253 = arith.cmpi sge, %251, %252 : vector<1x256xi32>
    %c9_i32_139 = arith.constant 9 : i32
    %254 = vector.broadcast %c9_i32_139 : i32 to vector<1x256xi32>
    %255 = arith.addi %170, %254 : vector<1x256xi32>
    %c16_i32_140 = arith.constant 16 : i32
    %256 = vector.broadcast %c16_i32_140 : i32 to vector<1x256xi32>
    %257 = arith.cmpi slt, %255, %256 : vector<1x256xi32>
    %258 = arith.andi %253, %257 : vector<1x256xi1>
    %cst_141 = arith.constant 0.000000e+00 : f32
    %259 = vector.shape_cast %258 : vector<1x256xi1> to vector<1x256xi1>
    %260 = vector.broadcast %259 : vector<1x256xi1> to vector<2x256xi1>
    %261 = vector.broadcast %cst_141 : f32 to vector<2x256xf32>
    %262 = arith.select %260, %249, %261 : vector<2x256xi1>, vector<2x256xf32>
    %263 = arith.addf %248, %262 : vector<2x256xf32>
    %c0_142 = arith.constant 0 : index
    %264 = memref.load %arg11[%c0_142] : memref<1xf32, #tpu.memory_space<smem>>
    %265 = vector.broadcast %264 : f32 to vector<2x256xf32>
    %266 = arith.addf %263, %265 : vector<2x256xf32>
    %267 = arith.negf %266 : vector<2x256xf32>
    %268 = math.exp %267 : vector<2x256xf32>
    %cst_143 = arith.constant 1.000000e+00 : f32
    %269 = vector.broadcast %cst_143 : f32 to vector<2x256xf32>
    %270 = arith.addf %269, %268 : vector<2x256xf32>
    %271 = arith.divf %269, %270 : vector<2x256xf32>
    %c0_144 = arith.constant 0 : index
    %c0_145 = arith.constant 0 : index
    %272 = vector.load %arg24[%c0_144, %c0_145] : memref<2x256xf32, #tpu.memory_space<vmem>>, vector<2x256xf32>
    tpu.vector_store %arg24[%c0_144, %c0_145], %271 {strides = array<i32>} : memref<2x256xf32, #tpu.memory_space<vmem>>, vector<2x256xf32>,
    %c0_146 = arith.constant 0 : index
    %c0_147 = arith.constant 0 : index
    %c0_148 = arith.constant 0 : index
    %273 = vector.load %arg2[%c0_146, %c0_147, %c0_148] : memref<1x16x256xf32, #tpu.memory_space<vmem>>, vector<1x16x256xf32>
    %274 = vector.extract_strided_slice %271 {offsets = [0, 0], sizes = [1, 256], strides = [1, 1]} : vector<2x256xf32> to vector<1x256xf32>
    %cst_149 = arith.constant 1.000000e+00 : f32
    %275 = vector.broadcast %cst_149 : f32 to vector<1x256xf32>
    %276 = arith.addf %275, %274 : vector<1x256xf32>
    %277 = vector.shape_cast %276 : vector<1x256xf32> to vector<1x1x256xf32>
    %278 = vector.broadcast %277 : vector<1x1x256xf32> to vector<1x16x256xf32>
    %279 = arith.mulf %278, %273 : vector<1x16x256xf32>
    %cst_150 = arith.constant dense<0.000000e+00> : vector<1x16xf32>
    %280 = vector.multi_reduction <add>, %279, %cst_150 [2] : vector<1x16x256xf32> to vector<1x16xf32>
    %281 = vector.shape_cast %280 : vector<1x16xf32> to vector<1x16x1xf32>
    %cst_151 = arith.constant 3.906250e-03 : f32
    %282 = vector.broadcast %cst_151 : f32 to vector<1x16x1xf32>
    %283 = arith.mulf %281, %282 : vector<1x16x1xf32>
    %284 = vector.shape_cast %283 : vector<1x16x1xf32> to vector<16x1xf32>
    %c8_152 = arith.constant 8 : index
    %c0_153 = arith.constant 0 : index
    %285 = vector.load %arg26[%c8_152, %c0_153] : memref<128x1xf32, #tpu.memory_space<vmem>>, vector<16x1xf32>
    tpu.vector_store %arg26[%c8_152, %c0_153], %284 {strides = array<i32>} : memref<128x1xf32, #tpu.memory_space<vmem>>, vector<16x1xf32>,
    %c0_154 = arith.constant 0 : index
    %c0_155 = arith.constant 0 : index
    %c0_156 = arith.constant 0 : index
    %286 = vector.load %arg3[%c0_154, %c0_155, %c0_156] : memref<1x24x256xf32, #tpu.memory_space<vmem>>, vector<1x24x256xf32>
    %287 = vector.extract_strided_slice %271 {offsets = [1, 0], sizes = [1, 256], strides = [1, 1]} : vector<2x256xf32> to vector<1x256xf32>
    %cst_157 = arith.constant 1.000000e+00 : f32
    %288 = vector.broadcast %cst_157 : f32 to vector<1x256xf32>
    %289 = arith.addf %288, %287 : vector<1x256xf32>
    %290 = vector.shape_cast %289 : vector<1x256xf32> to vector<1x1x256xf32>
    %291 = vector.broadcast %290 : vector<1x1x256xf32> to vector<1x24x256xf32>
    %292 = arith.mulf %291, %286 : vector<1x24x256xf32>
    %cst_158 = arith.constant dense<0.000000e+00> : vector<1x24xf32>
    %293 = vector.multi_reduction <add>, %292, %cst_158 [2] : vector<1x24x256xf32> to vector<1x24xf32>
    %294 = vector.shape_cast %293 : vector<1x24xf32> to vector<1x24x1xf32>
    %cst_159 = arith.constant 3.906250e-03 : f32
    %295 = vector.broadcast %cst_159 : f32 to vector<1x24x1xf32>
    %296 = arith.mulf %294, %295 : vector<1x24x1xf32>
    %297 = vector.shape_cast %296 : vector<1x24x1xf32> to vector<24x1xf32>
    %c24_160 = arith.constant 24 : index
    %c0_161 = arith.constant 0 : index
    %298 = vector.load %arg26[%c24_160, %c0_161] : memref<128x1xf32, #tpu.memory_space<vmem>>, vector<24x1xf32>
    tpu.vector_store %arg26[%c24_160, %c0_161], %297 {strides = array<i32>} : memref<128x1xf32, #tpu.memory_space<vmem>>, vector<24x1xf32>,
    %cst_162 = arith.constant 0.000000e+00 : f32
    %299 = vector.broadcast %cst_162 : f32 to vector<4x128xf32>
    %c0_163 = arith.constant 0 : index
    %c0_164 = arith.constant 0 : index
    %300 = vector.load %arg19[%c0_163, %c0_164] : memref<4x273xf32, #tpu.memory_space<vmem>>, vector<4x128xf32>
    tpu.vector_store %arg19[%c0_163, %c0_164], %299 {strides = array<i32>} : memref<4x273xf32, #tpu.memory_space<vmem>>, vector<4x128xf32>,
    %cst_165 = arith.constant 0.000000e+00 : f32
    %301 = vector.broadcast %cst_165 : f32 to vector<4x81xf32>
    %c0_166 = arith.constant 0 : index
    %c192 = arith.constant 192 : index
    %302 = vector.load %arg19[%c0_166, %c192] : memref<4x273xf32, #tpu.memory_space<vmem>>, vector<4x81xf32>
    tpu.vector_store %arg19[%c0_166, %c192], %301 {strides = array<i32>} : memref<4x273xf32, #tpu.memory_space<vmem>>, vector<4x81xf32>,
    %c0_167 = arith.constant 0 : index
    %c0_168 = arith.constant 0 : index
    %c0_169 = arith.constant 0 : index
    %303 = vector.load %arg4[%c0_167, %c0_168, %c0_169] : memref<1x32x64xf32, #tpu.memory_space<vmem>>, vector<1x32x64xf32>
    %cst_170 = arith.constant dense<0.000000e+00> : vector<1x64xf32>
    %304 = vector.multi_reduction <add>, %303, %cst_170 [1] : vector<1x32x64xf32> to vector<1x64xf32>
    %cst_171 = arith.constant 3.200000e+01 : f32
    %305 = vector.broadcast %cst_171 : f32 to vector<1x64xf32>
    %306 = arith.divf %304, %305 : vector<1x64xf32>
    %c0_172 = arith.constant 0 : index
    %c128 = arith.constant 128 : index
    %307 = vector.load %arg19[%c0_172, %c128] : memref<4x273xf32, #tpu.memory_space<vmem>>, vector<1x64xf32>
    tpu.vector_store %arg19[%c0_172, %c128], %306 {strides = array<i32>} : memref<4x273xf32, #tpu.memory_space<vmem>>, vector<1x64xf32>,
    %cst_173 = arith.constant dense<0xFF800000> : vector<1x64xf32>
    %308 = vector.multi_reduction <maximumf>, %303, %cst_173 [1] : vector<1x32x64xf32> to vector<1x64xf32>
    %c1_174 = arith.constant 1 : index
    %c128_175 = arith.constant 128 : index
    %309 = vector.load %arg19[%c1_174, %c128_175] : memref<4x273xf32, #tpu.memory_space<vmem>>, vector<1x64xf32>
    tpu.vector_store %arg19[%c1_174, %c128_175], %308 {strides = array<i32>} : memref<4x273xf32, #tpu.memory_space<vmem>>, vector<1x64xf32>,
    %c0_176 = arith.constant 0 : index
    %c0_177 = arith.constant 0 : index
    %c0_178 = arith.constant 0 : index
    %310 = vector.load %arg5[%c0_176, %c0_177, %c0_178] : memref<1x48x64xf32, #tpu.memory_space<vmem>>, vector<1x48x64xf32>
    %cst_179 = arith.constant dense<0.000000e+00> : vector<1x64xf32>
    %311 = vector.multi_reduction <add>, %310, %cst_179 [1] : vector<1x48x64xf32> to vector<1x64xf32>
    %cst_180 = arith.constant 4.800000e+01 : f32
    %312 = vector.broadcast %cst_180 : f32 to vector<1x64xf32>
    %313 = arith.divf %311, %312 : vector<1x64xf32>
    %c2_181 = arith.constant 2 : index
    %c128_182 = arith.constant 128 : index
    %314 = vector.load %arg19[%c2_181, %c128_182] : memref<4x273xf32, #tpu.memory_space<vmem>>, vector<1x64xf32>
    tpu.vector_store %arg19[%c2_181, %c128_182], %313 {strides = array<i32>} : memref<4x273xf32, #tpu.memory_space<vmem>>, vector<1x64xf32>,
    %cst_183 = arith.constant dense<0xFF800000> : vector<1x64xf32>
    %315 = vector.multi_reduction <maximumf>, %310, %cst_183 [1] : vector<1x48x64xf32> to vector<1x64xf32>
    %c3_184 = arith.constant 3 : index
    %c128_185 = arith.constant 128 : index
    %316 = vector.load %arg19[%c3_184, %c128_185] : memref<4x273xf32, #tpu.memory_space<vmem>>, vector<1x64xf32>
    tpu.vector_store %arg19[%c3_184, %c128_185], %315 {strides = array<i32>} : memref<4x273xf32, #tpu.memory_space<vmem>>, vector<1x64xf32>,
    %c0_186 = arith.constant 0 : index
    %c47 = arith.constant 47 : index
    %317 = vector.load %arg19[%c0_186, %c47] : memref<4x273xf32, #tpu.memory_space<vmem>>, vector<4x82xf32>
    %c0_187 = arith.constant 0 : index
    %c0_188 = arith.constant 0 : index
    %318 = vector.load %arg22[%c0_187, %c0_188] : memref<28x82xf32, #tpu.memory_space<vmem>>, vector<4x82xf32>
    tpu.vector_store %arg22[%c0_187, %c0_188], %317 {strides = array<i32>} : memref<28x82xf32, #tpu.memory_space<vmem>>, vector<4x82xf32>,
    %c0_189 = arith.constant 0 : index
    %c71 = arith.constant 71 : index
    %319 = vector.load %arg19[%c0_189, %c71] : memref<4x273xf32, #tpu.memory_space<vmem>>, vector<4x82xf32>
    %c4_190 = arith.constant 4 : index
    %c0_191 = arith.constant 0 : index
    %320 = vector.load %arg22[%c4_190, %c0_191] : memref<28x82xf32, #tpu.memory_space<vmem>>, vector<4x82xf32>
    tpu.vector_store %arg22[%c4_190, %c0_191], %319 {strides = array<i32>} : memref<28x82xf32, #tpu.memory_space<vmem>>, vector<4x82xf32>,
    %c0_192 = arith.constant 0 : index
    %c95 = arith.constant 95 : index
    %321 = vector.load %arg19[%c0_192, %c95] : memref<4x273xf32, #tpu.memory_space<vmem>>, vector<4x82xf32>
    %c8_193 = arith.constant 8 : index
    %c0_194 = arith.constant 0 : index
    %322 = vector.load %arg22[%c8_193, %c0_194] : memref<28x82xf32, #tpu.memory_space<vmem>>, vector<4x82xf32>
    tpu.vector_store %arg22[%c8_193, %c0_194], %321 {strides = array<i32>} : memref<28x82xf32, #tpu.memory_space<vmem>>, vector<4x82xf32>,
    %c0_195 = arith.constant 0 : index
    %c119 = arith.constant 119 : index
    %323 = vector.load %arg19[%c0_195, %c119] : memref<4x273xf32, #tpu.memory_space<vmem>>, vector<4x82xf32>
    %c12_196 = arith.constant 12 : index
    %c0_197 = arith.constant 0 : index
    %324 = vector.load %arg22[%c12_196, %c0_197] : memref<28x82xf32, #tpu.memory_space<vmem>>, vector<4x82xf32>
    tpu.vector_store %arg22[%c12_196, %c0_197], %323 {strides = array<i32>} : memref<28x82xf32, #tpu.memory_space<vmem>>, vector<4x82xf32>,
    %c0_198 = arith.constant 0 : index
    %c143 = arith.constant 143 : index
    %325 = vector.load %arg19[%c0_198, %c143] : memref<4x273xf32, #tpu.memory_space<vmem>>, vector<4x82xf32>
    %c16_199 = arith.constant 16 : index
    %c0_200 = arith.constant 0 : index
    %326 = vector.load %arg22[%c16_199, %c0_200] : memref<28x82xf32, #tpu.memory_space<vmem>>, vector<4x82xf32>
    tpu.vector_store %arg22[%c16_199, %c0_200], %325 {strides = array<i32>} : memref<28x82xf32, #tpu.memory_space<vmem>>, vector<4x82xf32>,
    %c0_201 = arith.constant 0 : index
    %c167 = arith.constant 167 : index
    %327 = vector.load %arg19[%c0_201, %c167] : memref<4x273xf32, #tpu.memory_space<vmem>>, vector<4x82xf32>
    %c20_202 = arith.constant 20 : index
    %c0_203 = arith.constant 0 : index
    %328 = vector.load %arg22[%c20_202, %c0_203] : memref<28x82xf32, #tpu.memory_space<vmem>>, vector<4x82xf32>
    tpu.vector_store %arg22[%c20_202, %c0_203], %327 {strides = array<i32>} : memref<28x82xf32, #tpu.memory_space<vmem>>, vector<4x82xf32>,
    %c0_204 = arith.constant 0 : index
    %c191 = arith.constant 191 : index
    %329 = vector.load %arg19[%c0_204, %c191] : memref<4x273xf32, #tpu.memory_space<vmem>>, vector<4x82xf32>
    %c24_205 = arith.constant 24 : index
    %c0_206 = arith.constant 0 : index
    %330 = vector.load %arg22[%c24_205, %c0_206] : memref<28x82xf32, #tpu.memory_space<vmem>>, vector<4x82xf32>
    tpu.vector_store %arg22[%c24_205, %c0_206], %329 {strides = array<i32>} : memref<28x82xf32, #tpu.memory_space<vmem>>, vector<4x82xf32>,
    %c0_207 = arith.constant 0 : index
    %c0_208 = arith.constant 0 : index
    %331 = vector.load %arg8[%c0_207, %c0_208] : memref<14x28xf32, #tpu.memory_space<vmem>>, vector<14x28xf32>
    %c0_209 = arith.constant 0 : index
    %c0_210 = arith.constant 0 : index
    %332 = vector.load %arg22[%c0_209, %c0_210] : memref<28x82xf32, #tpu.memory_space<vmem>>, vector<28x82xf32>
    %cst_211 = arith.constant dense<0.000000e+00> : vector<14x82xf32>
    %333 = tpu.matmul %331, %332, %cst_211 {dimension_numbers = #tpu.dot_dimension_numbers<[1], [0], [0], [1], [0, 0, 1, 1], [], []>} : vector<14x28xf32>, vector<28x82xf32>, vector<14x82xf32> -> vector<14x82xf32>
    %334 = tpu.iota {dimensions = array<i32: 1>} : vector<1x64xi32>
    %c7_i32 = arith.constant 7 : i32
    %335 = vector.broadcast %c7_i32 : i32 to vector<1x64xi32>
    %336 = arith.andi %334, %335 : vector<1x64xi32>
    %cst_212 = arith.constant 0.000000e+00 : f32
    %337 = vector.broadcast %cst_212 : f32 to vector<2x64xf32>
    %338 = vector.extract_strided_slice %333 {offsets = [0, 0], sizes = [2, 64], strides = [1, 1]} : vector<14x82xf32> to vector<2x64xf32>
    %c-9_i32_213 = arith.constant -9 : i32
    %339 = vector.broadcast %c-9_i32_213 : i32 to vector<1x64xi32>
    %340 = arith.addi %336, %339 : vector<1x64xi32>
    %c0_i32_214 = arith.constant 0 : i32
    %341 = vector.broadcast %c0_i32_214 : i32 to vector<1x64xi32>
    %342 = arith.cmpi sge, %340, %341 : vector<1x64xi32>
    %c-9_i32_215 = arith.constant -9 : i32
    %343 = vector.broadcast %c-9_i32_215 : i32 to vector<1x64xi32>
    %344 = arith.addi %336, %343 : vector<1x64xi32>
    %c8_i32 = arith.constant 8 : i32
    %345 = vector.broadcast %c8_i32 : i32 to vector<1x64xi32>
    %346 = arith.cmpi slt, %344, %345 : vector<1x64xi32>
    %347 = arith.andi %342, %346 : vector<1x64xi1>
    %cst_216 = arith.constant 0.000000e+00 : f32
    %348 = vector.shape_cast %347 : vector<1x64xi1> to vector<1x64xi1>
    %349 = vector.broadcast %348 : vector<1x64xi1> to vector<2x64xi1>
    %350 = vector.broadcast %cst_216 : f32 to vector<2x64xf32>
    %351 = arith.select %349, %338, %350 : vector<2x64xi1>, vector<2x64xf32>
    %352 = arith.addf %337, %351 : vector<2x64xf32>
    %353 = vector.extract_strided_slice %333 {offsets = [2, 3], sizes = [2, 64], strides = [1, 1]} : vector<14x82xf32> to vector<2x64xf32>
    %c-6_i32_217 = arith.constant -6 : i32
    %354 = vector.broadcast %c-6_i32_217 : i32 to vector<1x64xi32>
    %355 = arith.addi %336, %354 : vector<1x64xi32>
    %c0_i32_218 = arith.constant 0 : i32
    %356 = vector.broadcast %c0_i32_218 : i32 to vector<1x64xi32>
    %357 = arith.cmpi sge, %355, %356 : vector<1x64xi32>
    %c-6_i32_219 = arith.constant -6 : i32
    %358 = vector.broadcast %c-6_i32_219 : i32 to vector<1x64xi32>
    %359 = arith.addi %336, %358 : vector<1x64xi32>
    %c8_i32_220 = arith.constant 8 : i32
    %360 = vector.broadcast %c8_i32_220 : i32 to vector<1x64xi32>
    %361 = arith.cmpi slt, %359, %360 : vector<1x64xi32>
    %362 = arith.andi %357, %361 : vector<1x64xi1>
    %cst_221 = arith.constant 0.000000e+00 : f32
    %363 = vector.shape_cast %362 : vector<1x64xi1> to vector<1x64xi1>
    %364 = vector.broadcast %363 : vector<1x64xi1> to vector<2x64xi1>
    %365 = vector.broadcast %cst_221 : f32 to vector<2x64xf32>
    %366 = arith.select %364, %353, %365 : vector<2x64xi1>, vector<2x64xf32>
    %367 = arith.addf %352, %366 : vector<2x64xf32>
    %368 = vector.extract_strided_slice %333 {offsets = [4, 6], sizes = [2, 64], strides = [1, 1]} : vector<14x82xf32> to vector<2x64xf32>
    %c-3_i32_222 = arith.constant -3 : i32
    %369 = vector.broadcast %c-3_i32_222 : i32 to vector<1x64xi32>
    %370 = arith.addi %336, %369 : vector<1x64xi32>
    %c0_i32_223 = arith.constant 0 : i32
    %371 = vector.broadcast %c0_i32_223 : i32 to vector<1x64xi32>
    %372 = arith.cmpi sge, %370, %371 : vector<1x64xi32>
    %c-3_i32_224 = arith.constant -3 : i32
    %373 = vector.broadcast %c-3_i32_224 : i32 to vector<1x64xi32>
    %374 = arith.addi %336, %373 : vector<1x64xi32>
    %c8_i32_225 = arith.constant 8 : i32
    %375 = vector.broadcast %c8_i32_225 : i32 to vector<1x64xi32>
    %376 = arith.cmpi slt, %374, %375 : vector<1x64xi32>
    %377 = arith.andi %372, %376 : vector<1x64xi1>
    %cst_226 = arith.constant 0.000000e+00 : f32
    %378 = vector.shape_cast %377 : vector<1x64xi1> to vector<1x64xi1>
    %379 = vector.broadcast %378 : vector<1x64xi1> to vector<2x64xi1>
    %380 = vector.broadcast %cst_226 : f32 to vector<2x64xf32>
    %381 = arith.select %379, %368, %380 : vector<2x64xi1>, vector<2x64xf32>
    %382 = arith.addf %367, %381 : vector<2x64xf32>
    %383 = vector.extract_strided_slice %333 {offsets = [6, 9], sizes = [2, 64], strides = [1, 1]} : vector<14x82xf32> to vector<2x64xf32>
    %384 = arith.addf %382, %383 : vector<2x64xf32>
    %385 = vector.extract_strided_slice %333 {offsets = [8, 12], sizes = [2, 64], strides = [1, 1]} : vector<14x82xf32> to vector<2x64xf32>
    %c3_i32_227 = arith.constant 3 : i32
    %386 = vector.broadcast %c3_i32_227 : i32 to vector<1x64xi32>
    %387 = arith.addi %336, %386 : vector<1x64xi32>
    %c0_i32_228 = arith.constant 0 : i32
    %388 = vector.broadcast %c0_i32_228 : i32 to vector<1x64xi32>
    %389 = arith.cmpi sge, %387, %388 : vector<1x64xi32>
    %c3_i32_229 = arith.constant 3 : i32
    %390 = vector.broadcast %c3_i32_229 : i32 to vector<1x64xi32>
    %391 = arith.addi %336, %390 : vector<1x64xi32>
    %c8_i32_230 = arith.constant 8 : i32
    %392 = vector.broadcast %c8_i32_230 : i32 to vector<1x64xi32>
    %393 = arith.cmpi slt, %391, %392 : vector<1x64xi32>
    %394 = arith.andi %389, %393 : vector<1x64xi1>
    %cst_231 = arith.constant 0.000000e+00 : f32
    %395 = vector.shape_cast %394 : vector<1x64xi1> to vector<1x64xi1>
    %396 = vector.broadcast %395 : vector<1x64xi1> to vector<2x64xi1>
    %397 = vector.broadcast %cst_231 : f32 to vector<2x64xf32>
    %398 = arith.select %396, %385, %397 : vector<2x64xi1>, vector<2x64xf32>
    %399 = arith.addf %384, %398 : vector<2x64xf32>
    %400 = vector.extract_strided_slice %333 {offsets = [10, 15], sizes = [2, 64], strides = [1, 1]} : vector<14x82xf32> to vector<2x64xf32>
    %c6_i32_232 = arith.constant 6 : i32
    %401 = vector.broadcast %c6_i32_232 : i32 to vector<1x64xi32>
    %402 = arith.addi %336, %401 : vector<1x64xi32>
    %c0_i32_233 = arith.constant 0 : i32
    %403 = vector.broadcast %c0_i32_233 : i32 to vector<1x64xi32>
    %404 = arith.cmpi sge, %402, %403 : vector<1x64xi32>
    %c6_i32_234 = arith.constant 6 : i32
    %405 = vector.broadcast %c6_i32_234 : i32 to vector<1x64xi32>
    %406 = arith.addi %336, %405 : vector<1x64xi32>
    %c8_i32_235 = arith.constant 8 : i32
    %407 = vector.broadcast %c8_i32_235 : i32 to vector<1x64xi32>
    %408 = arith.cmpi slt, %406, %407 : vector<1x64xi32>
    %409 = arith.andi %404, %408 : vector<1x64xi1>
    %cst_236 = arith.constant 0.000000e+00 : f32
    %410 = vector.shape_cast %409 : vector<1x64xi1> to vector<1x64xi1>
    %411 = vector.broadcast %410 : vector<1x64xi1> to vector<2x64xi1>
    %412 = vector.broadcast %cst_236 : f32 to vector<2x64xf32>
    %413 = arith.select %411, %400, %412 : vector<2x64xi1>, vector<2x64xf32>
    %414 = arith.addf %399, %413 : vector<2x64xf32>
    %415 = vector.extract_strided_slice %333 {offsets = [12, 18], sizes = [2, 64], strides = [1, 1]} : vector<14x82xf32> to vector<2x64xf32>
    %c9_i32_237 = arith.constant 9 : i32
    %416 = vector.broadcast %c9_i32_237 : i32 to vector<1x64xi32>
    %417 = arith.addi %336, %416 : vector<1x64xi32>
    %c0_i32_238 = arith.constant 0 : i32
    %418 = vector.broadcast %c0_i32_238 : i32 to vector<1x64xi32>
    %419 = arith.cmpi sge, %417, %418 : vector<1x64xi32>
    %c9_i32_239 = arith.constant 9 : i32
    %420 = vector.broadcast %c9_i32_239 : i32 to vector<1x64xi32>
    %421 = arith.addi %336, %420 : vector<1x64xi32>
    %c8_i32_240 = arith.constant 8 : i32
    %422 = vector.broadcast %c8_i32_240 : i32 to vector<1x64xi32>
    %423 = arith.cmpi slt, %421, %422 : vector<1x64xi32>
    %424 = arith.andi %419, %423 : vector<1x64xi1>
    %cst_241 = arith.constant 0.000000e+00 : f32
    %425 = vector.shape_cast %424 : vector<1x64xi1> to vector<1x64xi1>
    %426 = vector.broadcast %425 : vector<1x64xi1> to vector<2x64xi1>
    %427 = vector.broadcast %cst_241 : f32 to vector<2x64xf32>
    %428 = arith.select %426, %415, %427 : vector<2x64xi1>, vector<2x64xf32>
    %429 = arith.addf %414, %428 : vector<2x64xf32>
    %c0_242 = arith.constant 0 : index
    %430 = memref.load %arg11[%c0_242] : memref<1xf32, #tpu.memory_space<smem>>
    %431 = vector.broadcast %430 : f32 to vector<2x64xf32>
    %432 = arith.addf %429, %431 : vector<2x64xf32>
    %433 = arith.negf %432 : vector<2x64xf32>
    %434 = math.exp %433 : vector<2x64xf32>
    %cst_243 = arith.constant 1.000000e+00 : f32
    %435 = vector.broadcast %cst_243 : f32 to vector<2x64xf32>
    %436 = arith.addf %435, %434 : vector<2x64xf32>
    %437 = arith.divf %435, %436 : vector<2x64xf32>
    %c0_244 = arith.constant 0 : index
    %c0_245 = arith.constant 0 : index
    %438 = vector.load %arg25[%c0_244, %c0_245] : memref<2x64xf32, #tpu.memory_space<vmem>>, vector<2x64xf32>
    tpu.vector_store %arg25[%c0_244, %c0_245], %437 {strides = array<i32>} : memref<2x64xf32, #tpu.memory_space<vmem>>, vector<2x64xf32>,
    %c0_246 = arith.constant 0 : index
    %c0_247 = arith.constant 0 : index
    %c0_248 = arith.constant 0 : index
    %439 = vector.load %arg4[%c0_246, %c0_247, %c0_248] : memref<1x32x64xf32, #tpu.memory_space<vmem>>, vector<1x32x64xf32>
    %440 = vector.extract_strided_slice %437 {offsets = [0, 0], sizes = [1, 64], strides = [1, 1]} : vector<2x64xf32> to vector<1x64xf32>
    %cst_249 = arith.constant 1.000000e+00 : f32
    %441 = vector.broadcast %cst_249 : f32 to vector<1x64xf32>
    %442 = arith.addf %441, %440 : vector<1x64xf32>
    %443 = vector.shape_cast %442 : vector<1x64xf32> to vector<1x1x64xf32>
    %444 = vector.broadcast %443 : vector<1x1x64xf32> to vector<1x32x64xf32>
    %445 = arith.mulf %444, %439 : vector<1x32x64xf32>
    %cst_250 = arith.constant dense<0.000000e+00> : vector<1x32xf32>
    %446 = vector.multi_reduction <add>, %445, %cst_250 [2] : vector<1x32x64xf32> to vector<1x32xf32>
    %447 = vector.shape_cast %446 : vector<1x32xf32> to vector<1x32x1xf32>
    %cst_251 = arith.constant 1.562500e-02 : f32
    %448 = vector.broadcast %cst_251 : f32 to vector<1x32x1xf32>
    %449 = arith.mulf %447, %448 : vector<1x32x1xf32>
    %450 = vector.shape_cast %449 : vector<1x32x1xf32> to vector<32x1xf32>
    %c48 = arith.constant 48 : index
    %c0_252 = arith.constant 0 : index
    %451 = vector.load %arg26[%c48, %c0_252] : memref<128x1xf32, #tpu.memory_space<vmem>>, vector<32x1xf32>
    tpu.vector_store %arg26[%c48, %c0_252], %450 {strides = array<i32>} : memref<128x1xf32, #tpu.memory_space<vmem>>, vector<32x1xf32>,
    %c0_253 = arith.constant 0 : index
    %c0_254 = arith.constant 0 : index
    %c0_255 = arith.constant 0 : index
    %452 = vector.load %arg5[%c0_253, %c0_254, %c0_255] : memref<1x48x64xf32, #tpu.memory_space<vmem>>, vector<1x48x64xf32>
    %453 = vector.extract_strided_slice %437 {offsets = [1, 0], sizes = [1, 64], strides = [1, 1]} : vector<2x64xf32> to vector<1x64xf32>
    %cst_256 = arith.constant 1.000000e+00 : f32
    %454 = vector.broadcast %cst_256 : f32 to vector<1x64xf32>
    %455 = arith.addf %454, %453 : vector<1x64xf32>
    %456 = vector.shape_cast %455 : vector<1x64xf32> to vector<1x1x64xf32>
    %457 = vector.broadcast %456 : vector<1x1x64xf32> to vector<1x48x64xf32>
    %458 = arith.mulf %457, %452 : vector<1x48x64xf32>
    %cst_257 = arith.constant dense<0.000000e+00> : vector<1x48xf32>
    %459 = vector.multi_reduction <add>, %458, %cst_257 [2] : vector<1x48x64xf32> to vector<1x48xf32>
    %460 = vector.shape_cast %459 : vector<1x48xf32> to vector<1x48x1xf32>
    %cst_258 = arith.constant 1.562500e-02 : f32
    %461 = vector.broadcast %cst_258 : f32 to vector<1x48x1xf32>
    %462 = arith.mulf %460, %461 : vector<1x48x1xf32>
    %463 = vector.shape_cast %462 : vector<1x48x1xf32> to vector<48x1xf32>
    %c80 = arith.constant 80 : index
    %c0_259 = arith.constant 0 : index
    %464 = vector.load %arg26[%c80, %c0_259] : memref<128x1xf32, #tpu.memory_space<vmem>>, vector<48x1xf32>
    tpu.vector_store %arg26[%c80, %c0_259], %463 {strides = array<i32>} : memref<128x1xf32, #tpu.memory_space<vmem>>, vector<48x1xf32>,
    %c0_260 = arith.constant 0 : index
    %c0_261 = arith.constant 0 : index
    %465 = vector.load %arg9[%c0_260, %c0_261] : memref<128x128xf32, #tpu.memory_space<vmem>>, vector<128x128xf32>
    %c0_262 = arith.constant 0 : index
    %c0_263 = arith.constant 0 : index
    %466 = vector.load %arg26[%c0_262, %c0_263] : memref<128x1xf32, #tpu.memory_space<vmem>>, vector<128x1xf32>
    %cst_264 = arith.constant dense<0.000000e+00> : vector<128x1xf32>
    %467 = tpu.matmul %465, %466, %cst_264 {dimension_numbers = #tpu.dot_dimension_numbers<[1], [0], [0], [1], [0, 0, 1, 1], [], []>} : vector<128x128xf32>, vector<128x1xf32>, vector<128x1xf32> -> vector<128x1xf32>
    %c0_265 = arith.constant 0 : index
    %c0_266 = arith.constant 0 : index
    %468 = vector.load %arg10[%c0_265, %c0_266] : memref<128x1xf32, #tpu.memory_space<vmem>>, vector<128x1xf32>
    %469 = arith.addf %467, %468 : vector<128x1xf32>
    %470 = arith.negf %469 : vector<128x1xf32>
    %471 = math.exp %470 : vector<128x1xf32>
    %cst_267 = arith.constant 1.000000e+00 : f32
    %472 = vector.broadcast %cst_267 : f32 to vector<128x1xf32>
    %473 = arith.addf %472, %471 : vector<128x1xf32>
    %474 = arith.divf %472, %473 : vector<128x1xf32>
    %475 = vector.extract_strided_slice %474 {offsets = [0, 0], sizes = [8, 1], strides = [1, 1]} : vector<128x1xf32> to vector<8x1xf32>
    %476 = vector.shape_cast %475 : vector<8x1xf32> to vector<1x8x1xf32>
    %c0_268 = arith.constant 0 : index
    %c0_269 = arith.constant 0 : index
    %477 = vector.load %arg23[%c0_268, %c0_269] : memref<1x1024xf32, #tpu.memory_space<vmem>>, vector<1x1024xf32>
    %c0_270 = arith.constant 0 : index
    %c0_271 = arith.constant 0 : index
    %c0_272 = arith.constant 0 : index
    %478 = vector.load %arg1[%c0_270, %c0_271, %c0_272] : memref<1x8x1024xf32, #tpu.memory_space<vmem>>, vector<1x8x1024xf32>
    %479 = vector.shape_cast %477 : vector<1x1024xf32> to vector<1x1x1024xf32>
    %cst_273 = arith.constant 1.000000e+00 : f32
    %480 = vector.broadcast %cst_273 : f32 to vector<1x8x1xf32>
    %481 = arith.addf %480, %476 : vector<1x8x1xf32>
    %482 = vector.broadcast %479 : vector<1x1x1024xf32> to vector<1x8x1024xf32>
    %483 = vector.broadcast %481 : vector<1x8x1xf32> to vector<1x8x1024xf32>
    %484 = arith.mulf %482, %483 : vector<1x8x1024xf32>
    %485 = vector.broadcast %476 : vector<1x8x1xf32> to vector<1x8x1024xf32>
    %486 = arith.addf %484, %485 : vector<1x8x1024xf32>
    %487 = arith.mulf %478, %486 : vector<1x8x1024xf32>
    %c0_274 = arith.constant 0 : index
    %c0_275 = arith.constant 0 : index
    %c0_276 = arith.constant 0 : index
    %488 = vector.load %arg12[%c0_274, %c0_275, %c0_276] : memref<1x8x1024xf32, #tpu.memory_space<vmem>>, vector<1x8x1024xf32>
    tpu.vector_store %arg12[%c0_274, %c0_275, %c0_276], %487 {strides = array<i32>} : memref<1x8x1024xf32, #tpu.memory_space<vmem>>, vector<1x8x1024xf32>,
    %489 = vector.extract_strided_slice %474 {offsets = [8, 0], sizes = [16, 1], strides = [1, 1]} : vector<128x1xf32> to vector<16x1xf32>
    %490 = vector.shape_cast %489 : vector<16x1xf32> to vector<1x16x1xf32>
    %c0_277 = arith.constant 0 : index
    %c0_278 = arith.constant 0 : index
    %491 = vector.load %arg24[%c0_277, %c0_278] : memref<2x256xf32, #tpu.memory_space<vmem>>, vector<1x256xf32>
    %c0_279 = arith.constant 0 : index
    %c0_280 = arith.constant 0 : index
    %c0_281 = arith.constant 0 : index
    %492 = vector.load %arg2[%c0_279, %c0_280, %c0_281] : memref<1x16x256xf32, #tpu.memory_space<vmem>>, vector<1x16x256xf32>
    %493 = vector.shape_cast %491 : vector<1x256xf32> to vector<1x1x256xf32>
    %cst_282 = arith.constant 1.000000e+00 : f32
    %494 = vector.broadcast %cst_282 : f32 to vector<1x16x1xf32>
    %495 = arith.addf %494, %490 : vector<1x16x1xf32>
    %496 = vector.broadcast %493 : vector<1x1x256xf32> to vector<1x16x256xf32>
    %497 = vector.broadcast %495 : vector<1x16x1xf32> to vector<1x16x256xf32>
    %498 = arith.mulf %496, %497 : vector<1x16x256xf32>
    %499 = vector.broadcast %490 : vector<1x16x1xf32> to vector<1x16x256xf32>
    %500 = arith.addf %498, %499 : vector<1x16x256xf32>
    %501 = arith.mulf %492, %500 : vector<1x16x256xf32>
    %c0_283 = arith.constant 0 : index
    %c0_284 = arith.constant 0 : index
    %c0_285 = arith.constant 0 : index
    %502 = vector.load %arg13[%c0_283, %c0_284, %c0_285] : memref<1x16x256xf32, #tpu.memory_space<vmem>>, vector<1x16x256xf32>
    tpu.vector_store %arg13[%c0_283, %c0_284, %c0_285], %501 {strides = array<i32>} : memref<1x16x256xf32, #tpu.memory_space<vmem>>, vector<1x16x256xf32>,
    %503 = vector.extract_strided_slice %474 {offsets = [24, 0], sizes = [24, 1], strides = [1, 1]} : vector<128x1xf32> to vector<24x1xf32>
    %504 = vector.shape_cast %503 : vector<24x1xf32> to vector<1x24x1xf32>
    %c1_286 = arith.constant 1 : index
    %c0_287 = arith.constant 0 : index
    %505 = vector.load %arg24[%c1_286, %c0_287] : memref<2x256xf32, #tpu.memory_space<vmem>>, vector<1x256xf32>
    %c0_288 = arith.constant 0 : index
    %c0_289 = arith.constant 0 : index
    %c0_290 = arith.constant 0 : index
    %506 = vector.load %arg3[%c0_288, %c0_289, %c0_290] : memref<1x24x256xf32, #tpu.memory_space<vmem>>, vector<1x24x256xf32>
    %507 = vector.shape_cast %505 : vector<1x256xf32> to vector<1x1x256xf32>
    %cst_291 = arith.constant 1.000000e+00 : f32
    %508 = vector.broadcast %cst_291 : f32 to vector<1x24x1xf32>
    %509 = arith.addf %508, %504 : vector<1x24x1xf32>
    %510 = vector.broadcast %507 : vector<1x1x256xf32> to vector<1x24x256xf32>
    %511 = vector.broadcast %509 : vector<1x24x1xf32> to vector<1x24x256xf32>
    %512 = arith.mulf %510, %511 : vector<1x24x256xf32>
    %513 = vector.broadcast %504 : vector<1x24x1xf32> to vector<1x24x256xf32>
    %514 = arith.addf %512, %513 : vector<1x24x256xf32>
    %515 = arith.mulf %506, %514 : vector<1x24x256xf32>
    %c0_292 = arith.constant 0 : index
    %c0_293 = arith.constant 0 : index
    %c0_294 = arith.constant 0 : index
    %516 = vector.load %arg14[%c0_292, %c0_293, %c0_294] : memref<1x24x256xf32, #tpu.memory_space<vmem>>, vector<1x24x256xf32>
    tpu.vector_store %arg14[%c0_292, %c0_293, %c0_294], %515 {strides = array<i32>} : memref<1x24x256xf32, #tpu.memory_space<vmem>>, vector<1x24x256xf32>,
    %517 = vector.extract_strided_slice %474 {offsets = [48, 0], sizes = [32, 1], strides = [1, 1]} : vector<128x1xf32> to vector<32x1xf32>
    %518 = vector.shape_cast %517 : vector<32x1xf32> to vector<1x32x1xf32>
    %c0_295 = arith.constant 0 : index
    %c0_296 = arith.constant 0 : index
    %519 = vector.load %arg25[%c0_295, %c0_296] : memref<2x64xf32, #tpu.memory_space<vmem>>, vector<1x64xf32>
    %c0_297 = arith.constant 0 : index
    %c0_298 = arith.constant 0 : index
    %c0_299 = arith.constant 0 : index
    %520 = vector.load %arg4[%c0_297, %c0_298, %c0_299] : memref<1x32x64xf32, #tpu.memory_space<vmem>>, vector<1x32x64xf32>
    %521 = vector.shape_cast %519 : vector<1x64xf32> to vector<1x1x64xf32>
    %cst_300 = arith.constant 1.000000e+00 : f32
    %522 = vector.broadcast %cst_300 : f32 to vector<1x32x1xf32>
    %523 = arith.addf %522, %518 : vector<1x32x1xf32>
    %524 = vector.broadcast %521 : vector<1x1x64xf32> to vector<1x32x64xf32>
    %525 = vector.broadcast %523 : vector<1x32x1xf32> to vector<1x32x64xf32>
    %526 = arith.mulf %524, %525 : vector<1x32x64xf32>
    %527 = vector.broadcast %518 : vector<1x32x1xf32> to vector<1x32x64xf32>
    %528 = arith.addf %526, %527 : vector<1x32x64xf32>
    %529 = arith.mulf %520, %528 : vector<1x32x64xf32>
    %c0_301 = arith.constant 0 : index
    %c0_302 = arith.constant 0 : index
    %c0_303 = arith.constant 0 : index
    %530 = vector.load %arg15[%c0_301, %c0_302, %c0_303] : memref<1x32x64xf32, #tpu.memory_space<vmem>>, vector<1x32x64xf32>
    tpu.vector_store %arg15[%c0_301, %c0_302, %c0_303], %529 {strides = array<i32>} : memref<1x32x64xf32, #tpu.memory_space<vmem>>, vector<1x32x64xf32>,
    %531 = vector.extract_strided_slice %474 {offsets = [80, 0], sizes = [48, 1], strides = [1, 1]} : vector<128x1xf32> to vector<48x1xf32>
    %532 = vector.shape_cast %531 : vector<48x1xf32> to vector<1x48x1xf32>
    %c1_304 = arith.constant 1 : index
    %c0_305 = arith.constant 0 : index
    %533 = vector.load %arg25[%c1_304, %c0_305] : memref<2x64xf32, #tpu.memory_space<vmem>>, vector<1x64xf32>
    %c0_306 = arith.constant 0 : index
    %c0_307 = arith.constant 0 : index
    %c0_308 = arith.constant 0 : index
    %534 = vector.load %arg5[%c0_306, %c0_307, %c0_308] : memref<1x48x64xf32, #tpu.memory_space<vmem>>, vector<1x48x64xf32>
    %535 = vector.shape_cast %533 : vector<1x64xf32> to vector<1x1x64xf32>
    %cst_309 = arith.constant 1.000000e+00 : f32
    %536 = vector.broadcast %cst_309 : f32 to vector<1x48x1xf32>
    %537 = arith.addf %536, %532 : vector<1x48x1xf32>
    %538 = vector.broadcast %535 : vector<1x1x64xf32> to vector<1x48x64xf32>
    %539 = vector.broadcast %537 : vector<1x48x1xf32> to vector<1x48x64xf32>
    %540 = arith.mulf %538, %539 : vector<1x48x64xf32>
    %541 = vector.broadcast %532 : vector<1x48x1xf32> to vector<1x48x64xf32>
    %542 = arith.addf %540, %541 : vector<1x48x64xf32>
    %543 = arith.mulf %534, %542 : vector<1x48x64xf32>
    %c0_310 = arith.constant 0 : index
    %c0_311 = arith.constant 0 : index
    %c0_312 = arith.constant 0 : index
    %544 = vector.load %arg16[%c0_310, %c0_311, %c0_312] : memref<1x48x64xf32, #tpu.memory_space<vmem>>, vector<1x48x64xf32>
    tpu.vector_store %arg16[%c0_310, %c0_311, %c0_312], %543 {strides = array<i32>} : memref<1x48x64xf32, #tpu.memory_space<vmem>>, vector<1x48x64xf32>,
    return
  }
  func.func @transform_0(%arg0: i32) -> (i32, i32, i32) {
    %c0_i32 = arith.constant 0 : i32
    %c0_i32_0 = arith.constant 0 : i32
    %c0_i32_1 = arith.constant 0 : i32
    return %arg0, %c0_i32, %c0_i32_0 : i32, i32, i32
  }
  func.func @transform_1(%arg0: i32) -> (i32, i32, i32) {
    %c0_i32 = arith.constant 0 : i32
    %c0_i32_0 = arith.constant 0 : i32
    %c0_i32_1 = arith.constant 0 : i32
    return %arg0, %c0_i32, %c0_i32_0 : i32, i32, i32
  }
  func.func @transform_2(%arg0: i32) -> (i32, i32, i32) {
    %c0_i32 = arith.constant 0 : i32
    %c0_i32_0 = arith.constant 0 : i32
    %c0_i32_1 = arith.constant 0 : i32
    return %arg0, %c0_i32, %c0_i32_0 : i32, i32, i32
  }
  func.func @transform_3(%arg0: i32) -> (i32, i32, i32) {
    %c0_i32 = arith.constant 0 : i32
    %c0_i32_0 = arith.constant 0 : i32
    %c0_i32_1 = arith.constant 0 : i32
    return %arg0, %c0_i32, %c0_i32_0 : i32, i32, i32
  }
  func.func @transform_4(%arg0: i32) -> (i32, i32, i32) {
    %c0_i32 = arith.constant 0 : i32
    %c0_i32_0 = arith.constant 0 : i32
    %c0_i32_1 = arith.constant 0 : i32
    return %arg0, %c0_i32, %c0_i32_0 : i32, i32, i32
  }
  func.func @transform_5(%arg0: i32) -> (i32, i32) {
    %c0_i32 = arith.constant 0 : i32
    %c0_i32_0 = arith.constant 0 : i32
    %c0_i32_1 = arith.constant 0 : i32
    return %c0_i32, %c0_i32_0 : i32, i32
  }
  func.func @transform_6(%arg0: i32) -> (i32, i32) {
    %c0_i32 = arith.constant 0 : i32
    %c0_i32_0 = arith.constant 0 : i32
    %c0_i32_1 = arith.constant 0 : i32
    return %c0_i32, %c0_i32_0 : i32, i32
  }
  func.func @transform_7(%arg0: i32) -> (i32, i32) {
    %c0_i32 = arith.constant 0 : i32
    %c0_i32_0 = arith.constant 0 : i32
    %c0_i32_1 = arith.constant 0 : i32
    return %c0_i32, %c0_i32_0 : i32, i32
  }
  func.func @transform_8(%arg0: i32) -> (i32, i32) {
    %c0_i32 = arith.constant 0 : i32
    %c0_i32_0 = arith.constant 0 : i32
    %c0_i32_1 = arith.constant 0 : i32
    return %c0_i32, %c0_i32_0 : i32, i32
  }
  func.func @transform_9(%arg0: i32) -> (i32, i32) {
    %c0_i32 = arith.constant 0 : i32
    %c0_i32_0 = arith.constant 0 : i32
    %c0_i32_1 = arith.constant 0 : i32
    return %c0_i32, %c0_i32_0 : i32, i32
  }
  func.func @transform_10(%arg0: i32) -> i32 {
    %c0_i32 = arith.constant 0 : i32
    %c0_i32_0 = arith.constant 0 : i32
    return %c0_i32 : i32
  }
  func.func @transform_11(%arg0: i32) -> (i32, i32, i32) {
    %c0_i32 = arith.constant 0 : i32
    %c0_i32_0 = arith.constant 0 : i32
    %c0_i32_1 = arith.constant 0 : i32
    return %arg0, %c0_i32, %c0_i32_0 : i32, i32, i32
  }
  func.func @transform_12(%arg0: i32) -> (i32, i32, i32) {
    %c0_i32 = arith.constant 0 : i32
    %c0_i32_0 = arith.constant 0 : i32
    %c0_i32_1 = arith.constant 0 : i32
    return %arg0, %c0_i32, %c0_i32_0 : i32, i32, i32
  }
  func.func @transform_13(%arg0: i32) -> (i32, i32, i32) {
    %c0_i32 = arith.constant 0 : i32
    %c0_i32_0 = arith.constant 0 : i32
    %c0_i32_1 = arith.constant 0 : i32
    return %arg0, %c0_i32, %c0_i32_0 : i32, i32, i32
  }
  func.func @transform_14(%arg0: i32) -> (i32, i32, i32) {
    %c0_i32 = arith.constant 0 : i32
    %c0_i32_0 = arith.constant 0 : i32
    %c0_i32_1 = arith.constant 0 : i32
    return %arg0, %c0_i32, %c0_i32_0 : i32, i32, i32
  }
  func.func @transform_15(%arg0: i32) -> (i32, i32, i32) {
    %c0_i32 = arith.constant 0 : i32
    %c0_i32_0 = arith.constant 0 : i32
    %c0_i32_1 = arith.constant 0 : i32
    return %arg0, %c0_i32, %c0_i32_0 : i32, i32, i32
  }
}

</mosaic_0001>

<bundles_post_ra>
// kernel: tpu_custom_call.1
= control target key start
LH: loop header
LB: loop body
LE: loop exit
PB: predicated region body
PF: predicated region fallthrough
CT: control target
= control target key end

     0   :  { %s8220_s0 = inlined_call_operand.vmem [shape: f32[2,8,1024], index: 0, kind: input, shape index: {}]   ;;  %s8221_s1 = inlined_call_operand.hbm [shape: f32[2,16,256], index: 1, kind: input, shape index: {}]   ;;  %s8222_s2 = inlined_call_operand.hbm [shape: f32[2,24,256], index: 2, kind: input, shape index: {}]   ;;  %s8223_s3 = inlined_call_operand.hbm [shape: f32[2,32,64], index: 3, kind: input, shape index: {}]   ;;  %s8224_s4 = inlined_call_operand.hbm [shape: f32[2,48,64], index: 4, kind: input, shape index: {}]   ;;  %s8225_s5 = inlined_call_operand.vmem [shape: f32[7,14], index: 5, kind: input, shape index: {}]   ;;  %s8226_s6 = inlined_call_operand.hbm [shape: f32[14,28], index: 6, kind: input, shape index: {}]   ;;  %s8227_s7 = inlined_call_operand.hbm [shape: f32[14,28], index: 7, kind: input, shape index: {}]   ;;  %s8228_s8 = inlined_call_operand.hbm [shape: f32[128,128], index: 8, kind: input, shape index: {}]   ;;  %s8229_s9 = inlined_call_operand.vmem [shape: f32[128,1], index: 9, kind: input, shape index: {}]   ;;  %s8230_s10 = inlined_call_operand.<no memory space> [shape: f32[1], index: 10, kind: input, shape index: {}]   ;;  %s8231_s11 = inlined_call_operand.hbm [shape: f32[2,8,1024], index: 11, kind: output, shape index: {0}]   ;;  %s8232_s12 = inlined_call_operand.hbm [shape: f32[2,16,256], index: 12, kind: output, shape index: {1}]   ;;  %s8233_s13 = inlined_call_operand.hbm [shape: f32[2,24,256], index: 13, kind: output, shape index: {2}]   ;;  %s8234_s14 = inlined_call_operand.hbm [shape: f32[2,32,64], index: 14, kind: output, shape index: {3}]   ;;  %s8235_s15 = inlined_call_operand.hbm [shape: f32[2,48,64], index: 15, kind: output, shape index: {4}]  }
   0x1   :  { %8273 = sst [smem:[#allocation50_spill]] %s8221_s1 }
   0x2   :  { %8274 = sst [smem:[#allocation51_spill]] %s8222_s2 }
   0x3   :  { %8275 = sst [smem:[#allocation52_spill]] %s8226_s6 }
   0x4   :  { %8276 = sst [smem:[#allocation53_spill]] %s8227_s7 }
   0x5   :  { %8277 = sst [smem:[#allocation54_spill]] %s8228_s8 }
   0x6   :  { %8278 = sst [smem:[#allocation55_spill]] %s8231_s11 }
   0x7   :  { %8279 = sst [smem:[#allocation56_spill]] %s8232_s12 }
   0x8   :  { %8280 = sst [smem:[#allocation57_spill]] %s8233_s13 }
   0x9   :  { %8281 = sst [smem:[#allocation58_spill]] %s8234_s14 }
   0xa   :  { %8282 = sst [smem:[#allocation59_spill]] %s8235_s15 }
   0xb   :  { %21 = sst [smem:[#allocation12]] %s8230_s10 }
   0xc   :  { %22 = vsyncpa [#allocation14], 0 }
   0xd   :  { %24 = vsyncpa [#allocation14 + $0x1], 0 }
   0xe   :  { %25 = vsyncpa [#allocation17], 0 }
   0xf   :  { %27 = vsyncpa [#allocation17 + $0x1], 0 }
  0x10   :  { %28 = vsyncpa [#allocation20], 0 }
  0x11   :  { %30 = vsyncpa [#allocation20 + $0x1], 0 }
  0x12   :  { %31 = vsyncpa [#allocation23], 0 }
  0x13   :  { %32 = vsyncpa [#allocation15], 0 }
  0x14   :  { %34 = vsyncpa [#allocation15 + $0x1], 0 }
  0x15   :  { %35 = vsyncpa [#allocation27], 0 }
  0x16   :  { %37 = vsyncpa [#allocation27 + $0x1], 0 }
  0x17   :  { %38 = vsyncpa [#allocation30], 0 }
  0x18   :  { %40 = vsyncpa [#allocation30 + $0x1], 0  ;;  %s6117_s20 = smov 0   ;;  %s6119_s21 = smov 0  }
  0x19   :  { %s6121_s22 = smov 0   ;;  %s6123_s10 = smov 0  }
  0x1a LB: > { %8283 = sst [smem:[#allocation40_spill]] %s5978_s20  ;;  %s6138_s23 = sadd.s32 4294967295, %s5990_s10   ;;  %s5990_s10 = sphi %s6123_s10, %s8344_s10   ;;  %s5986_s22 = sphi %s6121_s22, %s8346_s22   ;;  %s5982_s21 = sphi %s6119_s21, %s8348_s21   ;;  %s5978_s20 = sphi %s6117_s20, %s8347_s20  }
  0x1b   : > { %8284 = sst [smem:[#allocation41_spill]] %s5986_s22  ;;  %s8236_s24 = sadd.s32 4294967294, %s5990_s10  }
  0x1c   : > { %s6142_s25 = sadd.s32 1, %s5990_s10   ;;  %s79_s26 = sadd.s32 1, %s5986_s22 }
  0x1d   : > { %8285 = sst [smem:[#allocation42_spill]] %s6142_s25  ;;  %s76_s27 = ssub.s32 %s5990_s10, %s6142_s25 }
  0x1e   : > { %p86_p0 = scmp.ne.s32.totalorder %s5986_s22, %s5982_s21  ;;  %p77_p1 = scmp.eq.s32.totalorder %s76_s27, 0 }
  0x1f   : > { %p87_p2 = scmp.eq.s32.totalorder %s5990_s10, 0  ;;  %p92_p3 = scmp.ne.s32.totalorder %s5982_s21, %s5978_s20 }
  0x20   : > { %p8240_p4 = scmp.eq.s32.totalorder %s6138_s23, 0  ;;  %p320_p7 = scmp.eq.s32.totalorder %s6138_s23, 1 }
  0x21   : > { %s6154_s28 = scalar_select %p77_p1, %s5986_s22, %s79_s26  }
  0x22   : > { %p6156_p5 = por %p87_p2, %p86_p0  ;;  %p6162_p6 = por %p8240_p4, %p92_p3 }
  0x23   : > { %8286 = sst [smem:[#allocation43_spill]] %s6154_s28  ;;  %p326_p8 = scmp.eq.s32.totalorder %s8236_s24, 1 }
  0x24   : > { %s8288_s30 = scalar_select %p6162_p6, 1, 0 }
  0x25   : > { %p5049_p9 = scmp.ge.s32.totalorder %s5990_s10, 1  ;;  %p437_p10 = scmp.lt.s32.totalorder %s5990_s10, 3 }
  0x26   : > { %p6171_p11 = por %p320_p7, %p86_p0  ;;  %p6175_p12 = por %p326_p8, %p92_p3 }
  0x27   : > { %p6179_p13 = pnand %p5049_p9, %p437_p10  ;;  %s5992_s19 = smov [#allocation21]  }
  0x28   : > { %s8289_s16 = scalar_select %p6171_p11, 1, 0 }
  0x29   : > { %s8290_s17 = scalar_select %p6175_p12, 1, 0 }
  0x2a   : > { %s8292_s18 = scalar_select %p6179_p13, 1, 0 }
  0x2b   : > { %8291 = sst [smem:[#allocation44_spill]] %s8290_s17  ;;  %p5351_p1 = pneg %p6179_p13 }
  0x2c   : > { %s452_s26 = sshll.u32 %s5992_s19, 4  ;;  %p5393_p3 = scmp.lt.s32.totalorder %s5990_s10, 2  ;;  %s453_s26 = int_to_ptr.vmem [resolvable:$true] %s452_s26 }
  0x2d   : > { %p6187_p2 = pnand %p5351_p1, %p8240_p4  ;;  %s5993_s24 = smov [#allocation22]  }
  0x2e   : > { %s465_s28 = sshll.u32 %s5993_s24, 4  ;;  %s5619_s25 = scalar_lea.vmem %s453_s26, 256  ;;  %s466_s28 = int_to_ptr.vmem [resolvable:$true] %s465_s28 }
  0x2f   : > { %s8293_s27 = scalar_select %p6187_p2, 1, 0 }
  0x30   : > { %p8255_p7 = pneg %p6187_p2  ;;  %p5620_p8 = scmp.ne.s32.totalorder %s453_s26, %s5619_s25 }
  0x31   : > { %p5627_p12 = scmp.lt.s32.totalorder %s453_s26, %s453_s26  ;;  %p5628_p11 = scmp.lt.s32.totalorder %s5619_s25, %s5619_s25 }
  0x32   : > { %p5622_p9 = pnand %p5620_p8, %p8255_p7 }
  0x33   : > { %p5629_p1 = por %p5628_p11, %p5627_p12 }
  0x34   : > { %p5623_p10 = pneg %p5622_p9 }
  0x36   : > { %p5630_p4 = pnand %p5629_p1, %p5623_p10 }
  0x38   : > { %5633 = shalt.err (!%p5630_p4)
}
  0x39   : > { %s8248_s19 = smov 128   ;;  %s8252_s17 = smov 8  }
  0x3a   : > { %s8294_s6 = sld [smem:[#allocation52_spill]]  ;;  %s6207_s15 = sand.u32 1, %s5986_s22  }
  0x3b   : > { %s5645_s25 = scalar_lea.vmem %s466_s28, 256  ;;  %p5653_p8 = scmp.lt.s32.totalorder %s466_s28, %s466_s28 }
  0x3c   : > { %p5646_p11 = scmp.ne.s32.totalorder %s466_s28, %s5645_s25  ;;  %p5654_p9 = scmp.lt.s32.totalorder %s5645_s25, %s5645_s25 }
  0x3e   : > { %p5648_p4 = pnand %p5646_p11, %p8255_p7  ;;  %p5655_p10 = por %p5654_p9, %p5653_p8 }
  0x40   : > { %5354 = dma.hbm_to_vmem [thread:$0]  (!%p6187_p2), %s8294_s6, 256, %s453_s26, [#allocation20], %s8248_s19, %s8248_s19, %s8252_s17  }
  0x41   : > { %p5649_p12 = pneg %p5648_p4 }
  0x43   : > { %p5656_p1 = pnand %p5655_p10, %p5649_p12 }
  0x45   : > { %5659 = shalt.err (!%p5656_p1)
}
  0x46   : > { %s8295_s7 = sld [smem:[#allocation53_spill]]  ;;  %p6224_p11 = pnand %p5393_p3, %p6156_p5 }
  0x47   : > { %s8254_s25 = sand.u32 1, %s5990_s10   ;;  %s8250_s6 = smul.u32 48, %s6207_s15 }
  0x48   : > { %s8251_s22 = smul.u32 768, %s5990_s10  ;;  %s5996_s20 = smov [#allocation24]  }
  0x49   : > { %s478_s26 = sshll.u32 %s5996_s20, 4  ;;  %s8297_s2 = sld [smem:[#allocation51_spill]]  ;;  %s6242_s26 = int_to_ptr.vmem [resolvable:$true] %s478_s26 }
  0x4a   : > { %p6252_p3 = pneg %p6224_p11 }
  0x4c   : > { %5357 = dma.hbm_to_vmem [thread:$0]  (!%p6187_p2), %s8295_s7, 256, %s466_s28, [#allocation23], %s8248_s19, %s8248_s19, %s8252_s17  }
  0x4d   : > { %s531_s28 = scalar_lea.vmem [#allocation16], %s8250_s6  ;;  %s6246_s19 = scalar_lea.sflag [#allocation17], %s8254_s25 }
  0x4e   : > { %s538_s29 = sshll.u32 %s531_s28, 4  ;;  %s6240_s29 = int_to_ptr.vmem [resolvable:$true] %s538_s29 }
  0x4f   : > { %s6236_s12 = scalar_lea.hbm %s8297_s2, %s8251_s22  ;;  %s5665_s6 = scalar_lea.hbm %s8297_s2, 1536 }
  0x50   : > { %s5660_s20 = scalar_lea.hbm %s6236_s12, 768  ;;  %p5666_p8 = scmp.lt.s32.totalorder %s6236_s12, %s8297_s2 }
  0x51   : > { %p5661_p5 = scmp.ne.s32.totalorder %s6236_s12, %s5660_s20  ;;  %p5667_p9 = scmp.lt.s32.totalorder %s5665_s6, %s5660_s20 }
  0x53   : > { %p5663_p4 = pnand %p6252_p3, %p5661_p5  ;;  %p5668_p10 = por %p5667_p9, %p5666_p8 }
  0x55   : > { %p5664_p12 = pneg %p5663_p4 }
  0x57   : > { %p5669_p1 = pnand %p5668_p10, %p5664_p12 }
  0x59   : > { %5672 = shalt.err (!%p5669_p1)
}
  0x5a   : > { %s5673_s25 = scalar_lea.vmem %s6240_s29, 768  ;;  %s5997_s7 = smov [#allocation16]  }
  0x5b   : > { %p5674_p0 = scmp.ne.s32.totalorder %s6240_s29, %s5673_s25  ;;  %s5678_s14 = sshll.u32 %s5997_s7, 4  ;;  %s5679_s14 = int_to_ptr.vmem [resolvable:$false] %s5678_s14 }
  0x5c   : > { %s5680_s28 = scalar_lea.vmem %s5679_s14, 1536  ;;  %p5681_p7 = scmp.lt.s32.totalorder %s6240_s29, %s5679_s14 }
  0x5d   : > { %p5676_p5 = pnand %p5674_p0, %p6252_p3  ;;  %p5682_p6 = scmp.lt.s32.totalorder %s5680_s28, %s5673_s25 }
  0x5f   : > { %p5677_p4 = pneg %p5676_p5  ;;  %p5683_p13 = por %p5682_p6, %p5681_p7 }
  0x61   : > { %p5684_p2 = pnand %p5683_p13, %p5677_p4 }
  0x63   : > { %5687 = shalt.err (!%p5684_p2)
}
  0x64   : > { %s8260_s6 = smov 256   ;;  %s8261_s22 = smov 16  }
  0x65   : > { %5367 = dma.hbm_to_vmem [thread:$0]  (!%p6224_p11), %s6236_s12, 768, %s6240_s29, %s6246_s19, %s8260_s6, %s8260_s6, %s8261_s22  }
  0x66   : > { %s5699_s7 = scalar_lea.vmem %s6242_s26, 2048  ;;  %p8299_p6 = scmp.ne.s32.totalorder %s8293_s27, 0 }
  0x67   : > { %p5700_p0 = scmp.ne.s32.totalorder %s6242_s26, %s5699_s7  ;;  %p5707_p12 = scmp.lt.s32.totalorder %s6242_s26, %s6242_s26 }
  0x68   : > { %p8300_p13 = pneg %p8299_p6  ;;  %p5708_p8 = scmp.lt.s32.totalorder %s5699_s7, %s5699_s7 }
  0x6a   : > { %p5702_p2 = pnand %p5700_p0, %p8300_p13  ;;  %p5709_p9 = por %p5708_p8, %p5707_p12 }
  0x6c   : > { %p5703_p7 = pneg %p5702_p2 }
  0x6e   : > { %p5710_p10 = pnand %p5709_p9, %p5703_p7 }
  0x70   : > { %5713 = shalt.err (!%p5710_p10)
}
  0x71   : > { %s8301_s17 = smov 8   ;;  %s8302_s25 = smov 128  }
  0x72   : > { %s8303_s8 = sld [smem:[#allocation54_spill]]  ;;  %s8263_s29 = sshll.u32 %s6207_s15, 5 }
  0x73   : > { %s8262_s14 = sshll.u32 %s5990_s10, 9  ;;  %s8304_s1 = sld [smem:[#allocation50_spill]] }
  0x74   : > { %s510_s20 = scalar_lea.vmem [#allocation13], %s8263_s29  ;;  %s507_s6 = scalar_lea.sflag [#allocation14], %s6207_s15 }
  0x75   : > { %s517_s12 = sshll.u32 %s510_s20, 4  ;;  %s6305_s12 = int_to_ptr.vmem [resolvable:$true] %s517_s12 }
  0x78   : > { %5360 = dma.hbm_to_vmem [thread:$0]  (!%p8299_p6), %s8303_s8, 2048, %s6242_s26, [#allocation23], %s8302_s25, %s8302_s25, %s8301_s17  }
  0x79   : > { %s6301_s27 = scalar_lea.hbm %s8304_s1, %s8262_s14  ;;  %s5719_s28 = scalar_lea.hbm %s8304_s1, 1024 }
  0x7a   : > { %s5714_s22 = scalar_lea.hbm %s6301_s27, 512  ;;  %p5720_p0 = scmp.lt.s32.totalorder %s6301_s27, %s8304_s1 }
  0x7b   : > { %p5715_p1 = scmp.ne.s32.totalorder %s6301_s27, %s5714_s22  ;;  %p5721_p6 = scmp.lt.s32.totalorder %s5719_s28, %s5714_s22 }
  0x7d   : > { %p5717_p5 = pnand %p5715_p1, %p6252_p3  ;;  %p5722_p13 = por %p5721_p6, %p5720_p0 }
  0x7f   : > { %p5718_p4 = pneg %p5717_p5 }
  0x81   : > { %p5723_p2 = pnand %p5722_p13, %p5718_p4 }
  0x83   : > { %5726 = shalt.err (!%p5723_p2)
}
  0x84   : > { %s5727_s20 = scalar_lea.vmem %s6305_s12, 512  ;;  %s6000_s29 = smov [#allocation13]  }
  0x85   : > { %p5728_p7 = scmp.ne.s32.totalorder %s6305_s12, %s5727_s20  ;;  %s5732_s2 = sshll.u32 %s6000_s29, 4  ;;  %s5733_s2 = int_to_ptr.vmem [resolvable:$false] %s5732_s2 }
  0x86   : > { %s5734_s26 = scalar_lea.vmem %s5733_s2, 1024  ;;  %p5735_p9 = scmp.lt.s32.totalorder %s6305_s12, %s5733_s2 }
  0x87   : > { %p5730_p12 = pnand %p5728_p7, %p6252_p3  ;;  %p5736_p10 = scmp.lt.s32.totalorder %s5734_s26, %s5727_s20 }
  0x89   : > { %p5731_p8 = pneg %p5730_p12  ;;  %p5737_p1 = por %p5736_p10, %p5735_p9 }
  0x8b   : > { %p5738_p5 = pnand %p5737_p1, %p5731_p8 }
  0x8d   : > { %5741 = shalt.err (!%p5738_p5)
}
  0x8e   : > { %s8305_s22 = smov 16   ;;  %s8306_s14 = smov 256  }
  0x8f   : > { %5364 = dma.hbm_to_vmem [thread:$0]  (!%p6224_p11), %s6301_s27, 512, %s6305_s12, %s507_s6, %s8306_s14, %s8306_s14, %s8305_s22  }
  0x90   : > { %s8307_s28 = sshll.u32 %s5990_s10, 9  ;;  %s8308_s20 = sshll.u32 %s6207_s15, 5 }
  0x91   : > { %s6336_s2 = scalar_lea.hbm %s8223_s3, %s8307_s28  ;;  %s552_s26 = scalar_lea.vmem [#allocation18], %s8308_s20 }
  0x92   : > { %s559_s1 = sshll.u32 %s552_s26, 4  ;;  %s5742_s8 = scalar_lea.hbm %s6336_s2, 512  ;;  %s560_s1 = int_to_ptr.vmem [resolvable:$true] %s559_s1 }
  0x93   : > { %p5743_p4 = scmp.ne.s32.totalorder %s6336_s2, %s5742_s8  ;;  %s5747_s27 = scalar_lea.hbm %s8223_s3, 1024 }
  0x94   : > { %p5748_p13 = scmp.lt.s32.totalorder %s6336_s2, %s8223_s3  ;;  %p5749_p2 = scmp.lt.s32.totalorder %s5747_s27, %s5742_s8 }
  0x95   : > { %p5745_p0 = pnand %p5743_p4, %p6252_p3 }
  0x96   : > { %p5750_p7 = por %p5749_p2, %p5748_p13 }
  0x97   : > { %p5746_p6 = pneg %p5745_p0 }
  0x99   : > { %p5751_p12 = pnand %p5750_p7, %p5746_p6 }
  0x9b   : > { %5754 = shalt.err (!%p5751_p12)
}
  0x9c   : > { %s5755_s14 = scalar_lea.vmem %s560_s1, 512  ;;  %s6001_s28 = smov [#allocation18]  }
  0x9d   : > { %p5756_p8 = scmp.ne.s32.totalorder %s560_s1, %s5755_s14  ;;  %s5760_s29 = sshll.u32 %s6001_s28, 4  ;;  %s5761_s29 = int_to_ptr.vmem [resolvable:$false] %s5760_s29 }
  0x9e   : > { %s5762_s7 = scalar_lea.vmem %s5761_s29, 1024  ;;  %p5763_p1 = scmp.lt.s32.totalorder %s560_s1, %s5761_s29 }
  0x9f   : > { %p5758_p9 = pnand %p5756_p8, %p6252_p3  ;;  %p5764_p5 = scmp.lt.s32.totalorder %s5762_s7, %s5755_s14 }
  0xa1   : > { %p5759_p10 = pneg %p5758_p9  ;;  %p5765_p4 = por %p5764_p5, %p5763_p1 }
  0xa3   : > { %p5766_p0 = pnand %p5765_p4, %p5759_p10 }
  0xa5   : > { %5769 = shalt.err (!%p5766_p0)
}
  0xa6   : > { %5370 = dma.hbm_to_vmem [thread:$0]  (!%p6224_p11), %s6336_s2, 512, %s560_s1, %s6246_s19, %s8302_s25, %s8302_s25, %s8301_s17  }
  0xa7   : > { %s8309_s8 = smul.u32 768, %s5990_s10  ;;  %s8311_s22 = sand.u32 1, %s5990_s10  }
  0xa8   : > { %s8310_s6 = smul.u32 48, %s6207_s15  ;;  %s570_s14 = scalar_lea.sflag [#allocation20], %s8311_s22 }
  0xa9   : > { %s6365_s26 = scalar_lea.hbm %s8224_s4, %s8309_s8  ;;  %s5775_s2 = scalar_lea.hbm %s8224_s4, 1536 }
  0xaa   : > { %s573_s27 = scalar_lea.vmem [#allocation19], %s8310_s6  ;;  %s5770_s28 = scalar_lea.hbm %s6365_s26, 768 }
  0xab   : > { %s580_s12 = sshll.u32 %s573_s27, 4  ;;  %p5771_p6 = scmp.ne.s32.totalorder %s6365_s26, %s5770_s28  ;;  %s6369_s12 = int_to_ptr.vmem [resolvable:$true] %s580_s12 }
  0xac   : > { %p5776_p7 = scmp.lt.s32.totalorder %s6365_s26, %s8224_s4  ;;  %p5777_p12 = scmp.lt.s32.totalorder %s5775_s2, %s5770_s28 }
  0xad   : > { %p5773_p13 = pnand %p5771_p6, %p6252_p3 }
  0xae   : > { %p5778_p8 = por %p5777_p12, %p5776_p7 }
  0xaf   : > { %p5774_p2 = pneg %p5773_p13 }
  0xb1   : > { %p5779_p9 = pnand %p5778_p8, %p5774_p2 }
  0xb3   : > { %5782 = shalt.err (!%p5779_p9)
}
  0xb4   : > { %s5783_s7 = scalar_lea.vmem %s6369_s12, 768  ;;  %s6002_s8 = smov [#allocation19]  }
  0xb5   : > { %p5784_p10 = scmp.ne.s32.totalorder %s6369_s12, %s5783_s7  ;;  %s5788_s11 = sshll.u32 %s6002_s8, 4  ;;  %s5789_s11 = int_to_ptr.vmem [resolvable:$false] %s5788_s11 }
  0xb6   : > { %s5790_s20 = scalar_lea.vmem %s5789_s11, 1536  ;;  %p5791_p4 = scmp.lt.s32.totalorder %s6369_s12, %s5789_s11 }
  0xb7   : > { %p5786_p1 = pnand %p5784_p10, %p6252_p3  ;;  %p5792_p0 = scmp.lt.s32.totalorder %s5790_s20, %s5783_s7 }
  0xb9   : > { %p5787_p5 = pneg %p5786_p1  ;;  %p5793_p6 = por %p5792_p0, %p5791_p4 }
  0xbb   : > { %p5794_p13 = pnand %p5793_p6, %p5787_p5 }
  0xbd   : > { %5797 = shalt.err (!%p5794_p13)
}
  0xbe   : > { %5373 = dma.hbm_to_vmem [thread:$0]  (!%p6224_p11), %s6365_s26, 768, %s6369_s12, %s570_s14, %s8302_s25, %s8302_s25, %s8301_s17  }
  0xbf   : > { %p8312_p3 = scmp.ne.s32.totalorder %s8292_s18, 0 }
  0xc1   : > { %592 = sbr.rel (%p8312_p3) target bundleno = 1716 (0x6b4), region = 64 }
  0xc6   : > { %s6399_s13 = sand.u32 1, %s5982_s21   ;;  %p8313_p2 = scmp.ne.s32.totalorder %s8288_s30, 0 }
  0xc7   : > { %s6402_s6 = sshll.u32 %s6399_s13, 5  ;;  %s595_s27 = scalar_lea.sflag [#allocation14], %s6399_s13 }
  0xc8   : > { %s6406_s24 = scalar_lea.vmem [#allocation13], %s6402_s6 }
  0xc9   : > { %5945 = dma.done.wait (%p8313_p2), %s595_s27, 512  }
  0xca   : > { %5947 = vsyncadd (%p8313_p2), %s595_s27, 4294966784  ;;  %s6413_s18 = sand.u32 1, %s6138_s23   ;;  %s6416_s17 = smul.u32 48, %s6399_s13 }
  0xcb   : > { %s604_s25 = scalar_lea.sflag [#allocation17], %s6413_s18 }
  0xcc   : > { %s6420_s26 = scalar_lea.vmem [#allocation16], %s6416_s17 }
  0xcd   : > { %5949 = dma.done.wait (%p8313_p2), %s604_s25, 1280  }
  0xce   : > { %5951 = vsyncadd (%p8313_p2), %s604_s25, 4294966016  ;;  %s6427_s12 = scalar_lea.vmem [#allocation18], %s6402_s6  ;;  %s622_s22 = scalar_lea.sflag [#allocation20], %s6413_s18 }
  0xcf   : > { %s6431_s14 = scalar_lea.vmem [#allocation19], %s6416_s17 }
  0xd0   : > { %5953 = dma.done.wait (%p8313_p2), %s622_s22, 768  }
  0xd1   : > { %5955 = vsyncadd (%p8313_p2), %s622_s22, 4294966528  ;;  %p8314_p11 = scmp.eq.s32.totalorder %s6138_s23, 0 }
  0xd3   : > { %5957 = dma.done.wait (%p8314_p11), [#allocation20], 256   ;;  %p8315_p7 = pmov %p8314_p11 }
  0xd5   : > { %5959 = vsyncadd (%p8315_p7), [#allocation20], 4294967040  ;;  %p8316_p12 = pmov %p8315_p7 }
  0xd6   : > { %p8317_p8 = pmov %p8315_p7 }
  0xd7   : > { %5961 = dma.done.wait (%p8316_p12), [#allocation23], 2304  }
  0xd8   : > { %5963 = vsyncadd (%p8317_p8), [#allocation23], 4294964992  ;;  %vm730_vm0 = vcmask 1041408   ;;  %vm731_vm1 = vcmask 1043458   ;;  %vm733_vm2 = vcmask 332804   ;;  %v6003_v0 = vmov 0.0  }
  0xd9   : > { %vm732_vm3 = vmor %vm731_vm1, %vm730_vm0  ;;  %729 = vst [vmem:[#allocation2] sm:$0x3f] %v6003_v0  ;;  %p724_p9 = scmp.lt.s32.totalorder %s6138_s23, 1  ;;  %v816_v1 = vlaneseq  ;;  %1809 = vmatprep.mubr.f32.mxu1 %v6003_v0  ;;  %1738 = vmatprep.mubr.f32.mxu0 %v6003_v0  ;;  %v6004_v2 = vmov 1966171168   ;;  %vm2800_vm5 = vcmask 1043456  }
  0xda   : > { %2799 = vst [vmem:[#allocation3] sm:$0xff] %v6003_v0  ;;  %3563 = vst [vmem:[#allocation4] sm:$0xf] %v6003_v0  ;;  %v814_v3 = vunpack.c.l.s4 %v6004_v2  ;;  %vm2801_vm6 = vcmask 203780   ;;  %s6005_s29 = smov 41   ;;  %vm3564_vm8 = vcmask 1043968  }
  0xdb   : > { %vm734_vm4 = vmor %vm733_vm2, %vm732_vm3  ;;  %s725_s30 = scalar_select %p724_p9, %s6138_s23, 1  ;;  %v6456_v5 = vshrl.u32 %v816_v1, 7  ;;  %vm6571_vm9 = vcmp.lt.s32.totalorder %v816_v1, 256  ;;  %vm3565_vm10 = vcmask 138244   ;;  %vm3572_vm12 = vcmask 523264  }
  0xdc   : > { %735 = vst.msk [vmem:[#allocation2 + $0x16] sm:$0x3f] %vm734_vm4, %v6003_v0  ;;  %vm2802_vm7 = vmor %vm2801_vm6, %vm2800_vm5  ;;  %v815_v4 = vunpack.c.0.s8 %v814_v3  ;;  %s6007_s15 = smov 73   ;;  %s6008_s7 = smov 9   ;;  %vm3588_vm13 = vcmask 516096   ;;  %vm1060_vm14 = vcmask 140288  }
  0xdd   : > { %2803 = vst.msk [vmem:[#allocation3 + $0x10] sm:$0xff] %vm2802_vm7, %v6003_v0  ;;  %s5146_s28 = sshll.u32 %s725_s30, 6  ;;  %vm3566_vm11 = vmor %vm3565_vm10, %vm3564_vm8  ;;  %s6009_s8 = smov 105   ;;  %vm1128_vm15 = vcmask 596992   ;;  %vm1222_vm0 = vcmask 859136   ;;  %vm1319_vm1 = vcmask 72704  }
  0xde   : > { %s6461_s2 = scalar_lea.vmem %s8220_s0, %s5146_s28  ;;  %v6494_v20 = vsub.s32 %v815_v4, %v6456_v5  ;;  %3567 = vst.msk [vmem:[#allocation4 + $0x4] sm:$0xff] %vm3566_vm11, %v6003_v0  ;;  %s6010_s11 = smov 121   ;;  %vm1034_vm2 = vcmask 334848   ;;  %vm1646_vm3 = vcmask 1045504   ;;  %vm1154_vm4 = vcmask 142338  }
  0xdf   : > { %v6464_v6 = vld [vmem:[%s6461_s2] sm:$0xff]  ;;  %v6467_v7 = vld [vmem:[%s6461_s2 + $0x8] sm:$0xff]  ;;  %v6470_v8 = vld [vmem:[%s6461_s2 + $0x10] sm:$0xff]  ;;  %s6011_s20 = smov 89   ;;  %s6012_s27 = smov 57   ;;  %vm1248_vm6 = vcmask 144388  }
  0xe0   : > { %v6473_v9 = vld [vmem:[%s6461_s2 + $0x18] sm:$0xff]  ;;  %v6476_v10 = vld [vmem:[%s6461_s2 + $0x20] sm:$0xff]  ;;  %v6479_v11 = vld [vmem:[%s6461_s2 + $0x28] sm:$0xff]  ;;  %v744_v12 = vrot.slane %v6464_v6, 4  ;;  %v750_v13 = vrot.slane %v6467_v7, 4  ;;  %v756_v14 = vrot.slane %v6470_v8, 4 }
  0xe1   : > { %v6485_v15 = vld [vmem:[%s6461_s2 + $0x30] sm:$0xff]  ;;  %v6488_v16 = vld [vmem:[%s6461_s2 + $0x38] sm:$0xff]  ;;  %v762_v17 = vrot.slane %v6473_v9, 4  ;;  %v768_v18 = vrot.slane %v6476_v10, 4  ;;  %v774_v19 = vrot.slane %v6479_v11, 4  ;;  %8318 = vst [vmem:[#allocation45_spill] sm:$0xff] %v6494_v20 }
  0xe2   : > { %v745_v22 = vadd.f32 %v744_v12, %v6464_v6  ;;  %v751_v23 = vadd.f32 %v750_v13, %v6467_v7  ;;  %v757_v24 = vadd.f32 %v756_v14, %v6470_v8  ;;  %v780_v25 = vrot.slane %v6485_v15, 4  ;;  %s6013_s25 = smov 25   ;;  %s6014_s22 = smov 65  }
  0xe3   : > { %v5075_v21 = vld.sshfl [vmem:[#allocation2 + $0x16] sm:$0x3 pattern:$0x76325410]  ;;  %v763_v26 = vadd.f32 %v762_v17, %v6473_v9  ;;  %v769_v27 = vadd.f32 %v768_v18, %v6476_v10  ;;  %v775_v28 = vadd.f32 %v774_v19, %v6479_v11  ;;  %v786_v29 = vrot.slane %v6488_v16, 4  ;;  %s6015_s30 = smov 113  }
  0xe4   : > { %1411 = vrot.lane.b32.xlu0 %v5075_v21, %s6005_s29  ;;  %v746_v30 = vrot.slane %v745_v22, 2  ;;  %v752_v31 = vrot.slane %v751_v23, 2  ;;  %v758_v32 = vrot.slane %v757_v24, 2  ;;  %v781_v33 = vadd.f32 %v780_v25, %v6485_v15  ;;  %s6016_s28 = smov 33   ;;  %p8332_p1 = scmp.ne.s32.totalorder %s8289_s16, 0 }
  0xe5   : > { %v764_v34 = vrot.slane %v763_v26, 2  ;;  %v770_v35 = vrot.slane %v769_v27, 2  ;;  %v776_v36 = vrot.slane %v775_v28, 2  ;;  %v787_v37 = vadd.f32 %v786_v29, %v6488_v16  ;;  %s6025_s1 = smov [#allocation25]  }
  0xe6   : > { %v747_v38 = vadd.f32 %v746_v30, %v745_v22  ;;  %v753_v39 = vadd.f32 %v752_v31, %v751_v23  ;;  %v759_v40 = vadd.f32 %v758_v32, %v757_v24  ;;  %v782_v41 = vrot.slane %v781_v33, 2  ;;  %s5802_s19 = sshll.u32 %s6025_s1, 4  ;;  %s5803_s19 = int_to_ptr.vmem [resolvable:$false] %s5802_s19 }
  0xe7   : > { %v765_v42 = vadd.f32 %v764_v34, %v763_v26  ;;  %v771_v43 = vadd.f32 %v770_v35, %v769_v27  ;;  %v777_v44 = vadd.f32 %v776_v36, %v775_v28  ;;  %v788_v45 = vrot.slane %v787_v37, 2 }
  0xe8   : > { %v748_v46 = vrot.slane %v747_v38, 1  ;;  %v754_v47 = vrot.slane %v753_v39, 1  ;;  %v760_v48 = vrot.slane %v759_v40, 1  ;;  %v783_v49 = vadd.f32 %v782_v41, %v781_v33 }
  0xe9   : > { %v766_v50 = vrot.slane %v765_v42, 1  ;;  %v772_v51 = vrot.slane %v771_v43, 1  ;;  %v778_v52 = vrot.slane %v777_v44, 1  ;;  %v789_v53 = vadd.f32 %v788_v45, %v787_v37 }
  0xea   : > { %v749_v54 = vadd.f32 %v748_v46, %v747_v38  ;;  %v755_v55 = vadd.f32 %v754_v47, %v753_v39  ;;  %v761_v56 = vadd.f32 %v760_v48, %v759_v40  ;;  %v784_v57 = vrot.slane %v783_v49, 1 }
  0xeb   : > { %v767_v58 = vadd.f32 %v766_v50, %v765_v42  ;;  %v773_v59 = vadd.f32 %v772_v51, %v771_v43  ;;  %v779_v60 = vadd.f32 %v778_v52, %v777_v44  ;;  %v790_v61 = vrot.slane %v789_v53, 1 }
  0xec   : > { %v785_v62 = vadd.f32 %v784_v57, %v783_v49  ;;  %v793_v63 = vmul.f32 0.125, %v749_v54  ;;  %v794_v2 = vmul.f32 0.125, %v755_v55  ;;  %v795_v3 = vmul.f32 0.125, %v761_v56 }
  0xed   : > { %v791_v4 = vadd.f32 %v790_v61, %v789_v53  ;;  %v796_v21 = vmul.f32 0.125, %v767_v58  ;;  %v797_v22 = vmul.f32 0.125, %v773_v59  ;;  %v798_v23 = vmul.f32 0.125, %v779_v60  ;;  %v2804_v58 = vld [vmem:[%s6406_s24] sm:$0xff]  ;;  %v2806_v59 = vld [vmem:[%s6406_s24 + $0x10] sm:$0xff] }
  0xee   : > { %v799_v24 = vmul.f32 0.125, %v785_v62  ;;  %v809_v26 = vcombine.low %v793_v63, %v794_v2  ;;  %v862_v27 = vmax.f32 %v6464_v6, %v744_v12  ;;  %v868_v28 = vmax.f32 %v6467_v7, %v750_v13  ;;  %v2805_v63 = vld [vmem:[%s6406_s24 + $0x8] sm:$0xff]  ;;  %v2807_v2 = vld [vmem:[%s6406_s24 + $0x18] sm:$0xff] }
  0xef   : > { %v800_v30 = vmul.f32 0.125, %v791_v4  ;;  %v810_v31 = vcombine.low %v795_v3, %v796_v21  ;;  %v811_v32 = vcombine.low %v797_v22, %v798_v23  ;;  %v874_v33 = vmax.f32 %v6470_v8, %v756_v14 }
  0xf0   : > { %v819_v34 = vrot.slane %v809_v26, %v6494_v20  ;;  %v863_v35 = vrot.slane %v862_v27, 2  ;;  %v869_v36 = vrot.slane %v868_v28, 2  ;;  %v880_v37 = vmax.f32 %v6473_v9, %v762_v17 }
  0xf1   : > { %v812_v38 = vcombine.low %v799_v24, %v800_v30  ;;  %v826_v6 = vrot.slane %v810_v31, %v6494_v20  ;;  %v833_v7 = vrot.slane %v811_v32, %v6494_v20  ;;  %v875_v12 = vrot.slane %v874_v33, 2  ;;  %v2883_v32 = vld [vmem:[%s6420_s26] sm:$0xff] }
  0xf2   : > { %v864_v13 = vmax.f32 %v862_v27, %v863_v35  ;;  %v870_v39 = vmax.f32 %v868_v28, %v869_v36  ;;  %v881_v40 = vrot.slane %v880_v37, 2  ;;  %v886_v8 = vmax.f32 %v6476_v10, %v768_v18 }
  0xf3   : > { %v840_v14 = vrot.slane %v812_v38, %v6494_v20  ;;  %v841_v41 = vcombine.low %v819_v34, %v826_v6  ;;  %v876_v42 = vmax.f32 %v874_v33, %v875_v12  ;;  %v892_v9 = vmax.f32 %v6479_v11, %v774_v19  ;;  %v2885_v38 = vld [vmem:[%s6420_s26 + $0x10] sm:$0xff]  ;;  %v6557_v6 = vld [vmem:[%s6420_s26 + $0x18] sm:$0xff] }
  0xf4   : > { %v865_v17 = vrot.slane %v864_v13, 1  ;;  %v871_v43 = vrot.slane %v870_v39, 1  ;;  %v882_v44 = vmax.f32 %v880_v37, %v881_v40  ;;  %v887_v45 = vrot.slane %v886_v8, 2  ;;  %v6553_v37 = vld [vmem:[%s6420_s26 + $0x8] sm:$0xff]  ;;  %v2887_v40 = vld [vmem:[%s6420_s26 + $0x20] sm:$0xff] }
  0xf5   : > { %v842_v46 = vcombine.low %v833_v7, %v840_v14  ;;  %v849_v47 = vrot.slane %v841_v41, %v6494_v20  ;;  %v877_v48 = vrot.slane %v876_v42, 1  ;;  %v893_v49 = vrot.slane %v892_v9, 2 }
  0xf6   : > { %v866_v10 = vmax.f32 %v864_v13, %v865_v17  ;;  %v872_v18 = vmax.f32 %v870_v39, %v871_v43  ;;  %v883_v50 = vrot.slane %v882_v44, 1  ;;  %v888_v51 = vmax.f32 %v886_v8, %v887_v45 }
  0xf7   : > { %v856_v52 = vrot.slane %v842_v46, %v6494_v20  ;;  %v878_v11 = vmax.f32 %v876_v42, %v877_v48  ;;  %v894_v19 = vmax.f32 %v892_v9, %v893_v49  ;;  %v898_v53 = vmax.f32 %v6485_v15, %v780_v25  ;;  %v2888_v9 = vld [vmem:[%s6420_s26 + $0x28] sm:$0xff] }
  0xf8   : > { %v884_v54 = vmax.f32 %v882_v44, %v883_v50  ;;  %v889_v55 = vrot.slane %v888_v51, 1  ;;  %v904_v56 = vmax.f32 %v6488_v16, %v786_v29  ;;  %v917_v57 = vcombine.low %v866_v10, %v872_v18 }
  0xf9   : > { %v857_v60 = vcombine.low %v849_v47, %v856_v52  ;;  %v895_v61 = vrot.slane %v894_v19, 1  ;;  %v899_v62 = vrot.slane %v898_v53, 2  ;;  %v2808_v16 = vadd.f32 %v2806_v59, %v2804_v58 }
  0xfa   : > { %v890_v3 = vmax.f32 %v888_v51, %v889_v55  ;;  %v905_v4 = vrot.slane %v904_v56, 2  ;;  %v918_v21 = vcombine.low %v878_v11, %v884_v54  ;;  %v927_v15 = vrot.slane %v917_v57, %v6494_v20 }
  0xfb   : > { %860 = vst [vmem:[#allocation2 + $0x6] ss:$2 sm:$0xff] %v857_v60  ;;  %v896_v25 = vmax.f32 %v894_v19, %v895_v61  ;;  %v900_v22 = vmax.f32 %v898_v53, %v899_v62  ;;  %v2815_v24 = vadd.f32 %v2807_v2, %v2805_v63  ;;  %v2849_v26 = vmax.f32 %v2804_v58, %v2806_v59 }
  0xfc   : > { %v906_v29 = vmax.f32 %v904_v56, %v905_v4  ;;  %v934_v23 = vrot.slane %v918_v21, %v6494_v20  ;;  %v2809_v30 = vrot.slane %v2808_v16, 4  ;;  %v2856_v31 = vmax.f32 %v2805_v63, %v2807_v2 }
  0xfd   : > { %v901_v27 = vrot.slane %v900_v22, 1  ;;  %v919_v28 = vcombine.low %v890_v3, %v896_v25  ;;  %v2816_v35 = vrot.slane %v2815_v24, 4  ;;  %v2850_v36 = vrot.slane %v2849_v26, 4 }
  0xfe   : > { %v907_v33 = vrot.slane %v906_v29, 1  ;;  %v949_v34 = vcombine.low %v927_v15, %v934_v23  ;;  %v2810_v13 = vadd.f32 %v2809_v30, %v2808_v16  ;;  %v2857_v39 = vrot.slane %v2856_v31, 4 }
  0xff   : > { %v902_v7 = vmax.f32 %v900_v22, %v901_v27  ;;  %v941_v12 = vrot.slane %v919_v28, %v6494_v20  ;;  %v2817_v41 = vadd.f32 %v2816_v35, %v2815_v24  ;;  %v2851_v42 = vmax.f32 %v2849_v26, %v2850_v36 }
 0x100   : > { %v908_v8 = vmax.f32 %v906_v29, %v907_v33  ;;  %v957_v14 = vrot.slane %v949_v34, %v6494_v20  ;;  %v2811_v17 = vrot.slane %v2810_v13, 2  ;;  %v2858_v43 = vmax.f32 %v2856_v31, %v2857_v39 }
 0x101   : > { %v2889_v44 = vadd.f32 %v2885_v38, %v2883_v32  ;;  %v2897_v45 = vadd.f32 %v6557_v6, %v6553_v37  ;;  %v2818_v47 = vrot.slane %v2817_v41, 2  ;;  %v2852_v48 = vrot.slane %v2851_v42, 2 }
 0x102   : > { %v920_v46 = vcombine.low %v902_v7, %v908_v8  ;;  %v2928_v49 = vmax.f32 %v2883_v32, %v2887_v40  ;;  %v2812_v10 = vadd.f32 %v2811_v17, %v2810_v13  ;;  %v2859_v18 = vrot.slane %v2858_v43, 2 }
 0x103   : > { %v2890_v50 = vadd.f32 %v2889_v44, %v2887_v40  ;;  %v2898_v51 = vadd.f32 %v2897_v45, %v2888_v9  ;;  %v2819_v11 = vadd.f32 %v2818_v47, %v2817_v41  ;;  %v2853_v19 = vmax.f32 %v2851_v42, %v2852_v48 }
 0x104   : > { %v948_v52 = vrot.slane %v920_v46, %v6494_v20  ;;  %v2929_v53 = vmax.f32 %v2928_v49, %v2885_v38  ;;  %v2813_v54 = vrot.slane %v2812_v10, 1  ;;  %v2860_v55 = vmax.f32 %v2858_v43, %v2859_v18  ;;  %v3568_v18 = vld [vmem:[%s6427_s12] sm:$0xff] }
 0x105   : > { %v2891_v56 = vrot.slane %v2890_v50, 4  ;;  %v2899_v57 = vrot.slane %v2898_v51, 4  ;;  %v2820_v59 = vrot.slane %v2819_v11, 1  ;;  %v2854_v60 = vrot.slane %v2853_v19, 1 }
 0x106   : > { %v950_v58 = vcombine.low %v941_v12, %v948_v52  ;;  %v2930_v61 = vrot.slane %v2929_v53, 4  ;;  %v2814_v62 = vadd.f32 %v2813_v54, %v2812_v10  ;;  %v2861_v63 = vrot.slane %v2860_v55, 1 }
 0x107   : > { %v2892_v2 = vadd.f32 %v2891_v56, %v2890_v50  ;;  %v2900_v3 = vadd.f32 %v2899_v57, %v2898_v51  ;;  %v6006_v21 = vmov 1983009808   ;;  %v2821_v25 = vadd.f32 %v2820_v59, %v2819_v11  ;;  %v3569_v50 = vld [vmem:[%s6427_s12 + $0x8] sm:$0xff] }
 0x108   : > { %v964_v4 = vrot.slane %v950_v58, %v6494_v20  ;;  %v977_v15 = vunpack.c.l.s4 %v6006_v21  ;;  %v2855_v22 = vmax.f32 %v2853_v19, %v2854_v60  ;;  %v2823_v16 = vmul.f32 0.0625, %v2814_v62 }
 0x109   : > { %v2862_v29 = vmax.f32 %v2860_v55, %v2861_v63  ;;  %v2893_v23 = vrot.slane %v2892_v2, 2  ;;  %v2901_v24 = vrot.slane %v2900_v3, 2  ;;  %v2824_v27 = vmul.f32 0.0625, %v2821_v25 }
 0x10a   : > { %v965_v26 = vcombine.low %v957_v14, %v964_v4  ;;  %v2931_v30 = vmax.f32 %v2929_v53, %v2930_v61  ;;  %v2936_v31 = vmax.f32 %v6553_v37, %v2888_v9  ;;  %v978_v32 = vunpack.c.0.s8 %v977_v15 }
 0x10b   : > { %v2865_v28 = vcombine.low %v2855_v22, %v2862_v29  ;;  %v2827_v33 = vcombine.low %v2823_v16, %v2824_v27  ;;  %v2894_v34 = vadd.f32 %v2893_v23, %v2892_v2  ;;  %v2902_v36 = vadd.f32 %v2901_v24, %v2900_v3  ;;  %v3570_v2 = vld [vmem:[%s6427_s12 + $0x10] sm:$0xff]  ;;  %v3571_v3 = vld [vmem:[%s6427_s12 + $0x18] sm:$0xff] }
 0x10c   : > { %968 = vst [vmem:[#allocation2 + $0x7] ss:$2 sm:$0xff] %v965_v26  ;;  %v2932_v13 = vrot.slane %v2931_v30, 2  ;;  %v2937_v37 = vmax.f32 %v2936_v31, %v6557_v6  ;;  %v6578_v39 = vsub.s32 %v978_v32, %v6456_v5  ;;  %v3573_v58 = vsel %vm3572_vm12, %v3568_v18, 0.0  ;;  %v3604_v32 = vld [vmem:[%s6431_s14] sm:$0xff] }
 0x10d   : > { %v2872_v35 = vrot.slane %v2865_v28, %v6494_v20  ;;  %v2834_v38 = vrot.slane %v2827_v33, %v6494_v20  ;;  %v2895_v8 = vrot.slane %v2894_v34, 1  ;;  %v2903_v14 = vrot.slane %v2902_v36, 1 }
 0x10e   : > { %v2933_v9 = vmax.f32 %v2931_v30, %v2932_v13  ;;  %v2938_v17 = vrot.slane %v2937_v37, 4  ;;  %v3574_v59 = vsel %vm3572_vm12, %v3569_v50, 0.0  ;;  %v3576_v24 = vsel %vm3572_vm12, %v3570_v2, 0.0 }
 0x10f   : > { %v2879_v12 = vrot.slane %v2872_v35, %v6494_v20  ;;  %v2841_v40 = vrot.slane %v2834_v38, %v6494_v20  ;;  %v2896_v46 = vadd.f32 %v2895_v8, %v2894_v34  ;;  %v2904_v47 = vadd.f32 %v2903_v14, %v2902_v36  ;;  %v3605_v38 = vld [vmem:[%s6431_s14 + $0x8] sm:$0xff] }
 0x110   : > { %v2934_v11 = vrot.slane %v2933_v9, 1  ;;  %v2939_v19 = vmax.f32 %v2937_v37, %v2938_v17  ;;  %v3575_v16 = vadd.f32 %v3574_v59, %v3573_v58  ;;  %v3578_v26 = vsel %vm3572_vm12, %v3571_v3, 0.0 }
 0x111   : > { %2882 = vst.msk [vmem:[#allocation3 + $0x9] ss:$4 sm:$0x3] %vm6571_vm9, %v2879_v12  ;;  %2848 = vst.msk [vmem:[#allocation3 + $0x8] ss:$4 sm:$0x3] %vm6571_vm9, %v2841_v40 }
 0x112   : > { %v2906_v53 = vmul.f32 0.041666668, %v2896_v46  ;;  %v2907_v57 = vmul.f32 0.041666668, %v2904_v47  ;;  %v6641_v4 = vmax.f32 %v2933_v9, %v2934_v11  ;;  %v2940_v21 = vrot.slane %v2939_v19, 2  ;;  %v3608_v11 = vld [vmem:[%s6431_s14 + $0x20] sm:$0xff] }
 0x113   : > { %v6586_v41 = vld [vmem:[#allocation2 + $0x8] sm:$0xff]  ;;  %v6614_v51 = vld [vmem:[#allocation2 + $0x10] sm:$0xff]  ;;  %v3590_v30 = vsel %vm3572_vm12, %v3568_v18, -inf  ;;  %v3591_v31 = vsel %vm3572_vm12, %v3569_v50, -inf  ;;  %v3592_v35 = vsel %vm3572_vm12, %v3570_v2, -inf  ;;  %v3593_v36 = vsel %vm3572_vm12, %v3571_v3, -inf }
 0x114   : > { %v6588_v6 = vld [vmem:[#allocation2 + $0xe] sm:$0xff]  ;;  %v6590_v42 = vld [vmem:[#allocation2 + $0x4] sm:$0xff]  ;;  %v1459_v43 = vrot.slane %v6586_v41, %v6578_v39  ;;  %v1445_v44 = vcombine.low %v6586_v41, %v6586_v41  ;;  %v1462_v61 = vcombine.low %v6614_v51, %v6614_v51  ;;  %v2910_v23 = vcombine.low %v2906_v53, %v2907_v57 }
 0x115   : > { %v6598_v45 = vrot.slane %v6588_v6, %v6578_v39  ;;  %v6608_v49 = vrot.slane %v6590_v42, %v6578_v39  ;;  %v6610_v10 = vld [vmem:[#allocation2 + $0x2] sm:$0xff]  ;;  %v6616_v52 = vld [vmem:[#allocation2 + $0xa] sm:$0xff]  ;;  %v6622_v55 = vld [vmem:[#allocation2 + $0x12] sm:$0xff]  ;;  %v1162_v34 = vcombine.high %v6590_v42, %v6590_v42  ;;  %v2941_v17 = vmax.f32 %v2939_v19, %v2940_v21 }
 0x116   : > { %1491 = vrot.lane.b32.xlu1 %v1459_v43, %s6007_s15  ;;  %v6602_v48 = vrot.slane %v1445_v44, %v6578_v39  ;;  %v6620_v54 = vrot.slane %v6610_v10, %v6578_v39  ;;  %v6624_v56 = vld [vmem:[#allocation2 + $0x6] sm:$0xff]  ;;  %v6628_v60 = vcombine.high %v1459_v43, %v1459_v43  ;;  %v1537_v62 = vcombine.high %v6616_v52, %v6616_v52  ;;  %v3607_v50 = vld [vmem:[%s6431_s14 + $0x18] sm:$0xff] }
 0x117   : > { %1403 = vrot.lane.b32.xlu0 %v6598_v45, %s6005_s29  ;;  %v6637_v63 = vld [vmem:[#allocation2 + $0xc] sm:$0xff]  ;;  %v6645_v15 = vrot.slane %v6622_v55, %v6578_v39  ;;  %v1354_v25 = vcombine.high %v6624_v56, %v6624_v56  ;;  %v1085_v22 = vcombine.low %v6616_v52, %v6616_v52  ;;  %v6662_v27 = vrot.slane %v1462_v61, %v6578_v39  ;;  %v6687_v8 = vld [vmem:[#allocation2] sm:$0xff] }
 0x118   : > { %v6653_v29 = vrot.slane %v6637_v63, %v6578_v39  ;;  %v6665_v28 = vrot.slane %v1537_v62, %v6578_v39  ;;  %v1068_v33 = vcombine.low %v6610_v10, %v6610_v10  ;;  %v1084_v40 = vcombine.high %v6620_v54, %v6620_v54  ;;  %v3609_v62 = vld [vmem:[%s6431_s14 + $0x28] sm:$0xff] }
 0x119   : > { %v1569_v12 = vcombine.low %v6645_v15, %v6645_v15  ;;  %v6680_v13 = vrot.slane %v1354_v25, %v6578_v39  ;;  %v6683_v37 = vrot.slane %v1085_v22, %v6578_v39  ;;  %v2917_v9 = vrot.slane %v2910_v23, %v6494_v20 }
 0x11a   : > { %1305 = vrot.lane.b32.xlu1 %v6608_v49, %s6008_s7  ;;  %v6691_v14 = vcombine.low %v6653_v29, %v6653_v29  ;;  %v3610_v44 = vsel %vm3572_vm12, %v3604_v32, 0.0  ;;  %v3577_v46 = vadd.f32 %v3576_v24, %v3575_v16  ;;  %v3594_v47 = vmax.f32 %v3590_v30, %v3591_v31 }
 0x11b   : > { %1024 = vrot.lane.b32.xlu0 %v1459_v43, %s6005_s29  ;;  %v3606_v43 = vld [vmem:[%s6431_s14 + $0x10] sm:$0xff]  ;;  %v3595_v18 = vmax.f32 %v3592_v35, %v3593_v36  ;;  %v3611_v53 = vsel %vm3572_vm12, %v3605_v38, 0.0  ;;  %v6704_v19 = vrot.slane %v1162_v34, %v6578_v39  ;;  %v2924_v57 = vrot.slane %v2917_v9, %v6494_v20 }
 0x11c   : > { %v2942_v58 = vrot.slane %v2941_v17, 1  ;;  %v3579_v59 = vadd.f32 %v3578_v26, %v3577_v46  ;;  %v3612_v2 = vadd.f32 %v3611_v53, %v3610_v44  ;;  %v3613_v3 = vsel %vm3572_vm12, %v3606_v43, 0.0 }
 0x11d   : > { %v3596_v61 = vmax.f32 %v3594_v47, %v3595_v18  ;;  %2927 = vst.msk [vmem:[#allocation3 + $0xa] ss:$4 sm:$0x3] %vm6571_vm9, %v2924_v57  ;;  %v3615_v25 = vsel %vm3572_vm12, %v3607_v50, 0.0  ;;  %v3617_v22 = vsel %vm3572_vm12, %v3608_v11, 0.0  ;;  %v3619_v16 = vsel %vm3572_vm12, %v3609_v62, 0.0 }
 0x11e   : > { %1493 = vrot.lane.b32.xlu1 %v6628_v60, %s6007_s15  ;;  %v2943_v21 = vmax.f32 %v2941_v17, %v2942_v58  ;;  %v3580_v23 = vrot.slane %v3579_v59, 4  ;;  %v3614_v26 = vadd.f32 %v3613_v3, %v3612_v2  ;;  %v3630_v30 = vsel %vm3572_vm12, %v3604_v32, -inf }
 0x11f   : > { %1114 = vrot.lane.b32.xlu0 %v6620_v54, %s6007_s15  ;;  %v975_v54 = vcombine.high %v6687_v8, %v6687_v8  ;;  %v3597_v24 = vrot.slane %v3596_v61, 4  ;;  %v3631_v34 = vsel %vm3572_vm12, %v3605_v38, -inf  ;;  %v3632_v35 = vsel %vm3572_vm12, %v3606_v43, -inf }
 0x120   : > { %v2946_v31 = vcombine.low %v6641_v4, %v2943_v21  ;;  %v3633_v36 = vsel %vm3572_vm12, %v3607_v50, -inf  ;;  %v3581_v9 = vadd.f32 %v3580_v23, %v3579_v59  ;;  %v3616_v44 = vadd.f32 %v3615_v25, %v3614_v26 }
 0x121   : > { %v3598_v17 = vmax.f32 %v3596_v61, %v3597_v24  ;;  %v3636_v18 = vsel %vm3572_vm12, %v3609_v62, -inf  ;;  %v3639_v53 = vmax.f32 %v3632_v35, %v3633_v36  ;;  %v6737_v62 = vcombine.low %v6608_v49, %v6608_v49 }
 0x122   : > { %1495 = vrot.lane.b32.xlu1 %v6662_v27, %s6007_s15  ;;  %v2953_v46 = vrot.slane %v2946_v31, %v6494_v20  ;;  %v3582_v4 = vrot.slane %v3581_v9, 2  ;;  %v3618_v38 = vadd.f32 %v3617_v22, %v3616_v44  ;;  %v3637_v43 = vmax.f32 %v3631_v34, %v3636_v18 }
 0x123   : > { %1585 = vrot.lane.b32.xlu0 %v6665_v28, %s6009_s8  ;;  %v3599_v32 = vrot.slane %v3598_v17, 2  ;;  %v6742_v2 = vrot.slane %v6614_v51, %v6578_v39  ;;  %v6758_v7 = vrot.slane %v6687_v8, %v6578_v39  ;;  %v1256_v10 = vcombine.low %v6590_v42, %v6590_v42 }
 0x124   : > { %v2960_v50 = vrot.slane %v2953_v46, %v6494_v20  ;;  %v3583_v57 = vadd.f32 %v3582_v4, %v3581_v9  ;;  %v3620_v59 = vadd.f32 %v3619_v16, %v3618_v38  ;;  %v1370_v23 = vcombine.high %v6680_v13, %v6680_v13 }
 0x125   : > { %v3600_v58 = vmax.f32 %v3598_v17, %v3599_v32  ;;  %v1273_v24 = vcombine.low %v6637_v63, %v6637_v63  ;;  %v6767_v26 = vrot.slane %v1256_v10, %v6578_v39  ;;  %v1478_v42 = vcombine.high %v6742_v2, %v6742_v2  ;;  %v5480_v10 = vld [vmem:[#allocation2 + $0x14] ss:$0 sps:$4 sm:$0xff]  }
 0x126   : > { %1587 = vrot.lane.b32.xlu1 %v1569_v12, %s6009_s8  ;;  %v3634_v12 = vsel %vm3572_vm12, %v3608_v11, -inf  ;;  %v6733_v11 = vrot.slane %v6624_v56, %v6578_v39  ;;  %2963 = vst.msk [vmem:[#allocation3 + $0xb] ss:$4 sm:$0x3] %vm6571_vm9, %v2960_v50  ;;  %v6750_v56 = vrot.slane %v1068_v33, %v6578_v39  ;;  %v3621_v21 = vrot.slane %v3620_v59, 4 }
 0x127   : > { %1399 = vrot.lane.b32.xlu0 %v6680_v13, %s6005_s29  ;;  %v3635_v47 = vmax.f32 %v3630_v30, %v3634_v12  ;;  %v3601_v3 = vrot.slane %v3600_v58, 1  ;;  %v1371_v35 = vcombine.high %v6588_v6, %v6588_v6  ;;  %v1553_v36 = vcombine.low %v6665_v28, %v6665_v28  ;;  %v5476_v28 = vld [vmem:[#allocation2 + $0x18] ss:$0 sps:$4 sm:$0x33]  }
 0x128   : > { %v3622_v22 = vadd.f32 %v3621_v21, %v3620_v59  ;;  %v6783_v17 = vrot.slane %v1273_v24, %v6578_v39  ;;  %v1178_v18 = vcombine.low %v6704_v19, %v6704_v19  ;;  %v5076_v50 = vld.sshfl [vmem:[#allocation2 + $0x1a] sm:$0x3 pattern:$0x76325410]  ;;  %vm1642_vm7 = vcmask 113664  }
 0x129   : > { %v3638_v61 = vmax.f32 %v3635_v47, %v3637_v43  ;;  %v3602_v25 = vmax.f32 %v3600_v58, %v3601_v3  ;;  %v1554_v43 = vcombine.high %v6622_v55, %v6622_v55  ;;  %v1578_v58 = vcombine.low %v5076_v50, %v5076_v50  ;;  %v5479_v21 = vld [vmem:[#allocation2 + $0x12] ss:$0 sps:$4 sm:$0x33]  }
 0x12a   : > { %1116 = vrot.lane.b32.xlu1 %v1084_v40, %s6007_s15  ;;  %v989_v40 = vrot.slane %v975_v54, %v6578_v39  ;;  %v3584_v54 = vrot.slane %v3583_v57, 1  ;;  %v3623_v30 = vrot.slane %v3622_v22, 2  ;;  %v1288_v6 = vcombine.low %v6783_v17, %v6783_v17 }
 0x12b   : > { %1118 = vrot.lane.b32.xlu0 %v6683_v37, %s6007_s15  ;;  %v3640_v51 = vmax.f32 %v3638_v61, %v3639_v53  ;;  %3603 = vst.msk [vmem:[#allocation4 + $0x5] sm:$0x1] %vm3588_vm13, %v3602_v25  ;;  %v1385_v53 = vrot.slane %v1371_v35, %v6578_v39  ;;  %v1568_v59 = vrot.slane %v1554_v43, %v6578_v39  ;;  %vm3100_vm8 = vcmask 990208  }
 0x12c   : > { %v3585_v33 = vadd.f32 %v3584_v54, %v3583_v57  ;;  %v3624_v13 = vadd.f32 %v3623_v30, %v3622_v22  ;;  %v991_v9 = vcombine.high %v989_v40, %v989_v40  ;;  %v992_v57 = vcombine.high %v6586_v41, %v6586_v41 }
 0x12d   : > { %v3641_v16 = vrot.slane %v3640_v51, 4  ;;  %v1387_v38 = vcombine.high %v1385_v53, %v1385_v53  ;;  %v1570_v41 = vcombine.low %v1568_v59, %v1568_v59  ;;  %v1179_v3 = vcombine.high %v6637_v63, %v6637_v63  ;;  %v6840_v24 = vld [vmem:[#allocation3 + $0xc] sm:$0xff]  ;;  %v3006_v35 = vld [vmem:[#allocation3 + $0x4] sm:$0xff] }
 0x12e   : > { %1210 = vrot.lane.b32.xlu1 %v6704_v19, %s6009_s8  ;;  %v3587_v8 = vmul.f32 0.03125, %v3585_v33  ;;  %v3625_v44 = vrot.slane %v3624_v13, 1  ;;  %v1486_v19 = vrot.slane %v5476_v28, %v6578_v39  ;;  %v1006_v61 = vrot.slane %v992_v57, %v6578_v39  ;;  %v5074_v33 = vld.sshfl [vmem:[#allocation2 + $0x14] sm:$0x3 pattern:$0x76325410] }
 0x12f   : > { %1212 = vrot.lane.b32.xlu0 %v6691_v14, %s6009_s8  ;;  %v3642_v31 = vmax.f32 %v3640_v51, %v3641_v16  ;;  %v1193_v51 = vrot.slane %v1179_v3, %v6578_v39  ;;  %v1203_v63 = vcombine.low %v5074_v33, %v5074_v33  ;;  %v6829_v22 = vrot.slane %v5480_v10, %v6578_v39 }
 0x130   : > { %3589 = vst.msk [vmem:[#allocation4 + $0x4] sm:$0x1] %vm3588_vm13, %v3587_v8  ;;  %v3626_v46 = vadd.f32 %v3625_v44, %v3624_v13  ;;  %v1008_v55 = vcombine.high %v1006_v61, %v1006_v61  ;;  %v3049_v8 = vld [vmem:[#allocation3 + $0x8] sm:$0xff]  ;;  %v5483_v13 = vld [vmem:[#allocation3 + $0x10] ss:$0 sps:$4 sm:$0xff]   ;;  %v3030_v44 = vcombine.low %v3006_v35, %v3006_v35  ;;  %v1460_v50 = vcombine.high %v6602_v48, %v6602_v48 }
 0x131   : > { %v3643_v34 = vrot.slane %v3642_v31, 2  ;;  %v1298_v16 = vcombine.low %v6829_v22, %v6829_v22  ;;  %v3053_v30 = vcombine.high %v3049_v8, %v3049_v8  ;;  %v1369_v57 = vcombine.high %v6733_v11, %v6733_v11 }
 0x132   : > { %1020 = vrot.lane.b32.xlu1 %v989_v40, %s6005_s29  ;;  %v3628_v4 = vmul.f32 0.020833334, %v3626_v46  ;;  %v6812_v40 = vrot.slane %v6616_v52, %v6578_v39  ;;  %v1109_v52 = vrot.slane %v5479_v21, %v6578_v39  ;;  %v3093_v39 = vcombine.high %v6840_v24, %v6840_v24  ;;  %v2965_v46 = vld [vmem:[#allocation3 + $0x8] sm:$0xf] }
 0x133   : > { %1303 = vrot.lane.b32.xlu0 %v6737_v62, %s6008_s7  ;;  %v3644_v12 = vmax.f32 %v3642_v31, %v3643_v34  ;;  %v3050_v31 = vld [vmem:[#allocation3 + $0x10] sm:$0xf]  ;;  %v3073_v34 = vcombine.low %v3049_v8, %v3049_v8  ;;  %vm2983_vm9 = vcmask 142336   ;;  %vm3060_vm10 = vcmask 728064  }
 0x134   : > { %3629 = vst.msk [vmem:[#allocation4 + $0x6] sm:$0x1] %vm3588_vm13, %v3628_v4  ;;  %v1101_v54 = vcombine.high %v6812_v40, %v6812_v40  ;;  %vm3004_vm11 = vcmask 146436  }
 0x135   : > { %v3645_v47 = vrot.slane %v3644_v12, 1 }
 0x136   : > { %1501 = vrot.lane.b32.xlu1 %v1478_v42, %s6007_s15  ;;  %v3090_v42 = vld [vmem:[#allocation3 + $0x14] sm:$0xf] }
 0x137   : > { %1401 = vrot.lane.b32.xlu0 %v1370_v23, %s6005_s29  ;;  %v3646_v32 = vmax.f32 %v3644_v12, %v3645_v47  ;;  %v1195_v23 = vcombine.low %v1193_v51, %v1193_v51  ;;  %v2968_v12 = vcombine.high %v6003_v0, %v6003_v0  ;;  %v5488_v47 = vld [vmem:[#allocation3 + $0xc] ss:$0 sps:$4 sm:$0xff]  }
 0x139   : > { %3647 = vst.msk [vmem:[#allocation4 + $0x7] sm:$0x1] %vm3588_vm13, %v3646_v32  ;;  %vm3017_vm13 = vcmask 465920  }
 0x13a   : > { %1022 = vrot.lane.b32.xlu1 %v991_v9, %s6005_s29  ;;  %v3031_v9 = vcombine.low %v6840_v24, %v6840_v24 }
 0x13b   : > { %1583 = vrot.lane.b32.xlu0 %v1553_v36, %s6009_s8  ;;  %v3007_v36 = vld [vmem:[#allocation3 + $0xc] sm:$0xf] }
 0x13e   : > { %1208 = vrot.lane.b32.xlu1 %v1178_v18, %s6009_s8 }
 0x13f   : > { %1307 = vrot.lane.b32.xlu0 %v1288_v6, %s6008_s7 }
 0x140   : > { %v3703_v28 = vld [vmem:[#allocation4 + $0x4] sm:$0xff] }
 0x141   : > { %v3705_v32 = vcombine.high %v3703_v28, %v3703_v28 }
 0x142   : > { %1409 = vrot.lane.b32.xlu1 %v1387_v38, %s6005_s29 }
 0x143   : > { %1503 = vrot.lane.b32.xlu0 %v1486_v19, %s6007_s15 }
 0x146   : > { %1593 = vrot.lane.b32.xlu1 %v1568_v59, %s6009_s8 }
 0x147   : > { %1595 = vrot.lane.b32.xlu0 %v1578_v58, %s6009_s8 }
 0x14a   : > { %1407 = vrot.lane.b32.xlu1 %v1385_v53, %s6005_s29 }
 0x14b   : > { %1499 = vrot.lane.b32.xlu0 %v6742_v2, %s6007_s15  ;;  %v5073_v2 = vld.sshfl [vmem:[#allocation2 + $0x10] sm:$0x3 pattern:$0x76325410] }
 0x14e   : > { %1591 = vrot.lane.b32.xlu1 %v1570_v41, %s6009_s8 }
 0x14f   : > { %1030 = vrot.lane.b32.xlu0 %v1008_v55, %s6005_s29 }
 0x152   : > { %1032 = vrot.lane.b32.xlu1 %v5073_v2, %s6005_s29 }
 0x153   : > { %1124 = vrot.lane.b32.xlu0 %v1101_v54, %s6007_s15  ;;  %v1552_v54 = vcombine.low %v6812_v40, %v6812_v40 }
 0x156   : > { %v6824_v25 = vpop.permute.xlu0 %1411  ;;  %1126 = vrot.lane.b32.xlu1 %v1109_v52, %s6007_s15  ;;  %v3691_v52 = vld [vmem:[#allocation4 + $0x4] sm:$0xf] }
 0x157   : > { %1218 = vrot.lane.b32.xlu0 %v1193_v51, %s6009_s8  ;;  %1438 = vst.msk [vmem:[#allocation5 + $0x88] sm:$0x3] %vm1060_vm14, %v6824_v25 }
 0x15a   : > { %1220 = vrot.lane.b32.xlu1 %v1203_v63, %s6009_s8  ;;  %v1083_v63 = vcombine.high %v6750_v56, %v6750_v56 }
 0x15b   : > { %1313 = vrot.lane.b32.xlu0 %v6653_v29, %s6008_s7 }
 0x15e   : > { %1315 = vrot.lane.b32.xlu1 %v1298_v16, %s6008_s7 }
 0x15f   : > { %1028 = vrot.lane.b32.xlu0 %v1006_v61, %s6005_s29 }
 0x162   : > { %1122 = vrot.lane.b32.xlu1 %v6812_v40, %s6007_s15 }
 0x163   : > { %1216 = vrot.lane.b32.xlu0 %v1195_v23, %s6009_s8 }
 0x166   : > { %1311 = vrot.lane.b32.xlu1 %v6691_v14, %s6008_s7  ;;  %v3010_v14 = vcombine.high %v3006_v35, %v3006_v35 }
 0x167   : > { %3096 = vrot.lane.b32.xlu0 %v3093_v39, %s6010_s11 }
 0x16a   : > { %3098 = vrot.lane.b32.xlu1 %v3090_v42, %s6010_s11  ;;  %v6932_v42 = vld [vmem:[#allocation4] sm:$0xff] }
 0x16b   : > { %3094 = vrot.lane.b32.xlu0 %v6840_v24, %s6010_s11  ;;  %s6017_s11 = smov 81  }
 0x16e   : > { %3056 = vrot.lane.b32.xlu1 %v3053_v30, %s6011_s20 }
 0x16f   : > { %3058 = vrot.lane.b32.xlu0 %v3050_v31, %s6011_s20 }
 0x172   : > { %3077 = vrot.lane.b32.xlu1 %v3049_v8, %s6005_s29 }
 0x173   : > { %3079 = vrot.lane.b32.xlu0 %v5483_v13, %s6005_s29 }
 0x176   : > { %3054 = vrot.lane.b32.xlu1 %v3049_v8, %s6011_s20 }
 0x177   : > { %3075 = vrot.lane.b32.xlu0 %v3073_v34, %s6005_s29  ;;  %v6946_v34 = vcombine.high %v6932_v42, %v6932_v42 }
 0x17a   : > { %3013 = vrot.lane.b32.xlu1 %v3010_v14, %s6012_s27 }
 0x17b   : > { %3015 = vrot.lane.b32.xlu0 %v3007_v36, %s6012_s27 }
 0x17e   : > { %3034 = vrot.lane.b32.xlu1 %v3006_v35, %s6008_s7 }
 0x17f   : > { %3036 = vrot.lane.b32.xlu0 %v3031_v9, %s6008_s7 }
 0x182   : > { %3011 = vrot.lane.b32.xlu1 %v3006_v35, %s6012_s27 }
 0x183   : > { %3032 = vrot.lane.b32.xlu0 %v3030_v44, %s6008_s7 }
 0x186   : > { %2971 = vrot.lane.b32.xlu1 %v2968_v12, %s6013_s25 }
 0x187   : > { %2973 = vrot.lane.b32.xlu0 %v2965_v46, %s6013_s25 }
 0x188   : > { %v6866_v18 = vpop.permute.xlu1 %1491 }
 0x189   : > { %v6868_v6 = vpop.permute.xlu0 %1403 }
 0x18a   : > { %2993 = vrot.lane.b32.xlu1 %v3006_v35, %s6009_s8 }
 0x18b   : > { %2995 = vrot.lane.b32.xlu0 %v5488_v47, %s6009_s8 }
 0x18c   : > { %v6874_v4 = vpop.permute.xlu1 %1305 }
 0x18d   : > { %v6872_v53 = vpop.permute.xlu0 %1024 }
 0x18e   : > { %2969 = vrot.lane.b32.xlu1 %v6003_v0, %s6013_s25  ;;  %s8331_s25 = sld [smem:[#allocation55_spill]] }
 0x18f   : > { %2991 = vrot.lane.b32.xlu0 %v3030_v44, %s6009_s8 }
 0x190   : > { %v1494_v19 = vpop.permute.xlu1 %1493 }
 0x191   : > { %v6878_v38 = vpop.permute.xlu0 %1114  ;;  %v1507_v43 = vsel %vm1128_vm15, %v6866_v18, %v1494_v19 }
 0x192   : > { %1524 = vst [vmem:[#allocation5 + $0x58] sm:$0xc] %v1507_v43  ;;  %3706 = vrot.lane.b32.xlu1 %v3703_v28, %s6014_s22 }
 0x193   : > { %3708 = vrot.lane.b32.xlu0 %v3705_v32, %s6014_s22 }
 0x194   : > { %v6886_v58 = vpop.permute.xlu1 %1495 }
 0x195   : > { %v1586_v0 = vpop.permute.xlu0 %1585  ;;  %v1508_v59 = vsel %vm1128_vm15, %v1494_v19, %v6886_v58 }
 0x196   : > { %1525 = vst [vmem:[#allocation5 + $0x60] sm:$0xc] %v1508_v59  ;;  %1397 = vrot.lane.b32.xlu1 %v1369_v57, %s6005_s29  ;;  %v1271_v57 = vcombine.low %v6767_v26, %v6767_v26 }
 0x197   : > { %1489 = vrot.lane.b32.xlu0 %v1460_v50, %s6007_s15 }
 0x198   : > { %v6892_v61 = vpop.permute.xlu1 %1587 }
 0x199   : > { %v6894_v55 = vpop.permute.xlu0 %1399  ;;  %v1600_v41 = vsel %vm1222_vm0, %v1586_v0, %v6892_v61 }
 0x19a   : > { %1617 = vst [vmem:[#allocation5 + $0x60] sm:$0x30] %v1600_v41  ;;  %1581 = vrot.lane.b32.xlu1 %v6812_v40, %s6009_s8 }
 0x19b   : > { %1395 = vrot.lane.b32.xlu0 %v6733_v11, %s6005_s29  ;;  %v3697_v11 = vld [vmem:[#allocation4 + $0x4] sm:$0xf] }
 0x19c   : > { %v1117_v21 = vpop.permute.xlu1 %1116 }
 0x19d   : > { %v6904_v3 = vpop.permute.xlu0 %1118  ;;  %v1131_v2 = vsel %vm1128_vm15, %v6878_v38, %v1117_v21 }
 0x19e   : > { %v1132_v51 = vsel %vm1128_vm15, %v1117_v21, %v6904_v3  ;;  %1148 = vst [vmem:[#allocation5 + $0x10] sm:$0xc] %v1131_v2  ;;  %1487 = vrot.lane.b32.xlu1 %v6602_v48, %s6007_s15  ;;  %v990_v48 = vcombine.high %v6758_v7, %v6758_v7  ;;  %v6989_v21 = vld [vmem:[%s8225_s5] sm:$0x7f] }
 0x19f   : > { %1149 = vst [vmem:[#allocation5 + $0x18] sm:$0xc] %v1132_v51  ;;  %1579 = vrot.lane.b32.xlu0 %v1552_v54, %s6009_s8 }
 0x1a0   : > { %v1211_v40 = vpop.permute.xlu1 %1210 }
 0x1a1   : > { %v6913_v10 = vpop.permute.xlu0 %1212 }
 0x1a2   : > { %v1226_v33 = vsel %vm1222_vm0, %v1211_v40, %v6913_v10  ;;  %3693 = vrot.lane.b32.xlu1 %v3691_v52, %s6015_s30 }
 0x1a3   : > { %1243 = vst [vmem:[#allocation5 + $0x18] sm:$0x30] %v1226_v33  ;;  %3699 = vrot.lane.b32.xlu0 %v3697_v11, %s6011_s20  ;;  %v7009_v11 = vld [vmem:[#allocation3] sm:$0xff]  ;;  %s6023_s20 = smov 116  }
 0x1a4   : > { %v6925_v23 = vpop.permute.xlu1 %1020 }
 0x1a5   : > { %v6923_v16 = vpop.permute.xlu0 %1303 }
 0x1a6   : > { %v1322_v39 = vsel %vm1319_vm1, %v6923_v16, %v6874_v4  ;;  %1018 = vrot.lane.b32.xlu1 %v990_v48, %s6005_s29 }
 0x1a7   : > { %1340 = vst [vmem:[#allocation5 + $0x10] sm:$0xc0] %v1322_v39  ;;  %1112 = vrot.lane.b32.xlu0 %v1083_v63, %s6007_s15 }
 0x1a8   : > { %v6934_v30 = vpop.permute.xlu1 %1501 }
 0x1a9   : > { %v1402_v8 = vpop.permute.xlu0 %1401 }
 0x1aa   : > { %v1415_v31 = vsel %vm1034_vm2, %v6894_v55, %v1402_v8  ;;  %v1416_v13 = vsel %vm1034_vm2, %v1402_v8, %v6868_v6  ;;  %1206 = vrot.lane.b32.xlu1 %v6608_v49, %s6009_s8 }
 0x1ab   : > { %1432 = vst [vmem:[#allocation5 + $0x58] sm:$0x3] %v1415_v31  ;;  %1433 = vst [vmem:[#allocation5 + $0x60] sm:$0x3] %v1416_v13  ;;  %1301 = vrot.lane.b32.xlu0 %v6767_v26, %s6008_s7 }
 0x1ac   : > { %v1023_v14 = vpop.permute.xlu1 %1022 }
 0x1ad   : > { %v6948_v35 = vpop.permute.xlu0 %1583  ;;  %v1037_v9 = vsel %vm1034_vm2, %v6925_v23, %v1023_v14  ;;  %v1038_v44 = vsel %vm1034_vm2, %v1023_v14, %v6872_v53 }
 0x1ae   : > { %v1599_v36 = vsel %vm1222_vm0, %v6948_v35, %v1586_v0  ;;  %1054 = vst [vmem:[#allocation5 + $0x10] sm:$0x3] %v1037_v9  ;;  %1055 = vst [vmem:[#allocation5 + $0x18] sm:$0x3] %v1038_v44  ;;  %3673 = vrot.lane.b32.xlu1 %v6932_v42, %s6016_s28 }
 0x1af   : > { %1616 = vst [vmem:[#allocation5 + $0x58] sm:$0x30] %v1599_v36  ;;  %3675 = vrot.lane.b32.xlu0 %v6946_v34, %s6016_s28 }
 0x1b0   : > { %v6960_v12 = vpop.permute.xlu1 %1208 }
 0x1b1   : > { %v6958_v49 = vpop.permute.xlu0 %1307  ;;  %v1225_v47 = vsel %vm1222_vm0, %v6960_v12, %v1211_v40 }
 0x1b2   : > { %v1323_v46 = vsel %vm1319_vm1, %v6874_v4, %v6958_v49  ;;  %v1636_v28 = vld [vmem:[#allocation5 + $0x60] sm:$0x3f]  ;;  %1242 = vst [vmem:[#allocation5 + $0x10] sm:$0x30] %v1225_v47  ;;  %3684 = vrot.lane.b32.xlu1 %v6932_v42, %s6008_s7 }
 0x1b3   : > { %1341 = vst [vmem:[#allocation5 + $0x18] sm:$0xc0] %v1323_v46  ;;  %5080 = vmatprep.subr.msk.mxu1 %vm1646_vm3, %v1636_v28  ;;  %3686 = vrot.lane.b32.xlu0 %v6946_v34, %s6008_s7 }
 0x1b4   : > { %v1410_v19 = vpop.permute.xlu1 %1409 }
 0x1b5   : > { %v1504_v32 = vpop.permute.xlu0 %1503  ;;  %v1420_v43 = vsel %vm1034_vm2, %v1410_v19, %v6824_v25 }
 0x1b6   : > { %v1512_v4 = vsel %vm1128_vm15, %v6934_v30, %v1504_v32  ;;  %1530 = vst.msk [vmem:[#allocation5 + $0x88] sm:$0xc] %vm1154_vm4, %v1504_v32  ;;  %v1635_v50 = vld [vmem:[#allocation5 + $0x58] sm:$0x3f]  ;;  %1437 = vst [vmem:[#allocation5 + $0x80] sm:$0x3] %v1420_v43  ;;  %1016 = vrot.lane.b32.xlu1 %v6758_v7, %s6005_s29  ;;  %v1386_v7 = vcombine.high %v6598_v45, %v6598_v45 }
 0x1b7   : > { %1529 = vst [vmem:[#allocation5 + $0x80] sm:$0xc] %v1512_v4  ;;  %5081 = vmatpush1.msk.msra.mxu1 %vm1646_vm3, %v1635_v50  ;;  %1110 = vrot.lane.b32.xlu0 %v6750_v56, %s6007_s15  ;;  %v1477_v56 = vcombine.high %v6662_v27, %v6662_v27 }
 0x1b8   : > { %v1594_v59 = vpop.permute.xlu1 %1593 }
 0x1b9   : > { %v1596_v0 = vpop.permute.xlu0 %1595  ;;  %v1626_v54 = vld [vmem:[#allocation5 + $0x10] sm:$0xff] }
 0x1ba   : > { %1622 = vst.msk [vmem:[#allocation5 + $0x88] sm:$0x30] %vm1248_vm6, %v1596_v0  ;;  %v1604_v25 = vsel %vm1222_vm0, %v1594_v59, %v1596_v0  ;;  %v1627_v41 = vld [vmem:[#allocation5 + $0x18] sm:$0xff]  ;;  %1204 = vrot.lane.b32.xlu1 %v6737_v62, %s6009_s8 }
 0x1bb   : > { %1621 = vst [vmem:[#allocation5 + $0x80] sm:$0x30] %v1604_v25  ;;  %1299 = vrot.lane.b32.xlu0 %v1271_v57, %s6008_s7  ;;  %1775 = vmatprep.subr.mxu1 %v1627_v41 }
 0x1bc   : > { %1776 = vmatpush1.msra.mxu1 %v1626_v54  ;;  %v7000_v2 = vpop.permute.xlu1 %1407 }
 0x1bd   : > { %v6998_v26 = vpop.permute.xlu0 %1499  ;;  %5082 = vmatmul.mubr.msk.f32.vlgmr.msra.gmra.mxu1 %vm1642_vm7, %v6989_v21  ;;  %v1419_v27 = vsel %vm1034_vm2, %v7000_v2, %v1410_v19 }
 0x1be   : > { %v1511_v51 = vsel %vm1128_vm15, %v6998_v26, %v6934_v30  ;;  %1951 = vmatprep.mubr.f32.mxu1 %v7009_v11  ;;  %1436 = vst [vmem:[#allocation5 + $0x78] sm:$0x3] %v1419_v27  ;;  %1405 = vrot.lane.b32.xlu1 %v1386_v7, %s6005_s29 }
 0x1bf   : > { %1528 = vst [vmem:[#allocation5 + $0x78] sm:$0xc] %v1511_v51  ;;  %1497 = vrot.lane.b32.xlu0 %v1477_v56, %s6007_s15 }
 0x1c0   : > { %v7014_v62 = vpop.permute.xlu1 %1591 }
 0x1c1   : > { %v1031_v45 = vpop.permute.xlu0 %1030  ;;  %v1603_v52 = vsel %vm1222_vm0, %v7014_v62, %v1594_v59 }
 0x1c2   : > { %v1640_v40 = vld [vmem:[#allocation5 + $0x80] sm:$0x3f]  ;;  %1620 = vst [vmem:[#allocation5 + $0x78] sm:$0x30] %v1603_v52  ;;  %1589 = vrot.lane.b32.xlu1 %v6645_v15, %s6009_s8  ;;  %v1100_v15 = vcombine.high %v6683_v37, %v6683_v37 }
 0x1c3   : > { %3651 = vrot.lane.b32.xlu0 %v6932_v42, %s6017_s11  ;;  %5086 = vmatprep.subr.msk.mxu1 %vm1646_vm3, %v1640_v40 }
 0x1c4   : > { %v1033_v63 = vpop.permute.xlu1 %1032 }
 0x1c5   : > { %v1125_v33 = vpop.permute.xlu0 %1124  ;;  %v1042_v48 = vsel %vm1034_vm2, %v1031_v45, %v1033_v63  ;;  %1061 = vst.msk [vmem:[#allocation5 + $0x40] sm:$0x3] %vm1060_vm14, %v1033_v63  ;;  %vm2975_vm14 = vcmask 203776  }
 0x1c6   : > { %1059 = vst [vmem:[#allocation5 + $0x38] sm:$0x3] %v1042_v48  ;;  %3653 = vrot.lane.b32.xlu1 %v6946_v34, %s6017_s11  ;;  %s5068_s11 = sshll.u32 %s6399_s13, 6 }
 0x1c7   : > { %3663 = vrot.lane.b32.xlu0 %v6932_v42, %s6012_s27 }
 0x1c8   : > { %v1127_v8 = vpop.permute.xlu1 %1126 }
 0x1c9   : > { %v1219_v39 = vpop.permute.xlu0 %1218  ;;  %v1136_v30 = vsel %vm1128_vm15, %v1125_v33, %v1127_v8  ;;  %1155 = vst.msk [vmem:[#allocation5 + $0x40] sm:$0xc] %vm1154_vm4, %v1127_v8  ;;  %v1639_v31 = vld [vmem:[#allocation5 + $0x78] sm:$0x3f]  ;;  %vm3710_vm4 = vcmask 531456  }
 0x1ca   : > { %1153 = vst [vmem:[#allocation5 + $0x38] sm:$0xc] %v1136_v30  ;;  %5087 = vmatpush1.msk.msra.mxu1 %vm1646_vm3, %v1639_v31  ;;  %3665 = vrot.lane.b32.xlu1 %v6946_v34, %s6012_s27  ;;  %s7429_s27 = sld [smem:[#allocation12]] }
 0x1cb   : > { %1026 = vrot.lane.b32.xlu0 %v6628_v60, %s6005_s29  ;;  %s6019_s29 = smov 119  }
 0x1cc   : > { %v1221_v13 = vpop.permute.xlu1 %1220 }
 0x1cd   : > { %v1314_v42 = vpop.permute.xlu0 %1313  ;;  %v1230_v14 = vsel %vm1222_vm0, %v1219_v39, %v1221_v13  ;;  %1249 = vst.msk [vmem:[#allocation5 + $0x40] sm:$0x30] %vm1248_vm6, %v1221_v13  ;;  %vm3658_vm6 = vcmask 666624  }
 0x1ce   : > { %1247 = vst [vmem:[#allocation5 + $0x38] sm:$0x30] %v1230_v14  ;;  %1120 = vrot.lane.b32.xlu1 %v1100_v15, %s6007_s15  ;;  %s6020_s15 = smov 125  }
 0x1cf   : > { %1214 = vrot.lane.b32.xlu0 %v6653_v29, %s6009_s8  ;;  %s6022_s8 = smov 122  }
 0x1d0   : > { %v7043_v36 = vpop.permute.xlu1 %1315 }
 0x1d1   : > { %v7041_v60 = vpop.permute.xlu0 %1028  ;;  %v1327_v37 = vsel %vm1319_vm1, %v1314_v42, %v7043_v36 }
 0x1d2   : > { %v1041_v34 = vsel %vm1034_vm2, %v7041_v60, %v1031_v45  ;;  %1345 = vst [vmem:[#allocation5 + $0x38] sm:$0xc0] %v1327_v37  ;;  %1309 = vrot.lane.b32.xlu1 %v6783_v17, %s6008_s7 }
 0x1d3   : > { %1058 = vst [vmem:[#allocation5 + $0x30] sm:$0x3] %v1041_v34  ;;  %1317 = vrot.lane.b32.xlu0 %v6829_v22, %s6008_s7 }
 0x1d4   : > { %v7055_v9 = vpop.permute.xlu1 %1122 }
 0x1d5   : > { %v7053_v29 = vpop.permute.xlu0 %1216  ;;  %v1135_v46 = vsel %vm1128_vm15, %v7055_v9, %v1125_v33 }
 0x1d6   : > { %v1229_v44 = vsel %vm1222_vm0, %v7053_v29, %v1219_v39  ;;  %1152 = vst [vmem:[#allocation5 + $0x30] sm:$0xc] %v1135_v46  ;;  %3038 = vrot.lane.b32.xlu1 %v6840_v24, %s6008_s7  ;;  %s6021_s7 = smov 110  }
 0x1d7   : > { %1246 = vst [vmem:[#allocation5 + $0x30] sm:$0x30] %v1229_v44 }
 0x1d8   : > { %v7063_v22 = vpop.permute.xlu1 %1311 }
 0x1d9   : > { %v3097_v47 = vpop.permute.xlu0 %3096  ;;  %v1326_v17 = vsel %vm1319_vm1, %v7063_v22, %v1314_v42  ;;  %v1631_v28 = vld [vmem:[#allocation5 + $0x38] sm:$0xff] }
 0x1da   : > { %1344 = vst [vmem:[#allocation5 + $0x30] sm:$0xc0] %v1326_v17  ;;  %1917 = vmatprep.subr.mxu1 %v1631_v28 }
 0x1dc   : > { %v3099_v19 = vpop.permute.xlu1 %3098 }
 0x1dd   : > { %v3095_v32 = vpop.permute.xlu0 %3094  ;;  %v3102_v43 = vsel %vm3100_vm8, %v3097_v47, %v3099_v19  ;;  %3108 = vst.msk [vmem:[#allocation6 + $0x58] sm:$0xf] %vm2983_vm9, %v3099_v19 }
 0x1de   : > { %v3101_v4 = vsel %vm3100_vm8, %v3095_v32, %v3097_v47  ;;  %3107 = vst [vmem:[#allocation6 + $0x50] sm:$0xf] %v3102_v43  ;;  %vm3123_vm8 = vcmask 228352  }
 0x1df   : > { %3106 = vst [vmem:[#allocation6 + $0x48] sm:$0xf] %v3101_v4 }
 0x1e0   : > { %v3057_v50 = vpop.permute.xlu1 %3056 }
 0x1e1   : > { %v3059_v24 = vpop.permute.xlu0 %3058  ;;  %v1630_v0 = vld [vmem:[#allocation5 + $0x30] sm:$0xff] }
 0x1e2   : > { %3068 = vst.msk [vmem:[#allocation6 + $0x40] sm:$0xf] %vm2983_vm9, %v3059_v24  ;;  %v3062_v57 = vsel %vm3060_vm10, %v3057_v50, %v3059_v24  ;;  %1918 = vmatpush1.msra.mxu1 %v1630_v0 }
 0x1e3   : > { %3067 = vst [vmem:[#allocation6 + $0x38] sm:$0xf] %v3062_v57  ;;  %5088 = vmatmul.mubr.msk.f32.vlgmr.msra.gmra.mxu1 %vm1642_vm7, %v6989_v21 }
 0x1e4   : > { %v3078_v25 = vpop.permute.xlu1 %3077  ;;  %3203 = vmatprep.mubr.f32.mxu1 %v7009_v11 }
 0x1e5   : > { %v3080_v59 = vpop.permute.xlu0 %3079  ;;  %v3121_v54 = vld [vmem:[#allocation6 + $0x50] sm:$0xf] }
 0x1e6   : > { %3088 = vst.msk [vmem:[#allocation6 + $0x40] sm:$0xf0] %vm3004_vm11, %v3080_v59  ;;  %v3082_v41 = vsel %vm1034_vm2, %v3078_v25, %v3080_v59  ;;  %v3120_v56 = vld [vmem:[#allocation6 + $0x48] sm:$0xf]  ;;  %5099 = vmatprep.subr.msk.mxu1 %vm2800_vm5, %v3121_v54 }
 0x1e7   : > { %3087 = vst [vmem:[#allocation6 + $0x38] sm:$0xf0] %v3082_v41  ;;  %5100 = vmatpush1.msk.msra.mxu1 %vm2800_vm5, %v3120_v56  ;;  %v7094_v41 = vld [vmem:[#allocation21] sm:$0xff] }
 0x1e8   : > { %v3055_v51 = vpop.permute.xlu1 %3054 }
 0x1e9   : > { %v3076_v7 = vpop.permute.xlu0 %3075  ;;  %v3061_v45 = vsel %vm3060_vm10, %v3055_v51, %v3057_v50  ;;  %vm3655_vm10 = vcmask 662528  }
 0x1ea   : > { %v3081_v27 = vsel %vm1034_vm2, %v3076_v7, %v3078_v25  ;;  %3066 = vst [vmem:[#allocation6 + $0x30] sm:$0xf] %v3061_v45 }
 0x1eb   : > { %3086 = vst [vmem:[#allocation6 + $0x30] sm:$0xf0] %v3081_v27 }
 0x1ec   : > { %v3014_v40 = vpop.permute.xlu1 %3013 }
 0x1ed   : > { %v3016_v52 = vpop.permute.xlu0 %3015 }
 0x1ee   : > { %3025 = vst.msk [vmem:[#allocation6 + $0x28] sm:$0xf] %vm2983_vm9, %v3016_v52  ;;  %v3019_v33 = vsel %vm3017_vm13, %v3014_v40, %v3016_v52  ;;  %v3118_v63 = vld [vmem:[#allocation6 + $0x38] sm:$0xff] }
 0x1ef   : > { %3024 = vst [vmem:[#allocation6 + $0x20] sm:$0xf] %v3019_v33  ;;  %3165 = vmatprep.subr.mxu1 %v3118_v63 }
 0x1f0   : > { %v3035_v39 = vpop.permute.xlu1 %3034 }
 0x1f1   : > { %v7081_v48 = vpop.permute.xlu0 %3036 }
 0x1f2   : > { %v3041_v8 = vsel %vm1319_vm1, %v3035_v39, %v7081_v48  ;;  %v3117_v30 = vld [vmem:[#allocation6 + $0x30] sm:$0xff] }
 0x1f3   : > { %3047 = vst [vmem:[#allocation6 + $0x20] sm:$0xf0] %v3041_v8  ;;  %3166 = vmatpush1.msra.mxu1 %v3117_v30 }
 0x1f4   : > { %v3012_v15 = vpop.permute.xlu1 %3011 }
 0x1f5   : > { %v3033_v31 = vpop.permute.xlu0 %3032  ;;  %v3018_v13 = vsel %vm3017_vm13, %v3012_v15, %v3014_v40  ;;  %v7106_v40 = vld [vmem:[#allocation21 + $0x8] sm:$0x3f] }
 0x1f6   : > { %v3040_v42 = vsel %vm1319_vm1, %v3033_v31, %v3035_v39  ;;  %3023 = vst [vmem:[#allocation6 + $0x18] sm:$0xf] %v3018_v13 }
 0x1f7   : > { %3046 = vst [vmem:[#allocation6 + $0x18] sm:$0xf0] %v3040_v42 }
 0x1f8   : > { %v2972_v34 = vpop.permute.xlu1 %2971 }
 0x1f9   : > { %v2974_v14 = vpop.permute.xlu0 %2973 }
 0x1fa   : > { %2984 = vst.msk [vmem:[#allocation6 + $0x10] sm:$0xf] %vm2983_vm9, %v2974_v14  ;;  %v2977_v37 = vsel %vm2975_vm14, %v2972_v34, %v2974_v14  ;;  %v3115_v44 = vld [vmem:[#allocation6 + $0x20] sm:$0xff]  ;;  %vm3677_vm9 = vcmask 269312  }
 0x1fb   : > { %2982 = vst [vmem:[#allocation6 + $0x8] sm:$0xf] %v2977_v37  ;;  %3167 = vmatprep.subr.mxu1 %v3115_v44 }
 0x1fc   : > { %v2994_v47 = vpop.permute.xlu1 %2993 }
 0x1fd   : > { %v2996_v46 = vpop.permute.xlu0 %2995 }
 0x1fe   : > { %3005 = vst.msk [vmem:[#allocation6 + $0x10] sm:$0xf0] %vm3004_vm11, %v2996_v46  ;;  %v2998_v17 = vsel %vm1222_vm0, %v2994_v47, %v2996_v46  ;;  %v3114_v28 = vld [vmem:[#allocation6 + $0x18] sm:$0xff] }
 0x1ff   : > { %3003 = vst [vmem:[#allocation6 + $0x8] sm:$0xf0] %v2998_v17  ;;  %3168 = vmatpush1.msra.mxu1 %v3114_v28 }
 0x200   : > { %v2970_v19 = vpop.permute.xlu1 %2969 }
 0x201   : > { %v2992_v32 = vpop.permute.xlu0 %2991  ;;  %v2976_v43 = vsel %vm2975_vm14, %v2970_v19, %v2972_v34 }
 0x202   : > { %v2997_v4 = vsel %vm1222_vm0, %v2992_v32, %v2994_v47  ;;  %2981 = vst [vmem:[#allocation6] sm:$0xf] %v2976_v43 }
 0x203   : > { %3002 = vst [vmem:[#allocation6] sm:$0xf0] %v2997_v4 }
 0x204   : > { %v3707_v50 = vpop.permute.xlu1 %3706 }
 0x205   : > { %v3709_v24 = vpop.permute.xlu0 %3708 }
 0x206   : > { %v3711_v57 = vsel %vm3710_vm4, %v3707_v50, %v3709_v24  ;;  %v3112_v0 = vld [vmem:[#allocation6 + $0x8] sm:$0xff]  ;;  %vm2313_vm4 = vcmask 973824  }
 0x207   : > { %3713 = vst.msk [vmem:[#allocation7 + $0x18] sm:$0xf] %vm3658_vm6, %v3711_v57  ;;  %3169 = vmatprep.subr.mxu1 %v3112_v0 }
 0x208   : > { %v1398_v25 = vpop.permute.xlu1 %1397 }
 0x209   : > { %v1490_v59 = vpop.permute.xlu0 %1489  ;;  %v1414_v56 = vsel %vm1034_vm2, %v1398_v25, %v6894_v55  ;;  %v3714_v55 = vld [vmem:[#allocation22] sm:$0xff] }
 0x20a   : > { %v1506_v54 = vsel %vm1128_vm15, %v1490_v59, %v6866_v18  ;;  %v3111_v7 = vld [vmem:[#allocation6] sm:$0xff]  ;;  %1431 = vst [vmem:[#allocation5 + $0x50] sm:$0x3] %v1414_v56 }
 0x20b   : > { %1523 = vst [vmem:[#allocation5 + $0x50] sm:$0xc] %v1506_v54  ;;  %3170 = vmatpush1.msra.mxu1 %v3111_v7 }
 0x20c   : > { %5101 = vmatmul.mubr.msk.f32.vlgmr.msra.gmra.mxu1 %vm3123_vm8, %v7094_v41  ;;  %v1582_v27 = vpop.permute.xlu1 %1581 }
 0x20d   : > { %v1396_v51 = vpop.permute.xlu0 %1395  ;;  %3209 = vmatprep.mubr.f32.mxu1 %v7009_v11  ;;  %v1598_v52 = vsel %vm1222_vm0, %v1582_v27, %v6948_v35 }
 0x20e   : > { %v1413_v45 = vsel %vm1034_vm2, %v1396_v51, %v1398_v25  ;;  %v3719_v18 = vld [vmem:[#allocation7 + $0x18] sm:$0xf]  ;;  %1615 = vst [vmem:[#allocation5 + $0x50] sm:$0x30] %v1598_v52 }
 0x20f   : > { %1430 = vst [vmem:[#allocation5 + $0x48] sm:$0x3] %v1413_v45  ;;  %5215 = vmatprep.subr.msk.mxu1 %vm2800_vm5, %v3719_v18 }
 0x210   : > { %5216 = vmatpush3.msk.msra.mxu1 %vm2800_vm5, %v3719_v18  ;;  %v1488_v63 = vpop.permute.xlu1 %1487 }
 0x211   : > { %v1580_v33 = vpop.permute.xlu0 %1579  ;;  %5102 = vmatmul.mubr.msk.f32.gmra.mxu1 %vm3123_vm8, %v7106_v40  ;;  %v1505_v8 = vsel %vm1128_vm15, %v1488_v63, %v1490_v59 }
 0x212   : > { %v1597_v39 = vsel %vm1222_vm0, %v1580_v33, %v1582_v27  ;;  %5223 = vmatprep.mubr.msk.f32.mxu1 %vm3123_vm8, %v3714_v55  ;;  %1522 = vst [vmem:[#allocation5 + $0x48] sm:$0xc] %v1505_v8 }
 0x213   : > { %1614 = vst [vmem:[#allocation5 + $0x48] sm:$0x30] %v1597_v39 }
 0x214   : > { %v3694_v30 = vpop.permute.xlu1 %3693 }
 0x215   : > { %v3700_v35 = vpop.permute.xlu0 %3699  ;;  %3696 = vst.msk [vmem:[#allocation7 + $0x10] sm:$0xf] %vm3658_vm6, %v3694_v30  ;;  %v1634_v31 = vld [vmem:[#allocation5 + $0x50] sm:$0x3f] }
 0x216   : > { %3702 = vst.msk [vmem:[#allocation7 + $0x14] sm:$0xf] %vm3658_vm6, %v3700_v35  ;;  %5077 = vmatprep.subr.msk.mxu0 %vm1646_vm3, %v1634_v31 }
 0x218   : > { %v1019_v42 = vpop.permute.xlu1 %1018 }
 0x219   : > { %v1113_v15 = vpop.permute.xlu0 %1112  ;;  %v1036_v14 = vsel %vm1034_vm2, %v1019_v42, %v6925_v23 }
 0x21a   : > { %v1130_v13 = vsel %vm1128_vm15, %v1113_v15, %v6878_v38  ;;  %v1633_v34 = vld [vmem:[#allocation5 + $0x48] sm:$0x3f]  ;;  %1053 = vst [vmem:[#allocation5 + $0x8] sm:$0x3] %v1036_v14 }
 0x21b   : > { %1147 = vst [vmem:[#allocation5 + $0x8] sm:$0xc] %v1130_v13  ;;  %5078 = vmatpush1.msk.msra.mxu0 %vm1646_vm3, %v1633_v34 }
 0x21c   : > { %v1207_v44 = vpop.permute.xlu1 %1206 }
 0x21d   : > { %v1302_v37 = vpop.permute.xlu0 %1301  ;;  %v3718_v46 = vld [vmem:[#allocation7 + $0x10] sm:$0xff]  ;;  %v1224_v17 = vsel %vm1222_vm0, %v1207_v44, %v6960_v12 }
 0x21e   : > { %v1321_v47 = vsel %vm1319_vm1, %v1302_v37, %v6923_v16  ;;  %5217 = vmatprep.subr.mxu1 %v3718_v46  ;;  %1241 = vst [vmem:[#allocation5 + $0x8] sm:$0x30] %v1224_v17 }
 0x21f   : > { %1339 = vst [vmem:[#allocation5 + $0x8] sm:$0xc0] %v1321_v47  ;;  %5218 = vmatpush3.msra.mxu1 %v3718_v46 }
 0x220   : > { %v3674_v23 = vpop.permute.xlu1 %3673 }
 0x221   : > { %v3676_v38 = vpop.permute.xlu0 %3675 }
 0x222   : > { %v3678_v28 = vsel %vm3677_vm9, %v3674_v23, %v3676_v38  ;;  %v3119_v38 = vld [vmem:[#allocation6 + $0x40] sm:$0xff] }
 0x223   : > { %3680 = vst.msk [vmem:[#allocation7 + $0x8] sm:$0xf] %vm3658_vm6, %v3678_v28 }
 0x224   : > { %v3685_v19 = vpop.permute.xlu1 %3684 }
 0x225   : > { %v3687_v32 = vpop.permute.xlu0 %3686 }
 0x226   : > { %v1625_v4 = vld [vmem:[#allocation5 + $0x8] sm:$0xff]  ;;  %v3688_v43 = vsel %vm1319_vm1, %v3685_v19, %v3687_v32 }
 0x227   : > { %1704 = vmatprep.subr.mxu0 %v1625_v4  ;;  %3690 = vst.msk [vmem:[#allocation7 + $0xc] sm:$0xf] %vm3658_vm6, %v3688_v43 }
 0x228   : > { %v1017_v24 = vpop.permute.xlu1 %1016 }
 0x229   : > { %v1111_v16 = vpop.permute.xlu0 %1110  ;;  %v1035_v50 = vsel %vm1034_vm2, %v1017_v24, %v1019_v42 }
 0x22a   : > { %v1129_v12 = vsel %vm1128_vm15, %v1111_v16, %v1113_v15  ;;  %1052 = vst [vmem:[#allocation5] sm:$0x3] %v1035_v50 }
 0x22b   : > { %1146 = vst [vmem:[#allocation5] sm:$0xc] %v1129_v12 }
 0x22c   : > { %v1205_v59 = vpop.permute.xlu1 %1204 }
 0x22d   : > { %v1300_v57 = vpop.permute.xlu0 %1299  ;;  %v1223_v25 = vsel %vm1222_vm0, %v1205_v59, %v1207_v44 }
 0x22e   : > { %v1320_v0 = vsel %vm1319_vm1, %v1300_v57, %v1302_v37  ;;  %v3717_v54 = vld [vmem:[#allocation7 + $0x8] sm:$0xff]  ;;  %1240 = vst [vmem:[#allocation5] sm:$0x30] %v1223_v25 }
 0x22f   : > { %1338 = vst [vmem:[#allocation5] sm:$0xc0] %v1320_v0  ;;  %5219 = vmatprep.subr.mxu1 %v3717_v54 }
 0x230   : > { %5220 = vmatpush3.msra.mxu1 %v3717_v54  ;;  %v1406_v27 = vpop.permute.xlu1 %1405 }
 0x231   : > { %v1498_v56 = vpop.permute.xlu0 %1497  ;;  %v1417_v45 = vsel %vm1034_vm2, %v6868_v6, %v1406_v27  ;;  %v1418_v52 = vsel %vm1034_vm2, %v1406_v27, %v7000_v2 }
 0x232   : > { %v1509_v7 = vsel %vm1128_vm15, %v6886_v58, %v1498_v56  ;;  %v1510_v51 = vsel %vm1128_vm15, %v1498_v56, %v6998_v26  ;;  %1434 = vst [vmem:[#allocation5 + $0x68] sm:$0x3] %v1417_v45  ;;  %1435 = vst [vmem:[#allocation5 + $0x70] sm:$0x3] %v1418_v52 }
 0x233   : > { %1526 = vst [vmem:[#allocation5 + $0x68] sm:$0xc] %v1509_v7  ;;  %1527 = vst [vmem:[#allocation5 + $0x70] sm:$0xc] %v1510_v51 }
 0x234   : > { %v1590_v55 = vpop.permute.xlu1 %1589 }
 0x235   : > { %v3652_v18 = vpop.permute.xlu0 %3651  ;;  %v1601_v33 = vsel %vm1222_vm0, %v6892_v61, %v1590_v55  ;;  %v1602_v58 = vsel %vm1222_vm0, %v1590_v55, %v7014_v62 }
 0x236   : > { %v1624_v26 = vld [vmem:[#allocation5] sm:$0xff]  ;;  %1618 = vst [vmem:[#allocation5 + $0x68] sm:$0x30] %v1601_v33  ;;  %1619 = vst [vmem:[#allocation5 + $0x70] sm:$0x30] %v1602_v58 }
 0x237   : > { %1705 = vmatpush1.msra.mxu0 %v1624_v26 }
 0x238   : > { %5079 = vmatmul.mubr.msk.f32.vlgmr.msra.gmra.mxu0 %vm1642_vm7, %v6989_v21  ;;  %v3654_v2 = vpop.permute.xlu1 %3653 }
 0x239   : > { %v3664_v6 = vpop.permute.xlu0 %3663  ;;  %1880 = vmatprep.mubr.f32.mxu0 %v7009_v11  ;;  %v3656_v63 = vsel %vm3655_vm10, %v3652_v18, %v3654_v2  ;;  %vm2581_vm10 = vcmask 900096  }
 0x23a   : > { %3659 = vst.msk [vmem:[#allocation7] sm:$0xf] %vm3658_vm6, %v3656_v63 }
 0x23c   : > { %v3666_v8 = vpop.permute.xlu1 %3665 }
 0x23d   : > { %v1027_v39 = vpop.permute.xlu0 %1026  ;;  %v3667_v35 = vsel %vm3017_vm13, %v3664_v6, %v3666_v8  ;;  %v1638_v30 = vld [vmem:[#allocation5 + $0x70] sm:$0x3f]  ;;  %v1637_v31 = vld [vmem:[#allocation5 + $0x68] sm:$0x3f] }
 0x23e   : > { %v1039_v61 = vsel %vm1034_vm2, %v6872_v53, %v1027_v39  ;;  %v1040_v62 = vsel %vm1034_vm2, %v1027_v39, %v7041_v60  ;;  %3669 = vst.msk [vmem:[#allocation7 + $0x4] sm:$0xf] %vm3658_vm6, %v3667_v35  ;;  %5083 = vmatprep.subr.msk.mxu0 %vm1646_vm3, %v1638_v30  ;;  %vm1346_vm2 = vcmask 146438   ;;  %vm2397_vm6 = vcmask 949248  }
 0x23f   : > { %1056 = vst [vmem:[#allocation5 + $0x20] sm:$0x3] %v1039_v61  ;;  %1057 = vst [vmem:[#allocation5 + $0x28] sm:$0x3] %v1040_v62  ;;  %5084 = vmatpush1.msk.msra.mxu0 %vm1646_vm3, %v1637_v31 }
 0x240   : > { %v1121_v42 = vpop.permute.xlu1 %1120 }
 0x241   : > { %v1215_v15 = vpop.permute.xlu0 %1214  ;;  %v1133_v13 = vsel %vm1128_vm15, %v6904_v3, %v1121_v42  ;;  %v1134_v14 = vsel %vm1128_vm15, %v1121_v42, %v7055_v9  ;;  %v3715_v3 = vld [vmem:[#allocation22 + $0x8] sm:$0x3f]  ;;  %vm6018_vm15 = vmmov 0  }
 0x242   : > { %v1227_v53 = vsel %vm1222_vm0, %v6913_v10, %v1215_v15  ;;  %v1228_v60 = vsel %vm1222_vm0, %v1215_v15, %v7053_v29  ;;  %1150 = vst [vmem:[#allocation5 + $0x20] sm:$0xc] %v1133_v13  ;;  %1151 = vst [vmem:[#allocation5 + $0x28] sm:$0xc] %v1134_v14  ;;  %vm2253_vm0 = vcmask 998400  }
 0x243   : > { %1244 = vst [vmem:[#allocation5 + $0x20] sm:$0x30] %v1227_v53  ;;  %1245 = vst [vmem:[#allocation5 + $0x28] sm:$0x30] %v1228_v60 }
 0x244   : > { %v1310_v10 = vpop.permute.xlu1 %1309 }
 0x245   : > { %v1318_v34 = vpop.permute.xlu0 %1317  ;;  %v1324_v29 = vsel %vm1319_vm1, %v6958_v49, %v1310_v10  ;;  %v1325_v44 = vsel %vm1319_vm1, %v1310_v10, %v7063_v22  ;;  %v3716_v46 = vld [vmem:[#allocation7] sm:$0xff]  ;;  %v1641_v49 = vld [vmem:[#allocation5 + $0x88] sm:$0x3f] }
 0x246   : > { %v1328_v37 = vsel %vm1319_vm1, %v7043_v36, %v1318_v34  ;;  %1342 = vst [vmem:[#allocation5 + $0x20] sm:$0xc0] %v1324_v29  ;;  %1343 = vst [vmem:[#allocation5 + $0x28] sm:$0xc0] %v1325_v44  ;;  %5221 = vmatprep.subr.mxu1 %v3716_v46 }
 0x247   : > { %1347 = vst.msk [vmem:[#allocation5 + $0x40] sm:$0xc0] %vm1346_vm2, %v1328_v37  ;;  %5222 = vmatpush3.msra.mxu1 %v3716_v46  ;;  %vm2489_vm2 = vcmask 924672  }
 0x248   : > { %v3039_v9 = vpop.permute.xlu1 %3038  ;;  %5224 = vmatmul.mubr.msk.f32.vlgmr.msra.gmra.mxu1 %vm3123_vm8, %v3715_v3 }
 0x249   : > { %v3042_v36 = vsel %vm1319_vm1, %v7081_v48, %v3039_v9  ;;  %v3122_v48 = vld [vmem:[#allocation6 + $0x58] sm:$0xf] }
 0x24a   : > { %3048 = vst.msk [vmem:[#allocation6 + $0x28] sm:$0xf0] %vm3004_vm11, %v3042_v36 }
 0x24d   : > { %v1629_v47 = vld [vmem:[#allocation5 + $0x28] sm:$0xff]  ;;  %v1628_v17 = vld [vmem:[#allocation5 + $0x20] sm:$0xff] }
 0x24e   : > { %1846 = vmatprep.subr.mxu0 %v1629_v47  ;;  %v1632_v22 = vld [vmem:[#allocation5 + $0x40] sm:$0xff] }
 0x24f   : > { %1847 = vmatpush1.msra.mxu0 %v1628_v17 }
 0x250   : > { %5197 = vmatprep.subr.mxu0 %v7009_v11  ;;  %5085 = vmatmul.mubr.msk.f32.vlgmr.msra.gmra.mxu0 %vm1642_vm7, %v6989_v21 }
 0x251   : > { %5198 = vmatpush3.msk.msra.mxu0 %vm1646_vm3, %v1641_v49  ;;  %5201 = vmatprep.mubr.msk.f32.mxu0 %vm6018_vm15, %v7009_v11  ;;  %v3116_v23 = vld [vmem:[#allocation6 + $0x28] sm:$0xff] }
 0x252   : > { %5199 = vmatprep.subr.mxu0 %v7009_v11  ;;  %v3113_v11 = vld [vmem:[#allocation6 + $0x10] sm:$0xff] }
 0x253   : > { %5200 = vmatpush3.msra.mxu0 %v1632_v22 }
 0x254   : > { %5204 = vmatprep.subr.msk.mxu0 %vm2800_vm5, %v3122_v48  ;;  %5202 = vmatmul.mubr.msk.f32.vlgmr.msra.gmra.mxu0 %vm1642_vm7, %v6989_v21 }
 0x255   : > { %5205 = vmatpush3.msk.msra.mxu0 %vm2800_vm5, %v3122_v48  ;;  %5212 = vmatprep.mubr.msk.f32.mxu0 %vm3123_vm8, %v7094_v41  ;;  %vm2161_vm5 = vcmask 1022976  }
 0x256   : > { %5206 = vmatprep.subr.mxu0 %v3119_v38 }
 0x257   : > { %5207 = vmatpush3.msra.mxu0 %v3119_v38 }
 0x258   : > { %5208 = vmatprep.subr.mxu0 %v3116_v23 }
 0x259   : > { %5209 = vmatpush3.msra.mxu0 %v3116_v23 }
 0x25a   : > { %5210 = vmatprep.subr.mxu0 %v3113_v11 }
 0x25b   : > { %5211 = vmatpush3.msra.mxu0 %v3113_v11 }
 0x25c   : > { %5213 = vmatmul.mubr.msk.f32.vlgmr.msra.gmra.mxu0 %vm3123_vm8, %v7106_v40 }
 0x27d   : > { %v7194_v19 = vpop.f32.mrf.mxu1 }
 0x27e   : > { %v2288_v41 = vrot.slane %v7194_v19, 3  ;;  %v2136_v4 = vrot.slane %v7194_v19, 1  ;;  %v2556_v16 = vrot.slane %v7194_v19, 6  ;;  %v2228_v12 = vrot.slane %v7194_v19, 2 }
 0x27f   : > { %v7214_v0 = vpop.f32.mrf.mxu1  ;;  %v2372_v59 = vrot.slane %v7194_v19, 4  ;;  %v2464_v27 = vrot.slane %v7194_v19, 5 }
 0x280   : > { %v2137_v25 = vrot.slane %v7214_v0, 1  ;;  %v2229_v45 = vrot.slane %v7214_v0, 2  ;;  %v2465_v58 = vrot.slane %v7214_v0, 5  ;;  %v2289_v26 = vrot.slane %v7214_v0, 3 }
 0x281   : > { %v2373_v2 = vrot.slane %v7214_v0, 4  ;;  %v2557_v63 = vrot.slane %v7214_v0, 6 }
 0x2a3   : > { %v7254_v8 = vpop.f32.mrf.mxu1 }
 0x2a4   : > { %v2140_v35 = vrot.slane %v7254_v8, 1  ;;  %v2232_v15 = vrot.slane %v7254_v8, 2 }
 0x2a5   : > { %v7268_v42 = vpop.f32.mrf.mxu1 }
 0x2a6   : > { %v2141_v13 = vrot.slane %v7268_v42, 1  ;;  %v2233_v29 = vrot.slane %v7268_v42, 2 }
 0x2cc   : > { %v7282_v44 = vpop.f32.mrf.mxu1 }
 0x2cd   : > { %v3324_v46 = vrot.slane %v7282_v44, 2  ;;  %v3353_v3 = vrot.slane %v7282_v44, 4  ;;  %v3370_v36 = vrot.slane %v7282_v44, 6 }
 0x2ce   : > { %v7288_v9 = vpop.f32.mrf.mxu1 }
 0x2cf   : > { %v3354_v47 = vrot.slane %v7288_v9, 4  ;;  %v3325_v49 = vrot.slane %v7288_v9, 2  ;;  %v3371_v22 = vrot.slane %v7288_v9, 6 }
 0x2d1   : > { %v3211_v17 = vpop.f32.mrf.mxu1 }
 0x2d2   : > { %v3426_v38 = vrot.slane %v3211_v17, 2  ;;  %v3455_v11 = vrot.slane %v3211_v17, 4 }
 0x2d3   : > { %v3213_v48 = vpop.f32.mrf.mxu1 }
 0x2f8   : > { %v7190_v28 = vpop.f32.mrf.mxu0 }
 0x2f9   : > { %v2286_v21 = vrot.slane %v7190_v28, 3  ;;  %v2134_v32 = vrot.slane %v7190_v28, 1  ;;  %v2554_v40 = vrot.slane %v7190_v28, 6  ;;  %v2226_v43 = vrot.slane %v7190_v28, 2 }
 0x2fa   : > { %v7208_v24 = vpop.f32.mrf.mxu0  ;;  %v2370_v50 = vrot.slane %v7190_v28, 4  ;;  %v2462_v54 = vrot.slane %v7190_v28, 5 }
 0x2fb   : > { %2295 = vrot.lane.b32.xlu0 %v2286_v21, %s6019_s29  ;;  %2143 = vrot.lane.b32.xlu1 %v2134_v32, %s6020_s15  ;;  %v2135_v57 = vrot.slane %v7208_v24, 1  ;;  %v2227_v56 = vrot.slane %v7208_v24, 2  ;;  %v2287_v55 = vrot.slane %v7208_v24, 3  ;;  %v2371_v33 = vrot.slane %v7208_v24, 4 }
 0x2fc   : > { %v2555_v6 = vrot.slane %v7208_v24, 6  ;;  %v2463_v39 = vrot.slane %v7208_v24, 5 }
 0x2ff   : > { %2299 = vrot.lane.b32.xlu0 %v2288_v41, %s6019_s29  ;;  %2147 = vrot.lane.b32.xlu1 %v2136_v4, %s6020_s15 }
 0x303   : > { %2563 = vrot.lane.b32.xlu0 %v2554_v40, %s6021_s7  ;;  %2235 = vrot.lane.b32.xlu1 %v2226_v43, %s6022_s8 }
 0x307   : > { %2567 = vrot.lane.b32.xlu0 %v2556_v16, %s6021_s7  ;;  %2239 = vrot.lane.b32.xlu1 %v2228_v12, %s6022_s8  ;;  %v3427_v16 = vrot.slane %v3213_v48, 2 }
 0x308   : > { %v5225_v32 = vpop.f32.mrf.mxu1 }
 0x30b   : > { %2379 = vrot.lane.b32.xlu1 %v2370_v50, %s6023_s20  ;;  %2145 = vrot.lane.b32.xlu0 %v2135_v57, %s6020_s15  ;;  %v3456_v50 = vrot.slane %v3213_v48, 4  ;;  %v3861_v57 = vrot.slane %v5225_v32, 2 }
 0x30f   : > { %2383 = vrot.lane.b32.xlu1 %v2372_v59, %s6023_s20  ;;  %2149 = vrot.lane.b32.xlu0 %v2137_v25, %s6020_s15  ;;  %v3795_v59 = vpop.f32.mrf.mxu1 }
 0x310   : > { %v7224_v7 = vpop.f32.mrf.mxu0  ;;  %v3820_v25 = vrot.slane %v3795_v59, 2 }
 0x311   : > { %v2230_v61 = vrot.slane %v7224_v7, 2  ;;  %v2138_v62 = vrot.slane %v7224_v7, 1  ;;  %v2290_v30 = vrot.slane %v7224_v7, 3  ;;  %v2374_v31 = vrot.slane %v7224_v7, 4 }
 0x312   : > { %v7228_v51 = vpop.f32.mrf.mxu0  ;;  %v2466_v53 = vrot.slane %v7224_v7, 5 }
 0x313   : > { %2471 = vrot.lane.b32.xlu1 %v2462_v54, %s6015_s30  ;;  %2237 = vrot.lane.b32.xlu0 %v2227_v56, %s6022_s8  ;;  %v2139_v60 = vrot.slane %v7228_v51, 1  ;;  %v2231_v14 = vrot.slane %v7228_v51, 2  ;;  %v2291_v34 = vrot.slane %v7228_v51, 3  ;;  %v2375_v37 = vrot.slane %v7228_v51, 4 }
 0x314   : > { %v7232_v52 = vpop.f32.mrf.mxu0  ;;  %v3832_v54 = vrot.slane %v3795_v59, 4 }
 0x315   : > { %v2142_v10 = vrot.slane %v7232_v52, 1 }
 0x316   : > { %v5203_v18 = vpop.f32.mrf.mxu0 }
 0x317   : > { %2475 = vrot.lane.b32.xlu1 %v2464_v27, %s6015_s30  ;;  %2241 = vrot.lane.b32.xlu0 %v2229_v45, %s6022_s8  ;;  %v3838_v45 = vrot.slane %v3795_v59, 6  ;;  %v2470_v59 = vrot.slane %v7232_v52, 5 }
 0x31b   : > { %2297 = vrot.lane.b32.xlu1 %v2287_v55, %s6019_s29  ;;  %2381 = vrot.lane.b32.xlu0 %v2371_v33, %s6023_s20  ;;  %v2292_v33 = vrot.slane %v7254_v8, 3 }
 0x31c   : > { %v5214_v23 = vpop.f32.mrf.mxu0 }
 0x31d   : > { %v3428_v21 = vrot.slane %v5214_v23, 2  ;;  %v3457_v41 = vrot.slane %v5214_v23, 4 }
 0x31e   : > { %v3282_v4 = vpop.f32.mrf.mxu0 }
 0x31f   : > { %2477 = vrot.lane.b32.xlu1 %v2465_v58, %s6015_s30  ;;  %2301 = vrot.lane.b32.xlu0 %v2289_v26, %s6019_s29  ;;  %v3326_v40 = vrot.slane %v3282_v4, 2  ;;  %v3355_v43 = vrot.slane %v3282_v4, 4  ;;  %v3372_v12 = vrot.slane %v3282_v4, 6 }
 0x323   : > { %2565 = vrot.lane.b32.xlu1 %v2555_v6, %s6021_s7  ;;  %2385 = vrot.lane.b32.xlu0 %v2373_v2, %s6023_s20  ;;  %v2376_v6 = vrot.slane %v7254_v8, 4  ;;  %v2234_v2 = vrot.slane %v7232_v52, 2 }
 0x327   : > { %2569 = vrot.lane.b32.xlu1 %v2557_v63, %s6021_s7  ;;  %2473 = vrot.lane.b32.xlu0 %v2463_v39, %s6015_s30 }
 0x32b   : > { %2243 = vrot.lane.b32.xlu0 %v2230_v61, %s6022_s8  ;;  %2151 = vrot.lane.b32.xlu1 %v2138_v62, %s6020_s15  ;;  %v2558_v61 = vrot.slane %v7224_v7, 6  ;;  %v2467_v62 = vrot.slane %v7228_v51, 5 }
 0x32f   : > { %2155 = vrot.lane.b32.xlu0 %v2140_v35, %s6020_s15  ;;  %2303 = vrot.lane.b32.xlu1 %v2290_v30, %s6019_s29  ;;  %v7340_v35 = vand.u32 127, %v816_v1  ;;  %v2559_v1 = vrot.slane %v7228_v51, 6 }
 0x331   : > { %v3804_v20 = vand.u32 7, %v7340_v35 }
 0x333   : > { %2387 = vrot.lane.b32.xlu0 %v2374_v31, %s6023_s20  ;;  %2247 = vrot.lane.b32.xlu1 %v2232_v15, %s6022_s8  ;;  %v2377_v15 = vrot.slane %v7268_v42, 4 }
 0x337   : > { %2479 = vrot.lane.b32.xlu0 %v2466_v53, %s6015_s30  ;;  %2153 = vrot.lane.b32.xlu1 %v2139_v60, %s6020_s15  ;;  %v2293_v53 = vrot.slane %v7268_v42, 3  ;;  %v7349_v60 = vadd.s32 128, %v7340_v35 }
 0x33b   : > { %2157 = vrot.lane.b32.xlu0 %v2141_v13, %s6020_s15  ;;  %2245 = vrot.lane.b32.xlu1 %v2231_v14, %s6022_s8 }
 0x33f   : > { %2305 = vrot.lane.b32.xlu0 %v2291_v34, %s6019_s29  ;;  %2389 = vrot.lane.b32.xlu1 %v2375_v37, %s6023_s20  ;;  %v2468_v34 = vrot.slane %v7254_v8, 5  ;;  %v7360_v37 = vand.u32 31, %v7340_v35 }
 0x343   : > { %2249 = vrot.lane.b32.xlu0 %v2233_v29, %s6022_s8  ;;  %2159 = vrot.lane.b32.xlu1 %v2142_v10, %s6020_s15  ;;  %v7363_v10 = vand.u32 31, %v7349_v60 }
 0x347   : > { %3327 = vrot.lane.b32.xlu0 %v3324_v46, %s6020_s15  ;;  %3356 = vrot.lane.b32.xlu1 %v3353_v3, %s6022_s8  ;;  %v2378_v3 = vrot.slane %v7232_v52, 4 }
 0x34b   : > { %3358 = vrot.lane.b32.xlu0 %v3354_v47, %s6022_s8  ;;  %3373 = vrot.lane.b32.xlu1 %v3370_v36, %s6019_s29  ;;  %v2294_v36 = vrot.slane %v7232_v52, 3  ;;  %v2093_v47 = vadd.s32 4294967290, %v7360_v37 }
 0x34d   : > { %vm2101_vm1 = vcmp.ge.s32.totalorder %v2093_v47, 0  ;;  %v2430_v47 = vadd.s32 6, %v7360_v37 }
 0x34f   : > { %3375 = vrot.lane.b32.xlu0 %v3371_v22, %s6019_s29  ;;  %3329 = vrot.lane.b32.xlu1 %v3325_v49, %s6020_s15  ;;  %v2045_v49 = vadd.s32 4294967287, %v7360_v37  ;;  %v2046_v22 = vadd.s32 4294967287, %v7363_v10 }
 0x351   : > { %vm2053_vm7 = vcmp.ge.s32.totalorder %v2045_v49, 0  ;;  %vm2054_vm11 = vcmp.ge.s32.totalorder %v2046_v22, 0 }
 0x353   : > { %3400 = vrot.lane.b32.xlu0 %v3211_v17, %s6023_s20  ;;  %3402 = vrot.lane.b32.xlu1 %v3213_v48, %s6023_s20  ;;  %v2094_v17 = vadd.s32 4294967290, %v7363_v10  ;;  %v2194_v48 = vadd.s32 4294967293, %v7360_v37 }
 0x355   : > { %vm2102_vm3 = vcmp.ge.s32.totalorder %v2094_v17, 0  ;;  %vm2202_vm13 = vcmp.ge.s32.totalorder %v2194_v48, 0  ;;  %v2431_v17 = vadd.s32 6, %v7363_v10  ;;  %v2523_v48 = vadd.s32 9, %v7363_v10 }
 0x357   : > { %3429 = vrot.lane.b32.xlu1 %v3426_v38, %s6015_s30  ;;  %3404 = vrot.lane.b32.xlu0 %v5214_v23, %s6023_s20  ;;  %v2195_v38 = vadd.s32 4294967293, %v7363_v10 }
 0x359   : > { %vm2203_vm14 = vcmp.ge.s32.totalorder %v2195_v38, 0 }
 0x35b   : > { %3458 = vrot.lane.b32.xlu0 %v3455_v11, %s6021_s7  ;;  %3433 = vrot.lane.b32.xlu1 %v3428_v21, %s6015_s30  ;;  %v2560_v21 = vrot.slane %v7254_v8, 6 }
 0x35f   : > { %3462 = vrot.lane.b32.xlu0 %v3457_v41, %s6021_s7  ;;  %3850 = vrot.lane.b32.xlu1 %v5225_v32, %s6023_s20  ;;  %v2469_v32 = vrot.slane %v7268_v42, 5  ;;  %v2032_v41 = vadd.s32 384, %v7340_v35 }
 0x363   : > { %3360 = vrot.lane.b32.xlu1 %v3355_v43, %s6022_s8  ;;  %3331 = vrot.lane.b32.xlu0 %v3326_v40, %s6020_s15  ;;  %v2561_v43 = vrot.slane %v7268_v42, 6 }
 0x367   : > { %3377 = vrot.lane.b32.xlu1 %v3372_v12, %s6019_s29  ;;  %3431 = vrot.lane.b32.xlu0 %v3427_v16, %s6015_s30 }
 0x36b   : > { %3460 = vrot.lane.b32.xlu1 %v3456_v50, %s6021_s7  ;;  %3862 = vrot.lane.b32.xlu0 %v3861_v57, %s6015_s30 }
 0x36d   : > { %v7314_v56 = vpop.permute.xlu0 %2295  ;;  %v2144_v27 = vpop.permute.xlu1 %2143 }
 0x36f   : > { %3833 = vrot.lane.b32.xlu1 %v3832_v54, %s6022_s8  ;;  %3821 = vrot.lane.b32.xlu0 %v3820_v25, %s6020_s15  ;;  %s5147_s15 = sshll.u32 %s6138_s23, 10 }
 0x370   : > { %s7949_s22 = scalar_lea.hbm %s8331_s25, %s5147_s15 }
 0x371   : > { %v7318_v18 = vpop.permute.xlu0 %2299  ;;  %v7320_v55 = vpop.permute.xlu1 %2147 }
 0x373   : > { %2307 = vrot.lane.b32.xlu1 %v2292_v33, %s6019_s29  ;;  %3839 = vrot.lane.b32.xlu0 %v3838_v45, %s6019_s29  ;;  %v2339_v45 = vadd.s32 3, %v7363_v10  ;;  %v2077_v33 = vsel %vm2053_vm7, %v7190_v28, 0.0  ;;  %v2562_v28 = vrot.slane %v7232_v52, 6  ;;  %v2522_v52 = vadd.s32 9, %v7360_v37 }
 0x374   : > { %vm2539_vm7 = vcmp.lt.s32.totalorder %v2523_v48, 32 }
 0x375   : > { %v7325_v58 = vpop.permute.xlu0 %2563  ;;  %v2236_v26 = vpop.permute.xlu1 %2235  ;;  %vm2355_vm9 = vcmp.lt.s32.totalorder %v2339_v45, 32  ;;  %vm2538_vm15 = vcmp.lt.s32.totalorder %v2522_v52, 32 }
 0x377   : > { %2391 = vrot.lane.b32.xlu1 %v2376_v6, %s6023_s20  ;;  %2251 = vrot.lane.b32.xlu0 %v2234_v2, %s6022_s8 }
 0x379   : > { %v7331_v63 = vpop.permute.xlu0 %2567  ;;  %v7333_v39 = vpop.permute.xlu1 %2239 }
 0x37b   : > { %2571 = vrot.lane.b32.xlu1 %v2558_v61, %s6021_s7  ;;  %2481 = vrot.lane.b32.xlu0 %v2467_v62, %s6015_s30 }
 0x37d   : > { %v2146_v30 = vpop.permute.xlu0 %2145  ;;  %v7342_v31 = vpop.permute.xlu1 %2379 }
 0x37e   : > { %v2162_v4 = vsel %vm2161_vm5, %v2144_v27, %v2146_v30  ;;  %v2163_v40 = vsel %vm2161_vm5, %v2146_v30, %v7320_v55  ;;  %v2338_v27 = vadd.s32 3, %v7360_v37  ;;  %v2034_v37 = vadd.s32 640, %v7340_v35 }
 0x37f   : > { %2393 = vrot.lane.b32.xlu1 %v2377_v15, %s6023_s20  ;;  %2309 = vrot.lane.b32.xlu0 %v2293_v53, %s6019_s29  ;;  %v2178_v25 = vsel %vm2101_vm1, %v2162_v4, 0.0  ;;  %v2179_v54 = vsel %vm2102_vm3, %v2163_v40, 0.0  ;;  %v7410_v53 = vand.u32 31, %v2032_v41  ;;  %vm2446_vm1 = vcmp.lt.s32.totalorder %v2430_v47, 32 }
 0x380   : > { %v2186_v61 = vadd.f32 %v2178_v25, %v2077_v33  ;;  %vm2354_vm8 = vcmp.lt.s32.totalorder %v2338_v27, 32  ;;  %vm2447_vm3 = vcmp.lt.s32.totalorder %v2431_v17, 32  ;;  %v2033_v33 = vadd.s32 512, %v7340_v35 }
 0x381   : > { %v7351_v13 = vpop.permute.xlu0 %2149  ;;  %v7353_v14 = vpop.permute.xlu1 %2383  ;;  %v2341_v47 = vadd.s32 3, %v7410_v53 }
 0x383   : > { %2573 = vrot.lane.b32.xlu1 %v2559_v1, %s6021_s7  ;;  %2483 = vrot.lane.b32.xlu0 %v2468_v34, %s6015_s30 }
 0x385   : > { %v2238_v29 = vpop.permute.xlu0 %2237  ;;  %v7365_v46 = vpop.permute.xlu1 %2471 }
 0x386   : > { %v2254_v16 = vsel %vm2253_vm0, %v2236_v26, %v2238_v29  ;;  %v2255_v12 = vsel %vm2253_vm0, %v2238_v29, %v7333_v39  ;;  %v2078_v26 = vsel %vm2054_vm11, %v7208_v24, 0.0 }
 0x387   : > { %2395 = vrot.lane.b32.xlu1 %v2378_v3, %s6023_s20  ;;  %2311 = vrot.lane.b32.xlu0 %v2294_v36, %s6019_s29  ;;  %v2270_v6 = vsel %vm2202_vm13, %v2254_v16, 0.0  ;;  %v2271_v2 = vsel %vm2203_vm14, %v2255_v12, 0.0  ;;  %v2187_v62 = vadd.f32 %v2179_v54, %v2078_v26  ;;  %v2197_v54 = vadd.s32 4294967293, %v7410_v53  ;;  %s7923_s29 = scalar_lea.vmem [#allocation31], %s6416_s17  ;;  %s7933_s20 = scalar_lea.vmem [#allocation26], %s6402_s6 }
 0x388   : > { %v2278_v34 = vadd.f32 %v2270_v6, %v2186_v61 }
 0x389   : > { %v7377_v23 = vpop.permute.xlu0 %2241  ;;  %v7379_v11 = vpop.permute.xlu1 %2475  ;;  %v2279_v29 = vadd.f32 %v2271_v2, %v2187_v62  ;;  %v7450_v2 = vand.u32 31, %v2034_v37  ;;  %vm2205_vm14 = vcmp.ge.s32.totalorder %v2197_v54, 0 }
 0x38b   : > { %2575 = vrot.lane.b32.xlu1 %v2560_v21, %s6021_s7  ;;  %2485 = vrot.lane.b32.xlu0 %v2469_v32, %s6015_s30  ;;  %v2048_v32 = vadd.s32 4294967287, %v7410_v53  ;;  %v2050_v48 = vadd.s32 4294967287, %v7450_v2 }
 0x38d   : > { %v2382_v50 = vpop.permute.xlu0 %2381  ;;  %v2298_v57 = vpop.permute.xlu1 %2297  ;;  %vm2056_vm11 = vcmp.ge.s32.totalorder %v2048_v32, 0 }
 0x38e   : > { %v2314_v24 = vsel %vm2313_vm4, %v7314_v56, %v2298_v57  ;;  %v2315_v1 = vsel %vm2313_vm4, %v2298_v57, %v7318_v18  ;;  %v2398_v3 = vsel %vm2397_vm6, %v7342_v31, %v2382_v50  ;;  %v2399_v36 = vsel %vm2397_vm6, %v2382_v50, %v7353_v14 }
 0x38f   : > { %2577 = vrot.lane.b32.xlu1 %v2561_v43, %s6021_s7  ;;  %2487 = vrot.lane.b32.xlu0 %v2470_v59, %s6015_s30  ;;  %v2330_v56 = vadd.f32 %v2314_v24, %v2278_v34  ;;  %v2331_v49 = vadd.f32 %v2315_v1, %v2279_v29  ;;  %v2414_v31 = vsel %vm2354_vm8, %v2398_v3, 0.0  ;;  %v2415_v21 = vsel %vm2355_vm9, %v2399_v36, 0.0  ;;  %s4652_s30 = scalar_lea.sflag [#allocation15], %s6399_s13 }
 0x390   : > { %v2096_v43 = vadd.s32 4294967290, %v7410_v53  ;;  %v2035_v24 = vadd.s32 768, %v7340_v35  ;;  %v7455_v1 = vstv %s7429_s27  ;;  %vm2357_vm8 = vcmp.lt.s32.totalorder %v2341_v47, 32 }
 0x391   : > { %v7405_v30 = vpop.permute.xlu0 %2301  ;;  %v7407_v15 = vpop.permute.xlu1 %2477  ;;  %v2422_v4 = vadd.f32 %v2414_v31, %v2330_v56  ;;  %v2423_v10 = vadd.f32 %v2415_v21, %v2331_v49  ;;  %v7467_v49 = vand.u32 31, %v2033_v33  ;;  %vm2058_vm9 = vcmp.ge.s32.totalorder %v2050_v48, 0 }
 0x392   : > { %vm2104_vm13 = vcmp.ge.s32.totalorder %v2096_v43, 0  ;;  %v7470_v32 = vand.u32 31, %v2035_v24 }
 0x393   : > { %2579 = vrot.lane.b32.xlu0 %v2562_v28, %s6021_s7  ;;  %v2080_v28 = vsel %vm2056_vm11, %v7214_v0, 0.0  ;;  %v2198_v33 = vadd.s32 4294967293, %v7467_v49  ;;  %s695_s7 = scalar_lea.vmem [#allocation25], %s5068_s11  ;;  %s5804_s11 = scalar_lea.vmem %s5803_s19, 2048 }
 0x394   : > { %s4686_s8 = sshll.u32 %s695_s7, 4  ;;  %s7951_s8 = int_to_ptr.vmem [resolvable:$true] %s4686_s8 }
 0x395   : > { %v7424_v22 = vpop.permute.xlu0 %2385  ;;  %v2566_v38 = vpop.permute.xlu1 %2565  ;;  %s5798_s28 = scalar_lea.vmem %s7951_s8, 1024  ;;  %p5805_p0 = scmp.lt.s32.totalorder %s7951_s8, %s5803_s19 }
 0x396   : > { %v2582_v16 = vsel %vm2581_vm10, %v7325_v58, %v2566_v38  ;;  %v2583_v12 = vsel %vm2581_vm10, %v2566_v38, %v7331_v63  ;;  %p5799_p10 = scmp.ne.s32.totalorder %s7951_s8, %s5798_s28  ;;  %p5806_p6 = scmp.lt.s32.totalorder %s5804_s11, %s5798_s28 }
 0x397   : > { %v2598_v58 = vsel %vm2538_vm15, %v2582_v16, 0.0  ;;  %v2599_v26 = vsel %vm2539_vm7, %v2583_v12, 0.0  ;;  %v2036_v12 = vadd.s32 896, %v7340_v35 }
 0x398   : > { %p5800_p5 = pnand %p5799_p10, %p8332_p1  ;;  %p5807_p13 = por %p5806_p6, %p5805_p0 }
 0x399   : > { %v2474_v41 = vpop.permute.xlu0 %2473  ;;  %v7433_v40 = vpop.permute.xlu1 %2569 }
 0x39a   : > { %v2490_v50 = vsel %vm2489_vm2, %v7365_v46, %v2474_v41  ;;  %v2491_v57 = vsel %vm2489_vm2, %v2474_v41, %v7379_v11  ;;  %p5801_p4 = pneg %p5800_p5 }
 0x39b   : > { %v2506_v59 = vsel %vm2446_vm1, %v2490_v50, 0.0  ;;  %v2507_v25 = vsel %vm2447_vm3, %v2491_v57, 0.0 }
 0x39c   : > { %v2514_v27 = vadd.f32 %v2506_v59, %v2422_v4  ;;  %v2515_v45 = vadd.f32 %v2507_v25, %v2423_v10  ;;  %v2097_v4 = vadd.s32 4294967290, %v7467_v49  ;;  %v2098_v10 = vadd.s32 4294967290, %v7450_v2  ;;  %p5808_p3 = pnand %p5807_p13, %p5801_p4 }
 0x39d   : > { %v7448_v6 = vpop.permute.xlu0 %2243  ;;  %v2152_v46 = vpop.permute.xlu1 %2151  ;;  %v2049_v59 = vadd.s32 4294967287, %v7467_v49  ;;  %v2051_v25 = vadd.s32 4294967287, %v7470_v32 }
 0x39e   : > { %v2606_v61 = vadd.f32 %v2598_v58, %v2514_v27  ;;  %v2607_v62 = vadd.f32 %v2599_v26, %v2515_v45  ;;  %v2257_v34 = vsel %vm2253_vm0, %v7377_v23, %v7448_v6  ;;  %v2165_v29 = vsel %vm2161_vm5, %v7351_v13, %v2152_v46 }
 0x39f   : > { %v2181_v52 = vsel %vm2104_vm13, %v2165_v29, 0.0  ;;  %v2273_v21 = vsel %vm2205_vm14, %v2257_v34, 0.0  ;;  %vm2105_vm15 = vcmp.ge.s32.totalorder %v2097_v4, 0  ;;  %vm2106_vm1 = vcmp.ge.s32.totalorder %v2098_v10, 0 }
 0x3a0   : > { %v2616_v3 = vadd.f32 %v7455_v1, %v2606_v61  ;;  %v2617_v36 = vadd.f32 %v7455_v1, %v2607_v62  ;;  %v2189_v0 = vadd.f32 %v2181_v52, %v2080_v28  ;;  %v2099_v45 = vadd.s32 4294967290, %v7470_v32 }
 0x3a1   : > { %v2156_v17 = vpop.permute.xlu0 %2155  ;;  %v7465_v56 = vpop.permute.xlu1 %2303  ;;  %v2199_v58 = vadd.s32 4294967293, %v7450_v2  ;;  %v2342_v62 = vadd.s32 3, %v7467_v49  ;;  %v7492_v28 = vand.u32 31, %v2036_v12  ;;  %vm2057_vm3 = vcmp.ge.s32.totalorder %v2049_v59, 0 }
 0x3a2   : > { %v5091_v38 = vmul.f32 -1.442695, %v2616_v3  ;;  %v5092_v31 = vmul.f32 -1.442695, %v2617_v36  ;;  %v2281_v37 = vadd.f32 %v2273_v21, %v2189_v0  ;;  %v2317_v41 = vsel %vm2313_vm4, %v7405_v30, %v7465_v56 }
 0x3a3   : > { %vm2059_vm7 = vcmp.ge.s32.totalorder %v2051_v25, 0  ;;  %v2082_v29 = vsel %vm2058_vm9, %v7228_v51, 0.0  ;;  %vm2107_vm11 = vcmp.ge.s32.totalorder %v2099_v45, 0  ;;  %vm2206_vm13 = vcmp.ge.s32.totalorder %v2198_v33, 0 }
 0x3a4   : > { %5491 = vpow2.f32 %v5091_v38  ;;  %v2333_v50 = vadd.f32 %v2317_v41, %v2281_v37  ;;  %vm2207_vm14 = vcmp.ge.s32.totalorder %v2199_v58, 0  ;;  %v2081_v47 = vsel %vm2057_vm3, %v7224_v7, 0.0 }
 0x3a5   : > { %5493 = vpow2.f32 %v5092_v31  ;;  %v2388_v43 = vpop.permute.xlu0 %2387  ;;  %v7477_v16 = vpop.permute.xlu1 %2247  ;;  %v2083_v0 = vsel %vm2059_vm7, %v7254_v8, 0.0  ;;  %v2200_v7 = vadd.s32 4294967293, %v7470_v32 }
 0x3a6   : > { %v2401_v57 = vsel %vm2397_vm6, %v7424_v22, %v2388_v43 }
 0x3a7   : > { %v2417_v54 = vsel %vm2357_vm8, %v2401_v57, 0.0  ;;  %vm2358_vm8 = vcmp.lt.s32.totalorder %v2342_v62, 32  ;;  %v2100_v57 = vadd.s32 4294967290, %v7492_v28  ;;  %vm2208_vm9 = vcmp.ge.s32.totalorder %v2200_v7, 0 }
 0x3a8   : > { %v7484_v27 = vadd.f32 %v2417_v54, %v2333_v50 }
 0x3a9   : > { %v7489_v26 = vpop.permute.xlu0 %2479  ;;  %v2154_v61 = vpop.permute.xlu1 %2153 }
 0x3aa   : > { %v2166_v24 = vsel %vm2161_vm5, %v2152_v46, %v2154_v61  ;;  %v2167_v34 = vsel %vm2161_vm5, %v2154_v61, %v2156_v17  ;;  %v2052_v46 = vadd.s32 4294967287, %v7492_v28 }
 0x3ab   : > { %v2182_v3 = vsel %vm2105_vm15, %v2166_v24, 0.0  ;;  %v2183_v36 = vsel %vm2106_vm1, %v2167_v34, 0.0  ;;  %vm2108_vm1 = vcmp.ge.s32.totalorder %v2100_v57, 0  ;;  %v2731_v57 = vld [vmem:[%s6461_s2] sm:$0xff] }
 0x3ac   : > { %v2191_v52 = vadd.f32 %v2183_v36, %v2082_v29  ;;  %v2190_v31 = vadd.f32 %v2182_v3, %v2081_v47  ;;  %vm2060_vm15 = vcmp.ge.s32.totalorder %v2052_v46, 0 }
 0x3ad   : > { %v2158_v48 = vpop.permute.xlu0 %2157  ;;  %v2246_v38 = vpop.permute.xlu1 %2245  ;;  %v2084_v62 = vsel %vm2060_vm15, %v7268_v42, 0.0 }
 0x3ae   : > { %v2168_v21 = vsel %vm2161_vm5, %v2156_v17, %v2158_v48  ;;  %v2258_v51 = vsel %vm2253_vm0, %v7448_v6, %v2246_v38  ;;  %v2259_v37 = vsel %vm2253_vm0, %v2246_v38, %v7477_v16 }
 0x3af   : > { %v2184_v41 = vsel %vm2107_vm11, %v2168_v21, 0.0  ;;  %v2274_v4 = vsel %vm2206_vm13, %v2258_v51, 0.0  ;;  %v2275_v10 = vsel %vm2207_vm14, %v2259_v37, 0.0 }
 0x3b0   : > { %v2192_v8 = vadd.f32 %v2184_v41, %v2083_v0  ;;  %v2282_v12 = vadd.f32 %v2274_v4, %v2190_v31  ;;  %v7506_v50 = vadd.f32 %v2275_v10, %v2191_v52  ;;  %v2031_v31 = vadd.s32 256, %v7340_v35 }
 0x3b1   : > { %v5492_v59 = vpop.eup %5491  ;;  %v7509_v25 = vpop.permute.xlu0 %2305  ;;  %v7546_v4 = vsub.s32 0, %v6456_v5 }
 0x3b2   : > { %v7511_v17 = vpop.permute.xlu1 %2389  ;;  %v5494_v6 = vpop.eup %5493  ;;  %v2648_v54 = vadd.f32 1.0, %v5492_v59  ;;  %v2318_v45 = vsel %vm2313_vm4, %v7465_v56, %v7509_v25 }
 0x3b3   : > { %v2402_v33 = vsel %vm2397_vm6, %v2388_v43, %v7511_v17  ;;  %v2649_v58 = vadd.f32 1.0, %v5494_v6  ;;  %v2334_v61 = vadd.f32 %v2318_v45, %v2282_v12  ;;  %8323 = vst [vmem:[#allocation48_spill] sm:$0xff] %v7546_v4  ;;  %v7553_v12 = vand.u32 15, %v7349_v60  ;;  %v2732_v6 = vld [vmem:[%s6461_s2 + $0x8] sm:$0xff] }
 0x3b4   : > { %v2418_v24 = vsel %vm2358_vm8, %v2402_v33, 0.0  ;;  %5495 = vrcp.f32 %v2648_v54 }
 0x3b5   : > { %5497 = vrcp.f32 %v2649_v58  ;;  %v7519_v34 = vadd.f32 %v2418_v24, %v2334_v61  ;;  %v7521_v29 = vpop.permute.xlu0 %2249 }
 0x3b6   : > { %v2160_v3 = vpop.permute.xlu1 %2159  ;;  %v2260_v56 = vsel %vm2253_vm0, %v7477_v16, %v7521_v29 }
 0x3b7   : > { %v2169_v43 = vsel %vm2161_vm5, %v2158_v48, %v2160_v3  ;;  %v2276_v36 = vsel %vm2208_vm9, %v2260_v56, 0.0  ;;  %v2039_v48 = vand.u32 31, %v2031_v31 }
 0x3b8   : > { %v2185_v52 = vsel %vm2108_vm1, %v2169_v43, 0.0  ;;  %v7528_v47 = vadd.f32 %v2276_v36, %v2192_v8  ;;  %v3291_v8 = vand.u32 15, %v7340_v35  ;;  %v3294_v43 = vadd.s32 4294967287, %v7553_v12 }
 0x3b9   : > { %v7530_v0 = vadd.f32 %v2185_v52, %v2084_v62  ;;  %v3328_v38 = vpop.permute.xlu0 %3327  ;;  %v2047_v45 = vadd.s32 4294967287, %v2039_v48  ;;  %v2095_v36 = vadd.s32 4294967290, %v2039_v48  ;;  %v2196_v7 = vadd.s32 4294967293, %v2039_v48 }
 0x3ba   : > { %v3357_v46 = vpop.permute.xlu1 %3356  ;;  %v3309_v24 = vadd.s32 4294967290, %v3291_v8  ;;  %v3293_v56 = vadd.s32 4294967287, %v3291_v8  ;;  %vm3296_vm13 = vcmp.ge.s32.totalorder %v3294_v43, 0  ;;  %v3385_v43 = vadd.s32 3, %v3291_v8 }
 0x3bb   : > { %vm2055_vm3 = vcmp.ge.s32.totalorder %v2047_v45, 0  ;;  %vm2103_vm14 = vcmp.ge.s32.totalorder %v2095_v36, 0  ;;  %v2340_v45 = vadd.s32 3, %v2039_v48  ;;  %vm2204_vm8 = vcmp.ge.s32.totalorder %v2196_v7, 0 }
 0x3bc   : > { %vm3311_vm7 = vcmp.ge.s32.totalorder %v3309_v24, 0  ;;  %vm3295_vm11 = vcmp.ge.s32.totalorder %v3293_v56, 0  ;;  %v3342_v7 = vadd.s32 4294967293, %v7553_v12  ;;  %v3444_v35 = vadd.s32 9, %v7553_v12 }
 0x3bd   : > { %v7533_v21 = vpop.permute.xlu0 %3358  ;;  %v3305_v56 = vsel %vm3295_vm11, %v7282_v44, 0.0  ;;  %vm2356_vm1 = vcmp.lt.s32.totalorder %v2340_v45, 32 }
 0x3be   : > { %v7535_v51 = vpop.permute.xlu1 %3373  ;;  %v3362_v36 = vsel %vm2253_vm0, %v3357_v46, %v7533_v21  ;;  %v2400_v46 = vsel %vm2397_vm6, %v7353_v14, %v7424_v22 }
 0x3c1   : > { %v7537_v16 = vpop.eup %5495  ;;  %v7539_v37 = vpop.permute.xlu0 %3375 }
 0x3c2   : > { %8321 = vst [vmem:[#allocation46_spill] sm:$0xff] %v7537_v16  ;;  %v7541_v42 = vpop.permute.xlu1 %3329  ;;  %v7543_v41 = vpop.eup %5497  ;;  %v2739_v10 = vadd.f32 1.0, %v7537_v16 }
 0x3c3   : > { %8322 = vst [vmem:[#allocation47_spill] sm:$0xff] %v7543_v41  ;;  %v2740_v59 = vadd.f32 1.0, %v7543_v41 }
 0x3c4   : > { %v2750_v54 = vrot.slane %v2739_v10, %v7546_v4  ;;  %v3333_v10 = vsel %vm2161_vm5, %v3328_v38, %v7541_v42  ;;  %v7583_v38 = vadd.s32 9, %v2039_v48 }
 0x3c5   : > { %v7559_v33 = vpop.permute.xlu0 %3400  ;;  %v2754_v61 = vrot.slane %v2740_v59, %v7546_v4  ;;  %v3341_v59 = vadd.s32 4294967293, %v3291_v8 }
 0x3c6   : > { %v7561_v58 = vpop.permute.xlu1 %3402  ;;  %v2779_v3 = vmul.f32 %v2750_v54, %v2731_v57  ;;  %v2079_v57 = vsel %vm2055_vm3, %v7194_v19, 0.0  ;;  %v7577_v54 = vadd.s32 6, %v2039_v48  ;;  %v3306_v19 = vsel %vm3296_vm13, %v7288_v9, 0.0 }
 0x3c7   : > { %v2780_v60 = vmul.f32 %v2754_v61, %v2732_v6  ;;  %v2164_v6 = vsel %vm2161_vm5, %v7320_v55, %v7351_v13  ;;  %v3337_v61 = vsel %vm3311_vm7, %v3333_v10, 0.0  ;;  %v2256_v55 = vsel %vm2253_vm0, %v7333_v39, %v7377_v23 }
 0x3c8   : > { %vm3343_vm9 = vcmp.ge.s32.totalorder %v3341_v59, 0  ;;  %v3386_v13 = vadd.s32 3, %v7553_v12  ;;  %v3339_v10 = vadd.f32 %v3337_v61, %v3305_v56  ;;  %v3310_v48 = vadd.s32 4294967290, %v7553_v12 }
 0x3c9   : > { %v7565_v62 = vpop.permute.xlu0 %3404  ;;  %v7569_v31 = vadd.f32 %v2780_v60, %v2779_v3  ;;  %v2180_v60 = vsel %vm2103_vm14, %v2164_v6, 0.0  ;;  %vm2448_vm15 = vcmp.lt.s32.totalorder %v7577_v54, 32  ;;  %v2272_v39 = vsel %vm2204_vm8, %v2256_v55, 0.0 }
 0x3ca   : > { %v7567_v52 = vpop.permute.xlu1 %3429  ;;  %vm2540_vm3 = vcmp.lt.s32.totalorder %v7583_v38, 32  ;;  %vm3389_vm7 = vcmp.lt.s32.totalorder %v3385_v43, 16  ;;  %v3415_v23 = vadd.s32 6, %v7553_v12  ;;  %v2188_v6 = vadd.f32 %v2180_v60, %v2079_v57 }
 0x3cb   : > { %8324 = vst [vmem:[#allocation49_spill] sm:$0xff] %v7569_v31  ;;  %v3414_v31 = vadd.s32 6, %v3291_v8  ;;  %v3366_v61 = vsel %vm3343_vm9, %v3362_v36, 0.0  ;;  %vm3390_vm11 = vcmp.lt.s32.totalorder %v3386_v13, 16  ;;  %v2316_v56 = vsel %vm2313_vm4, %v7318_v18, %v7405_v30 }
 0x3cc   : > { %v3368_v41 = vadd.f32 %v3366_v61, %v3339_v10  ;;  %vm3312_vm13 = vcmp.ge.s32.totalorder %v3310_v48, 0  ;;  %v3443_v55 = vadd.s32 9, %v3291_v8  ;;  %v2280_v16 = vadd.f32 %v2272_v39, %v2188_v6 }
 0x3cd   : > { %v7579_v3 = vpop.permute.xlu0 %3458  ;;  %vm3344_vm14 = vcmp.ge.s32.totalorder %v3342_v7, 0  ;;  %vm3418_vm8 = vcmp.lt.s32.totalorder %v3414_v31, 16  ;;  %v2416_v60 = vsel %vm2356_vm1, %v2400_v46, 0.0  ;;  %vm3419_vm9 = vcmp.lt.s32.totalorder %v3415_v23, 16 }
 0x3ce   : > { %v7581_v24 = vpop.permute.xlu1 %3433  ;;  %v2332_v18 = vadd.f32 %v2316_v56, %v2280_v16  ;;  %v3379_v30 = vsel %vm2313_vm4, %v7535_v51, %v7539_v37  ;;  %v3406_v45 = vsel %vm2397_vm6, %v7559_v33, %v7561_v58  ;;  %vm3447_vm1 = vcmp.lt.s32.totalorder %v3443_v55, 16 }
 0x3cf   : > { %v3383_v59 = vadd.f32 %v3379_v30, %v3368_v41  ;;  %v2584_v16 = vsel %vm2581_vm10, %v7331_v63, %v7433_v40  ;;  %v3407_v41 = vsel %vm2397_vm6, %v7561_v58, %v7565_v62  ;;  %v3410_v10 = vsel %vm3389_vm7, %v3406_v45, 0.0 }
 0x3d0   : > { %v3813_v63 = vadd.s32 4294967290, %v3804_v20  ;;  %v3826_v7 = vadd.s32 4294967293, %v3804_v20  ;;  %v3843_v38 = vadd.s32 3, %v3804_v20  ;;  %v3855_v30 = vadd.s32 6, %v3804_v20 }
 0x3d1   : > { %v3463_v44 = vpop.permute.xlu0 %3462  ;;  %v3412_v6 = vadd.f32 %v3410_v10, %v3383_v59  ;;  %v2493_v10 = vsel %vm2489_vm2, %v7407_v15, %v7489_v26 }
 0x3d2   : > { %v7595_v9 = vpop.permute.xlu1 %3850  ;;  %vm3827_vm7 = vcmp.ge.s32.totalorder %v3826_v7, 0 }
 0x3d5   : > { %v3332_v4 = vpop.permute.xlu0 %3331 }
 0x3d6   : > { %v3361_v57 = vpop.permute.xlu1 %3360  ;;  %v3334_v14 = vsel %vm2161_vm5, %v7541_v42, %v3332_v4  ;;  %v2424_v42 = vadd.f32 %v2416_v60, %v2332_v18  ;;  %vm3448_vm5 = vcmp.lt.s32.totalorder %v3444_v35, 16  ;;  %v2433_v18 = vadd.s32 6, %v7410_v53 }
 0x3d7   : > { %v3363_v22 = vsel %vm2253_vm0, %v7533_v21, %v3361_v57  ;;  %v3338_v8 = vsel %vm3312_vm13, %v3334_v14, 0.0  ;;  %v2492_v21 = vsel %vm2489_vm2, %v7379_v11, %v7407_v15  ;;  %vm3857_vm13 = vcmp.lt.s32.totalorder %v3855_v30, 8 }
 0x3d8   : > { %v3340_v36 = vadd.f32 %v3338_v8, %v3306_v19  ;;  %v3367_v51 = vsel %vm3344_vm14, %v3363_v22, 0.0  ;;  %v2508_v39 = vsel %vm2448_vm15, %v2492_v21, 0.0  ;;  %vm3814_vm15 = vcmp.ge.s32.totalorder %v3813_v63, 0 }
 0x3d9   : > { %v3432_v4 = vpop.permute.xlu0 %3431  ;;  %v2516_v46 = vadd.f32 %v2508_v39, %v2424_v42  ;;  %v2201_v21 = vadd.s32 4294967293, %v7492_v28  ;;  %v2343_v42 = vadd.s32 3, %v7450_v2  ;;  %v2525_v63 = vadd.s32 9, %v7410_v53 }
 0x3da   : > { %v3378_v12 = vpop.permute.xlu1 %3377  ;;  %v3369_v33 = vadd.f32 %v3367_v51, %v3340_v36  ;;  %v3435_v19 = vsel %vm2489_vm2, %v7567_v52, %v3432_v4  ;;  %v3436_v58 = vsel %vm2489_vm2, %v3432_v4, %v7581_v24  ;;  %v2600_v52 = vsel %vm2540_vm3, %v2584_v16, 0.0 }
 0x3db   : > { %v3380_v11 = vsel %vm2313_vm4, %v7539_v37, %v3378_v12  ;;  %v3439_v48 = vsel %vm3418_vm8, %v3435_v19, 0.0  ;;  %v3411_v37 = vsel %vm3390_vm11, %v3407_v41, 0.0  ;;  %v3440_v60 = vsel %vm3419_vm9, %v3436_v58, 0.0 }
 0x3dc   : > { %v3384_v62 = vadd.f32 %v3380_v11, %v3369_v33  ;;  %v3441_v61 = vadd.f32 %v3439_v48, %v3412_v6  ;;  %v2608_v22 = vadd.f32 %v2600_v52, %v2516_v46  ;;  %vm3845_vm3 = vcmp.lt.s32.totalorder %v3843_v38, 8 }
 0x3dd   : > { %v3863_v43 = vpop.permute.xlu0 %3862  ;;  %vm2449_vm11 = vcmp.lt.s32.totalorder %v2433_v18, 32  ;;  %v3853_v19 = vsel %vm3845_vm3, %v7595_v9, 0.0  ;;  %vm2209_vm14 = vcmp.ge.s32.totalorder %v2201_v21, 0  ;;  %vm2359_vm8 = vcmp.lt.s32.totalorder %v2343_v42, 32 }
 0x3de   : > { %v3461_v31 = vpop.permute.xlu1 %3460  ;;  %v3413_v56 = vadd.f32 %v3411_v37, %v3384_v62  ;;  %v2618_v20 = vadd.f32 %v7455_v1, %v2608_v22  ;;  %v3865_v39 = vsel %vm3857_vm13, %v3863_v43, 0.0  ;;  %v2509_v62 = vsel %vm2449_vm11, %v2493_v10, 0.0 }
 0x3df   : > { %v3464_v54 = vsel %vm2581_vm10, %v7579_v3, %v3461_v31  ;;  %v3465_v57 = vsel %vm2581_vm10, %v3461_v31, %v3463_v44  ;;  %v2434_v52 = vadd.s32 6, %v7467_v49  ;;  %vm2541_vm9 = vcmp.lt.s32.totalorder %v2525_v63, 32 }
 0x3e0   : > { %v3468_v24 = vsel %vm3447_vm1, %v3464_v54, 0.0  ;;  %v3442_v14 = vadd.f32 %v3440_v60, %v3413_v56  ;;  %v3469_v8 = vsel %vm3448_vm5, %v3465_v57, 0.0  ;;  %v5093_v7 = vmul.f32 -1.442695, %v2618_v20 }
 0x3e1   : > { %v3470_v13 = vadd.f32 %v3468_v24, %v3441_v61  ;;  %v3822_v59 = vpop.permute.xlu0 %3821  ;;  %v2437_v42 = vadd.s32 6, %v7492_v28 }
 0x3e2   : > { %v3834_v45 = vpop.permute.xlu1 %3833  ;;  %v3471_v3 = vadd.f32 %v3469_v8, %v3442_v14  ;;  %v3824_v23 = vsel %vm3814_vm15, %v3822_v59, 0.0  ;;  %v2435_v14 = vadd.s32 6, %v7450_v2 }
 0x3e3   : > { %v3474_v44 = vadd.f32 %v3470_v13, %v7455_v1  ;;  %v3836_v36 = vsel %vm3827_vm7, %v3834_v45, 0.0  ;;  %v2345_v45 = vadd.s32 3, %v7492_v28  ;;  %vm2453_vm13 = vcmp.lt.s32.totalorder %v2437_v42, 32  ;;  %v3533_v42 = vld [vmem:[%s6420_s26 + $0x28] sm:$0xff] }
 0x3e4   : > { %v3837_v55 = vadd.f32 %v3836_v36, %v3824_v23  ;;  %v3475_v16 = vadd.f32 %v3471_v3, %v7455_v1  ;;  %vm2451_vm5 = vcmp.lt.s32.totalorder %v2435_v14, 32  ;;  %v2527_v3 = vadd.s32 9, %v7450_v2 }
 0x3e5   : > { %v5106_v51 = vmul.f32 -1.442695, %v3474_v44  ;;  %v3840_v35 = vpop.permute.xlu0 %3839  ;;  %vm2361_vm7 = vcmp.lt.s32.totalorder %v2345_v45, 32  ;;  %v3528_v45 = vld [vmem:[%s6420_s26] sm:$0xff] }
 0x3e6   : > { %v7655_v4 = vpop.permute.xlu1 %2307  ;;  %v5107_v12 = vmul.f32 -1.442695, %v3475_v16  ;;  %v3842_v41 = vadd.f32 %v3840_v35, %v3837_v55  ;;  %vm2543_vm11 = vcmp.lt.s32.totalorder %v2527_v3, 32 }
 0x3e7   : > { %5499 = vpow2.f32 %v5106_v51  ;;  %v2319_v33 = vsel %vm2313_vm4, %v7509_v25, %v7655_v4  ;;  %v2528_v51 = vadd.s32 9, %v7470_v32 }
 0x3e8   : > { %v2335_v11 = vadd.f32 %v2319_v33, %v7506_v50  ;;  %5501 = vpow2.f32 %v5107_v12  ;;  %v3854_v48 = vadd.f32 %v3853_v19, %v3842_v41 }
 0x3e9   : > { %v2252_v6 = vpop.permute.xlu0 %2251  ;;  %5503 = vpow2.f32 %v5093_v7 }
 0x3ea   : > { %v2392_v58 = vpop.permute.xlu1 %2391  ;;  %v3866_v25 = vadd.f32 %v3865_v39, %v3854_v48  ;;  %v2261_v9 = vsel %vm2253_vm0, %v7521_v29, %v2252_v6  ;;  %v2517_v29 = vadd.f32 %v2509_v62, %v7484_v27  ;;  %vm2450_vm0 = vcmp.lt.s32.totalorder %v2434_v52, 32 }
 0x3eb   : > { %v2403_v50 = vsel %vm2397_vm6, %v7511_v17, %v2392_v58  ;;  %v2277_v46 = vsel %vm2209_vm14, %v2261_v9, 0.0  ;;  %vm2544_vm14 = vcmp.lt.s32.totalorder %v2528_v51, 32  ;;  %v3529_v51 = vld [vmem:[%s6420_s26 + $0x8] sm:$0xff] }
 0x3ec   : > { %v2419_v15 = vsel %vm2359_vm8, %v2403_v50, 0.0  ;;  %v3881_v53 = vadd.f32 %v3866_v25, %v7455_v1  ;;  %v7675_v37 = vadd.f32 %v2277_v46, %v7530_v0  ;;  %v2526_v0 = vadd.s32 9, %v7467_v49 }
 0x3ed   : > { %v2427_v43 = vadd.f32 %v2419_v15, %v2335_v11  ;;  %v2482_v31 = vpop.permute.xlu0 %2481  ;;  %v2436_v49 = vadd.s32 6, %v7470_v32  ;;  %v2529_v46 = vadd.s32 9, %v7492_v28 }
 0x3ee   : > { %v2572_v61 = vpop.permute.xlu1 %2571  ;;  %v5112_v56 = vmul.f32 -1.442695, %v3881_v53  ;;  %v2494_v57 = vsel %vm2489_vm2, %v7489_v26, %v2482_v31  ;;  %vm2542_vm1 = vcmp.lt.s32.totalorder %v2526_v0, 32 }
 0x3ef   : > { %v2585_v17 = vsel %vm2581_vm10, %v7433_v40, %v2572_v61  ;;  %v2510_v22 = vsel %vm2450_vm0, %v2494_v57, 0.0  ;;  %v2344_v40 = vadd.s32 3, %v7470_v32  ;;  %vm2452_vm3 = vcmp.lt.s32.totalorder %v2436_v49, 32 }
 0x3f0   : > { %v2601_v54 = vsel %vm2541_vm9, %v2585_v17, 0.0  ;;  %5505 = vpow2.f32 %v5112_v56  ;;  %v2518_v23 = vadd.f32 %v2510_v22, %v7519_v34 }
 0x3f1   : > { %v2609_v60 = vadd.f32 %v2601_v54, %v2517_v29  ;;  %v2310_v24 = vpop.permute.xlu0 %2309  ;;  %vm2360_vm15 = vcmp.lt.s32.totalorder %v2344_v40, 32 }
 0x3f2   : > { %v2394_v38 = vpop.permute.xlu1 %2393  ;;  %v2320_v20 = vsel %vm2313_vm4, %v7655_v4, %v2310_v24 }
 0x3f3   : > { %v2619_v13 = vadd.f32 %v7455_v1, %v2609_v60  ;;  %v2404_v34 = vsel %vm2397_vm6, %v2392_v58, %v2394_v38  ;;  %v2336_v19 = vadd.f32 %v2320_v20, %v7528_v47  ;;  %v7715_v60 = vsub.s32 1, %v6456_v5  ;;  %v8325_v20 = vld [vmem:[#allocation48_spill] sm:$0xff] }
 0x3f4   : > { %v5500_v27 = vpop.eup %5499  ;;  %v2420_v48 = vsel %vm2360_vm15, %v2404_v34, 0.0 }
 0x3f5   : > { %v3482_v18 = vadd.f32 1.0, %v5500_v27  ;;  %v5094_v30 = vmul.f32 -1.442695, %v2619_v13  ;;  %v5502_v8 = vpop.eup %5501  ;;  %v2484_v59 = vpop.permute.xlu0 %2483  ;;  %v2428_v15 = vadd.f32 %v2420_v48, %v2336_v19  ;;  %v3501_v19 = vld [vmem:[%s6406_s24 + $0x8] sm:$0xff] }
 0x3f6   : > { %v2574_v26 = vpop.permute.xlu1 %2573  ;;  %v3483_v44 = vadd.f32 1.0, %v5502_v8  ;;  %v2495_v55 = vsel %vm2489_vm2, %v2482_v31, %v2484_v59  ;;  %v5504_v12 = vpop.eup %5503 }
 0x3f7   : > { %5507 = vrcp.f32 %v3482_v18  ;;  %v2586_v36 = vsel %vm2581_vm10, %v2572_v61, %v2574_v26  ;;  %v2511_v41 = vsel %vm2451_vm5, %v2495_v55, 0.0  ;;  %v2650_v10 = vadd.f32 1.0, %v5504_v12 }
 0x3f8   : > { %5509 = vpow2.f32 %v5094_v30  ;;  %v2602_v21 = vsel %vm2542_vm1, %v2586_v36, 0.0  ;;  %v2519_v63 = vadd.f32 %v2511_v41, %v2427_v43  ;;  %v3500_v36 = vld [vmem:[%s6406_s24] sm:$0xff] }
 0x3f9   : > { %5511 = vrcp.f32 %v3483_v44  ;;  %v2610_v16 = vadd.f32 %v2602_v21, %v2518_v23  ;;  %v2312_v2 = vpop.permute.xlu0 %2311  ;;  %v3502_v23 = vld [vmem:[%s6406_s24 + $0x10] sm:$0xff] }
 0x3fa   : > { %v2396_v35 = vpop.permute.xlu1 %2395  ;;  %v2321_v11 = vsel %vm2313_vm4, %v2310_v24, %v2312_v2  ;;  %vm2545_vm4 = vcmp.lt.s32.totalorder %v2529_v46, 32 }
 0x3fb   : > { %v2620_v33 = vadd.f32 %v7455_v1, %v2610_v16  ;;  %v2405_v7 = vsel %vm2397_vm6, %v2394_v38, %v2396_v35  ;;  %v2337_v47 = vadd.f32 %v2321_v11, %v7675_v37  ;;  %v3531_v16 = vld [vmem:[%s6420_s26 + $0x18] sm:$0xff]  ;;  %vm3888_vm6 = vcmask 517120  }
 0x3fc   : > { %v2421_v52 = vsel %vm2361_vm7, %v2405_v7, 0.0 }
 0x3fd   : > { %v5095_v32 = vmul.f32 -1.442695, %v2620_v33  ;;  %v5506_v4 = vpop.eup %5505  ;;  %v2486_v39 = vpop.permute.xlu0 %2485  ;;  %v2429_v54 = vadd.f32 %v2421_v52, %v2337_v47  ;;  %v3503_v33 = vld [vmem:[%s6406_s24 + $0x18] sm:$0xff] }
 0x3fe   : > { %v2576_v6 = vpop.permute.xlu1 %2575  ;;  %v3885_v58 = vadd.f32 1.0, %v5506_v4  ;;  %v2496_v25 = vsel %vm2489_vm2, %v2484_v59, %v2486_v39  ;;  %v3532_v59 = vld [vmem:[%s6420_s26 + $0x20] sm:$0xff] }
 0x3ff   : > { %5513 = vpow2.f32 %v5095_v32  ;;  %v2587_v9 = vsel %vm2581_vm10, %v2574_v26, %v2576_v6  ;;  %v2512_v50 = vsel %vm2452_vm3, %v2496_v25, 0.0  ;;  %v3530_v26 = vld [vmem:[%s6420_s26 + $0x10] sm:$0xff] }
 0x400   : > { %v2603_v62 = vsel %vm2543_vm11, %v2587_v9, 0.0  ;;  %5515 = vrcp.f32 %v3885_v58  ;;  %v2520_v61 = vadd.f32 %v2512_v50, %v2428_v15 }
 0x401   : > { %v2611_v53 = vadd.f32 %v2603_v62, %v2519_v63  ;;  %5517 = vrcp.f32 %v2650_v10  ;;  %v2488_v43 = vpop.permute.xlu0 %2487 }
 0x402   : > { %v2578_v31 = vpop.permute.xlu1 %2577  ;;  %v2497_v56 = vsel %vm2489_vm2, %v2486_v39, %v2488_v43  ;;  %v3928_v43 = vld [vmem:[%s6431_s14 + $0x28] sm:$0xff] }
 0x403   : > { %v2621_v29 = vadd.f32 %v7455_v1, %v2611_v53  ;;  %v2588_v37 = vsel %vm2581_vm10, %v2576_v6, %v2578_v31  ;;  %v2513_v57 = vsel %vm2453_vm13, %v2497_v56, 0.0  ;;  %v3925_v56 = vld [vmem:[%s6431_s14 + $0x10] sm:$0xff] }
 0x404   : > { %v5508_v17 = vpop.eup %5507  ;;  %v2604_v28 = vsel %vm2544_vm14, %v2588_v37, 0.0  ;;  %v2521_v22 = vadd.f32 %v2513_v57, %v2429_v54 }
 0x405   : > { %v5510_v0 = vpop.eup %5509  ;;  %v5096_v24 = vmul.f32 -1.442695, %v2621_v29  ;;  %v2612_v38 = vadd.f32 %v2604_v28, %v2520_v61  ;;  %v3504_v14 = vadd.f32 1.0, %v5508_v17  ;;  %v2580_v18 = vpop.permute.xlu0 %2579  ;;  %v3926_v29 = vld [vmem:[%s6431_s14 + $0x18] sm:$0xff] }
 0x406   : > { %v5512_v13 = vpop.eup %5511  ;;  %v2651_v27 = vadd.f32 1.0, %v5510_v0  ;;  %v2589_v8 = vsel %vm2581_vm10, %v2578_v31, %v2580_v18  ;;  %v3927_v31 = vld [vmem:[%s6431_s14 + $0x20] sm:$0xff]  ;;  %vm2797_vm10 = vcmask 7168  }
 0x407   : > { %v3490_v30 = vcombine.low %v5508_v17, %v5512_v13  ;;  %5519 = vpow2.f32 %v5096_v24  ;;  %v2622_v40 = vadd.f32 %v7455_v1, %v2612_v38  ;;  %v2605_v49 = vsel %vm2545_vm4, %v2589_v8, 0.0  ;;  %v3923_v18 = vld [vmem:[%s6431_s14] sm:$0xff]  ;;  %v8327_v8 = vld [vmem:[#allocation46_spill] sm:$0xff] }
 0x408   : > { %5521 = vrcp.f32 %v2651_v27  ;;  %v3505_v3 = vadd.f32 1.0, %v5512_v13  ;;  %v3537_v44 = vrot.slane %v3504_v14, %v7715_v60  ;;  %v2613_v21 = vadd.f32 %v2605_v49, %v2521_v22  ;;  %v7753_v27 = vld [vmem:[%s6431_s14 + $0x8] sm:$0xff] }
 0x409   : > { %5108 = vst.sshfl [vmem:[#allocation9] sm:$0x33 pattern:$0x76325410] %v3490_v30  ;;  %v5097_v55 = vmul.f32 -1.442695, %v2622_v40  ;;  %v3509_v2 = vrot.slane %v3504_v14, %v8325_v20 }
 0x40a   : > { %v3541_v35 = vrot.slane %v3505_v3, %v7715_v60  ;;  %v3546_v12 = vmul.f32 %v3537_v44, %v3532_v59  ;;  %v3544_v34 = vmul.f32 %v3537_v44, %v3530_v26  ;;  %v3542_v41 = vmul.f32 %v3537_v44, %v3528_v45  ;;  %v8326_v40 = vld [vmem:[#allocation45_spill] sm:$0xff]  ;;  %v8328_v59 = vld [vmem:[#allocation47_spill] sm:$0xff] }
 0x40b   : > { %5523 = vpow2.f32 %v5097_v55  ;;  %v2623_v32 = vadd.f32 %v7455_v1, %v2613_v21  ;;  %v3513_v11 = vrot.slane %v3505_v3, %v8325_v20  ;;  %v3516_v4 = vmul.f32 %v3509_v2, %v3502_v23  ;;  %v7764_v49 = vld [vmem:[%s6461_s2 + $0x10] sm:$0xff] }
 0x40c   : > { %v5514_v10 = vpop.eup %5513  ;;  %v3547_v48 = vmul.f32 %v3541_v35, %v3533_v42  ;;  %v3545_v63 = vmul.f32 %v3541_v35, %v3531_v16  ;;  %v3543_v7 = vmul.f32 %v3541_v35, %v3529_v51  ;;  %v3514_v39 = vmul.f32 %v3509_v2, %v3500_v36  ;;  %v3893_v2 = vld [vmem:[%s6427_s12 + $0x18] sm:$0xff]  ;;  %v7775_v35 = vld [vmem:[%s6461_s2 + $0x18] sm:$0xff] }
 0x40d   : > { %v2652_v6 = vadd.f32 1.0, %v5514_v10  ;;  %v5098_v58 = vmul.f32 -1.442695, %v2623_v32  ;;  %v3517_v25 = vmul.f32 %v3513_v11, %v3503_v33  ;;  %v3515_v9 = vmul.f32 %v3513_v11, %v3501_v19  ;;  %v5516_v47 = vpop.eup %5515 }
 0x40e   : > { %v7734_v50 = vadd.f32 %v3547_v48, %v3546_v12  ;;  %v7736_v1 = vadd.f32 %v3545_v63, %v3544_v34  ;;  %v7738_v62 = vadd.f32 %v3543_v7, %v3542_v41  ;;  %v5518_v46 = vpop.eup %5517  ;;  %v3894_v15 = vadd.f32 1.0, %v5516_v47  ;;  %3889 = vst.msk [vmem:[#allocation10] sm:$0x3] %vm3888_vm6, %v5516_v47  ;;  %v3892_v34 = vld [vmem:[%s6427_s12 + $0x10] sm:$0xff] }
 0x40f   : > { %5525 = vrcp.f32 %v2652_v6  ;;  %v7740_v52 = vadd.f32 %v3517_v25, %v3516_v4  ;;  %v7742_v53 = vadd.f32 %v3515_v9, %v3514_v39  ;;  %v2741_v37 = vadd.f32 1.0, %v5518_v46  ;;  %v8330_v4 = vld [vmem:[#allocation49_spill] sm:$0xff]  ;;  %v3891_v25 = vld [vmem:[%s6427_s12 + $0x8] sm:$0xff] }
 0x410   : > { %5527 = vpow2.f32 %v5098_v58  ;;  %v3932_v61 = vrot.slane %v3894_v15, %v7715_v60  ;;  %v8329_v26 = vcombine.low %v8327_v8, %v8328_v59  ;;  %v3898_v36 = vrot.slane %v3894_v15, %v8325_v20  ;;  %v3890_v9 = vld [vmem:[%s6427_s12] sm:$0xff]  ;;  %v7789_v47 = vld [vmem:[%s6461_s2 + $0x20] sm:$0xff] }
 0x411   : > { %v2758_v30 = vrot.slane %v2741_v37, %v8325_v20 }
 0x412   : > { %v3938_v17 = vmul.f32 %v3932_v61, %v3928_v43  ;;  %v3937_v54 = vmul.f32 %v3932_v61, %v3927_v31  ;;  %v3936_v28 = vmul.f32 %v3932_v61, %v3926_v29  ;;  %v3935_v13 = vmul.f32 %v3932_v61, %v3925_v56 }
 0x413   : > { %v7761_v45 = vrot.slane %v8329_v26, %v8326_v40  ;;  %v3934_v23 = vmul.f32 %v3932_v61, %v7753_v27  ;;  %v3933_v51 = vmul.f32 %v3932_v61, %v3923_v18  ;;  %v2781_v33 = vmul.f32 %v2758_v30, %v7764_v49  ;;  %v7805_v18 = vld [vmem:[%s6461_s2 + $0x30] sm:$0xff] }
 0x414   : > { %v5520_v57 = vpop.eup %5519  ;;  %v3954_v38 = vsel %vm3572_vm12, %v3938_v17, 0.0  ;;  %v3951_v14 = vsel %vm3572_vm12, %v3937_v54, 0.0  ;;  %v3948_v42 = vsel %vm3572_vm12, %v3936_v28, 0.0  ;;  %v3945_v16 = vsel %vm3572_vm12, %v3935_v13, 0.0 }
 0x415   : > { %v5522_v0 = vpop.eup %5521  ;;  %v2653_v24 = vadd.f32 1.0, %v5520_v57  ;;  %3955 = vadd.xlane.f32.xlu1 %v3954_v38  ;;  %3952 = vadd.xlane.f32.xlu0 %v3951_v14  ;;  %v3902_v32 = vmul.f32 %v3898_v36, %v3893_v2  ;;  %v2788_v10 = vadd.f32 %v8330_v4, %v2781_v33  ;;  %v3942_v63 = vsel %vm3572_vm12, %v3934_v23, 0.0  ;;  %v3979_v33 = vld [vmem:[#allocation24 + $0x50] sm:$0xff] }
 0x416   : > { %v2681_v22 = vcombine.low %v5518_v46, %v5522_v0  ;;  %v2742_v55 = vadd.f32 1.0, %v5522_v0  ;;  %v3939_v7 = vsel %vm3572_vm12, %v3933_v51, 0.0  ;;  %v3901_v39 = vmul.f32 %v3898_v36, %v3892_v34  ;;  %5273 = vmatprep.mubr.f32.mxu1 %v3979_v33  ;;  %v3981_v33 = vld [vmem:[#allocation24 + $0x60] sm:$0xff] }
 0x417   : > { %5529 = vrcp.f32 %v2653_v24  ;;  %v3912_v43 = vsel %vm3572_vm12, %v3902_v32, 0.0  ;;  %v3900_v61 = vmul.f32 %v3898_v36, %v3891_v25  ;;  %v3899_v29 = vmul.f32 %v3898_v36, %v3890_v9  ;;  %v7798_v24 = vld [vmem:[%s6461_s2 + $0x28] sm:$0xff]  ;;  %v7812_v36 = vld [vmem:[%s6461_s2 + $0x38] sm:$0xff] }
 0x418   : > { %v5524_v3 = vpop.eup %5523  ;;  %v7767_v44 = vrot.slane %v2681_v22, %v8326_v40  ;;  %v2762_v41 = vrot.slane %v2742_v55, %v8325_v20  ;;  %v3909_v31 = vsel %vm3572_vm12, %v3901_v39, 0.0 }
 0x419   : > { %v2654_v21 = vadd.f32 1.0, %v5524_v3  ;;  %3949 = vadd.xlane.f32.xlu0 %v3948_v42  ;;  %3946 = vadd.xlane.f32.xlu1 %v3945_v16  ;;  %v3906_v57 = vsel %vm3572_vm12, %v3900_v61, 0.0  ;;  %v3903_v28 = vsel %vm3572_vm12, %v3899_v29, 0.0 }
 0x41a   : > { %v2712_v12 = vcombine.low %v7761_v45, %v7767_v44  ;;  %v2782_v11 = vmul.f32 %v2762_v41, %v7775_v35  ;;  %v3969_v41 = vld [vmem:[#allocation24] sm:$0xff] }
 0x41b   : > { %5531 = vrcp.f32 %v2654_v21  ;;  %5258 = vmatprep.mubr.f32.mxu0 %v3969_v41  ;;  %v3971_v41 = vld [vmem:[#allocation24 + $0x10] sm:$0xff] }
 0x41c   : > { %v5526_v19 = vpop.eup %5525  ;;  %v2789_v46 = vadd.f32 %v2788_v10, %v2782_v11 }
 0x41d   : > { %v5528_v48 = vpop.eup %5527  ;;  %v2743_v6 = vadd.f32 1.0, %v5526_v19  ;;  %3943 = vadd.xlane.f32.xlu0 %v3942_v63  ;;  %3940 = vadd.xlane.f32.xlu1 %v3939_v7 }
 0x41e   : > { %v2655_v58 = vadd.f32 1.0, %v5528_v48 }
 0x41f   : > { %v2766_v15 = vrot.slane %v2743_v6, %v8325_v20 }
 0x420   : > { %5533 = vrcp.f32 %v2655_v58 }
 0x421   : > { %v2783_v56 = vmul.f32 %v2766_v15, %v7789_v47  ;;  %3913 = vadd.xlane.f32.xlu0 %v3912_v43  ;;  %3910 = vadd.xlane.f32.xlu1 %v3909_v31 }
 0x423   : > { %v2790_v37 = vadd.f32 %v2789_v46, %v2783_v56 }
 0x424   : > { %v5530_v17 = vpop.eup %5529 }
 0x425   : > { %v2682_v54 = vcombine.low %v5526_v19, %v5530_v17  ;;  %v2744_v0 = vadd.f32 1.0, %v5530_v17  ;;  %3907 = vadd.xlane.f32.xlu0 %v3906_v57  ;;  %3904 = vadd.xlane.f32.xlu1 %v3903_v28 }
 0x427   : > { %v2770_v38 = vrot.slane %v2744_v0, %v8325_v20 }
 0x428   : > { %v5532_v14 = vpop.eup %5531 }
 0x429   : > { %v2745_v13 = vadd.f32 1.0, %v5532_v14  ;;  %v2784_v22 = vmul.f32 %v2770_v38, %v7798_v24  ;;  %3555 = vadd.xlane.f32.xlu0 %v7734_v50  ;;  %3552 = vadd.xlane.f32.xlu1 %v7736_v1  ;;  %v2704_v50 = vrot.slane %v2682_v54, %v8326_v40 }
 0x42b   : > { %v2774_v30 = vrot.slane %v2745_v13, %v8325_v20  ;;  %v2791_v8 = vadd.f32 %v2790_v37, %v2784_v22 }
 0x42d   : > { %v5534_v59 = vpop.eup %5533  ;;  %v2785_v26 = vmul.f32 %v2774_v30, %v7805_v18  ;;  %3549 = vadd.xlane.f32.xlu0 %v7738_v62  ;;  %3522 = vadd.xlane.f32.xlu1 %v7740_v52  ;;  %v2720_v62 = vrot.slane %v2712_v12, %v8326_v40 }
 0x42e   : > { %v2683_v3 = vcombine.low %v5532_v14, %v5534_v59  ;;  %v2746_v23 = vadd.f32 1.0, %v5534_v59 }
 0x42f   : > { %v2792_v55 = vadd.f32 %v2791_v8, %v2785_v26 }
 0x430   : > { %v2711_v1 = vrot.slane %v2683_v3, %v8326_v40  ;;  %v2778_v21 = vrot.slane %v2746_v23, %v8325_v20 }
 0x431   : > { %3519 = vadd.xlane.f32.xlu0 %v7742_v53 }
 0x432   : > { %v2713_v42 = vcombine.low %v2704_v50, %v2711_v1  ;;  %v2786_v16 = vmul.f32 %v2778_v21, %v7812_v36 }
 0x434   : > { %v2727_v52 = vrot.slane %v2713_v42, %v8326_v40  ;;  %v2793_v51 = vadd.f32 %v2792_v55, %v2786_v16 }
 0x436   : > { %v7824_v2 = vcombine.low %v2720_v62, %v2727_v52  ;;  %2794 = vadd.xlane.f32.xlu1 %v2793_v51  ;;  %v3970_v52 = vld [vmem:[#allocation24 + $0x8] sm:$0xff]  ;;  %v3980_v51 = vld [vmem:[#allocation24 + $0x58] sm:$0xff] }
 0x438   : > { %v4276_v34 = vrot.slane %v7824_v2, %v7715_v60 }
 0x49e   : > { %v3953_v53 = vpop.xlane.xlu0 %3952  ;;  %v3956_v19 = vpop.xlane.xlu1 %3955 }
 0x49f   : > { %v3961_v32 = vmul.f32 0.015625, %v3953_v53  ;;  %v3962_v11 = vmul.f32 0.015625, %v3956_v19  ;;  %v3972_v53 = vld [vmem:[#allocation24 + $0x18] sm:$0xff]  ;;  %v3982_v19 = vld [vmem:[#allocation24 + $0x68] sm:$0xff] }
 0x4a1   : > { %3967 = vst.msk [vmem:[#allocation11 + $0x70] sm:$0xff] %vm2797_vm10, %v3961_v32  ;;  %3968 = vst.msk [vmem:[#allocation11 + $0x78] sm:$0xff] %vm2797_vm10, %v3962_v11  ;;  %v3973_v32 = vld [vmem:[#allocation24 + $0x20] sm:$0xff]  ;;  %v3983_v11 = vld [vmem:[#allocation24 + $0x70] sm:$0xff] }
 0x4a2   : > { %v3950_v40 = vpop.xlane.xlu0 %3949  ;;  %v3947_v45 = vpop.xlane.xlu1 %3946 }
 0x4a3   : > { %v3960_v44 = vmul.f32 0.015625, %v3950_v40  ;;  %v3959_v12 = vmul.f32 0.015625, %v3947_v45  ;;  %v3974_v40 = vld [vmem:[#allocation24 + $0x28] sm:$0xff]  ;;  %v3984_v45 = vld [vmem:[#allocation24 + $0x78] sm:$0xff] }
 0x4a5   : > { %3966 = vst.msk [vmem:[#allocation11 + $0x68] sm:$0xff] %vm2797_vm10, %v3960_v44  ;;  %3965 = vst.msk [vmem:[#allocation11 + $0x60] sm:$0xff] %vm2797_vm10, %v3959_v12  ;;  %v3975_v44 = vld [vmem:[#allocation24 + $0x30] sm:$0xff]  ;;  %v3976_v12 = vld [vmem:[#allocation24 + $0x38] sm:$0xff] }
 0x4a6   : > { %v3944_v4 = vpop.xlane.xlu0 %3943  ;;  %v3941_v10 = vpop.xlane.xlu1 %3940 }
 0x4a7   : > { %v3958_v48 = vmul.f32 0.015625, %v3944_v4  ;;  %v3957_v63 = vmul.f32 0.015625, %v3941_v10  ;;  %v3977_v4 = vld [vmem:[#allocation24 + $0x40] sm:$0xff]  ;;  %v3978_v10 = vld [vmem:[#allocation24 + $0x48] sm:$0xff] }
 0x4a8   : > { %v4000_v7 = vld [vmem:[#allocation11 + $0x78] sm:$0xff]  ;;  %v3999_v58 = vld [vmem:[#allocation11 + $0x70] sm:$0xff] }
 0x4a9   : > { %3964 = vst.msk [vmem:[#allocation11 + $0x58] sm:$0xff] %vm2797_vm10, %v3958_v48  ;;  %3963 = vst.msk [vmem:[#allocation11 + $0x50] sm:$0xff] %vm2797_vm10, %v3957_v63  ;;  %5226 = vmatprep.subr.mxu0 %v4000_v7  ;;  %5282 = vmatprep.subr.mxu1 %v4000_v7  ;;  %v6024_v48 = vmov 0   ;;  %v4002_v63 = vld [vmem:[%s8229_s9 + $0x8] sm:$0xff] }
 0x4aa   : > { %v3914_v39 = vpop.xlane.xlu0 %3913  ;;  %5227 = vmatpush3.msra.mxu0 %v4000_v7  ;;  %5298 = vmatpush3.msra.mxu1 %v4000_v7  ;;  %v3911_v6 = vpop.xlane.xlu1 %3910  ;;  %v4012_v7 = vld [vmem:[%s8229_s9 + $0x58] sm:$0xff] }
 0x4ab   : > { %v3918_v25 = vmul.f32 0.015625, %v3914_v39  ;;  %v3917_v9 = vmul.f32 0.015625, %v3911_v6  ;;  %5228 = vmatprep.subr.mxu0 %v3999_v58  ;;  %5283 = vmatprep.subr.mxu1 %v3999_v58 }
 0x4ac   : > { %5229 = vmatpush3.msra.mxu0 %v3999_v58  ;;  %5299 = vmatpush3.msra.mxu1 %v3999_v58  ;;  %v3998_v46 = vld [vmem:[#allocation11 + $0x68] sm:$0xff]  ;;  %v3997_v31 = vld [vmem:[#allocation11 + $0x60] sm:$0xff] }
 0x4ad   : > { %3922 = vst.msk [vmem:[#allocation11 + $0x48] sm:$0xff] %vm2797_vm10, %v3918_v25  ;;  %3921 = vst.msk [vmem:[#allocation11 + $0x40] sm:$0xff] %vm2797_vm10, %v3917_v9  ;;  %5230 = vmatprep.subr.mxu0 %v3998_v46  ;;  %5284 = vmatprep.subr.mxu1 %v3998_v46  ;;  %v4001_v58 = vld [vmem:[%s8229_s9] sm:$0xff] }
 0x4ae   : > { %v3908_v15 = vpop.xlane.xlu0 %3907  ;;  %5231 = vmatpush3.msra.mxu0 %v3998_v46  ;;  %5300 = vmatpush3.msra.mxu1 %v3998_v46  ;;  %v3905_v43 = vpop.xlane.xlu1 %3904 }
 0x4af   : > { %v3916_v61 = vmul.f32 0.015625, %v3908_v15  ;;  %v3915_v29 = vmul.f32 0.015625, %v3905_v43  ;;  %5232 = vmatprep.subr.mxu0 %v3997_v31  ;;  %5285 = vmatprep.subr.mxu1 %v3997_v31  ;;  %v4011_v43 = vld [vmem:[%s8229_s9 + $0x50] sm:$0xff] }
 0x4b0   : > { %5233 = vmatpush3.msra.mxu0 %v3997_v31  ;;  %5301 = vmatpush3.msra.mxu1 %v3997_v31  ;;  %v3996_v56 = vld [vmem:[#allocation11 + $0x58] sm:$0xff]  ;;  %v3995_v54 = vld [vmem:[#allocation11 + $0x50] sm:$0xff]  ;;  %v4004_v31 = vld [vmem:[%s8229_s9 + $0x18] sm:$0xff] }
 0x4b1   : > { %3920 = vst.msk [vmem:[#allocation11 + $0x38] sm:$0xff] %vm2797_vm10, %v3916_v61  ;;  %3919 = vst.msk [vmem:[#allocation11 + $0x30] sm:$0xff] %vm2797_vm10, %v3915_v29  ;;  %5234 = vmatprep.subr.mxu0 %v3996_v56  ;;  %5286 = vmatprep.subr.mxu1 %v3996_v56 }
 0x4b2   : > { %v3556_v37 = vpop.xlane.xlu0 %3555  ;;  %5235 = vmatpush3.msra.mxu0 %v3996_v56  ;;  %5302 = vmatpush3.msra.mxu1 %v3996_v56  ;;  %v3553_v17 = vpop.xlane.xlu1 %3552 }
 0x4b3   : > { %v3559_v57 = vmul.f32 0.00390625, %v3556_v37  ;;  %v3558_v28 = vmul.f32 0.00390625, %v3553_v17  ;;  %5236 = vmatprep.subr.mxu0 %v3995_v54  ;;  %5287 = vmatprep.subr.mxu1 %v3995_v54 }
 0x4b4   : > { %5237 = vmatpush3.msra.mxu0 %v3995_v54  ;;  %5303 = vmatpush3.msra.mxu1 %v3995_v54  ;;  %v3994_v0 = vld [vmem:[#allocation11 + $0x48] sm:$0xff]  ;;  %v3993_v13 = vld [vmem:[#allocation11 + $0x40] sm:$0xff] }
 0x4b5   : > { %3562 = vst.msk [vmem:[#allocation11 + $0x28] sm:$0xff] %vm2797_vm10, %v3559_v57  ;;  %3561 = vst.msk [vmem:[#allocation11 + $0x20] sm:$0xff] %vm2797_vm10, %v3558_v28  ;;  %5238 = vmatprep.subr.mxu0 %v3994_v0  ;;  %5288 = vmatprep.subr.mxu1 %v3994_v0  ;;  %v4014_v28 = vld [vmem:[%s8229_s9 + $0x68] sm:$0xff] }
 0x4b6   : > { %v3550_v38 = vpop.xlane.xlu0 %3549  ;;  %5239 = vmatpush3.msra.mxu0 %v3994_v0  ;;  %5304 = vmatpush3.msra.mxu1 %v3994_v0  ;;  %v3523_v14 = vpop.xlane.xlu1 %3522 }
 0x4b7   : > { %v3557_v22 = vmul.f32 0.00390625, %v3550_v38  ;;  %v3525_v30 = vmul.f32 0.00390625, %v3523_v14  ;;  %5240 = vmatprep.subr.mxu0 %v3993_v13  ;;  %5289 = vmatprep.subr.mxu1 %v3993_v13 }
 0x4b8   : > { %5241 = vmatpush3.msra.mxu0 %v3993_v13  ;;  %5305 = vmatpush3.msra.mxu1 %v3993_v13  ;;  %v3992_v8 = vld [vmem:[#allocation11 + $0x38] sm:$0xff]  ;;  %v3991_v26 = vld [vmem:[#allocation11 + $0x30] sm:$0xff] }
 0x4b9   : > { %3560 = vst.msk [vmem:[#allocation11 + $0x18] sm:$0xff] %vm2797_vm10, %v3557_v22  ;;  %3527 = vst.msk [vmem:[#allocation11 + $0x10] sm:$0xff] %vm2797_vm10, %v3525_v30  ;;  %5242 = vmatprep.subr.mxu0 %v3992_v8  ;;  %5290 = vmatprep.subr.mxu1 %v3992_v8  ;;  %v4003_v30 = vld [vmem:[%s8229_s9 + $0x10] sm:$0xff] }
 0x4ba   : > { %v3520_v59 = vpop.xlane.xlu0 %3519  ;;  %5243 = vmatpush3.msra.mxu0 %v3992_v8  ;;  %5306 = vmatpush3.msra.mxu1 %v3992_v8 }
 0x4bb   : > { %v3524_v3 = vmul.f32 0.00390625, %v3520_v59  ;;  %5244 = vmatprep.subr.mxu0 %v3991_v26  ;;  %5291 = vmatprep.subr.mxu1 %v3991_v26 }
 0x4bc   : > { %5245 = vmatpush3.msra.mxu0 %v3991_v26  ;;  %5307 = vmatpush3.msra.mxu1 %v3991_v26  ;;  %v3990_v23 = vld [vmem:[#allocation11 + $0x28] sm:$0xff]  ;;  %v3989_v50 = vld [vmem:[#allocation11 + $0x20] sm:$0xff] }
 0x4bd   : > { %3526 = vst.msk [vmem:[#allocation11 + $0x8] sm:$0xff] %vm2797_vm10, %v3524_v3  ;;  %5246 = vmatprep.subr.mxu0 %v3990_v23  ;;  %5292 = vmatprep.subr.mxu1 %v3990_v23  ;;  %v4006_v3 = vld [vmem:[%s8229_s9 + $0x28] sm:$0xff] }
 0x4be   : > { %5247 = vmatpush3.msra.mxu0 %v3990_v23  ;;  %5308 = vmatpush3.msra.mxu1 %v3990_v23 }
 0x4bf   : > { %v2795_v55 = vpop.xlane.xlu1 %2794  ;;  %5248 = vmatprep.subr.mxu0 %v3989_v50  ;;  %5293 = vmatprep.subr.mxu1 %v3989_v50 }
 0x4c0   : > { %v2796_v1 = vmul.f32 0.0009765625, %v2795_v55  ;;  %5249 = vmatpush3.msra.mxu0 %v3989_v50  ;;  %5309 = vmatpush3.msra.mxu1 %v3989_v50  ;;  %v3988_v21 = vld [vmem:[#allocation11 + $0x18] sm:$0xff]  ;;  %v3987_v42 = vld [vmem:[#allocation11 + $0x10] sm:$0xff]  ;;  %v4016_v55 = vld [vmem:[%s8229_s9 + $0x78] sm:$0xff] }
 0x4c1   : > { %5250 = vmatprep.subr.mxu0 %v3988_v21  ;;  %5294 = vmatprep.subr.mxu1 %v3988_v21 }
 0x4c2   : > { %2798 = vst.msk [vmem:[#allocation11] sm:$0xff] %vm2797_vm10, %v2796_v1  ;;  %5251 = vmatpush3.msra.mxu0 %v3988_v21  ;;  %5310 = vmatpush3.msra.mxu1 %v3988_v21 }
 0x4c3   : > { %5252 = vmatprep.subr.mxu0 %v3987_v42  ;;  %5295 = vmatprep.subr.mxu1 %v3987_v42 }
 0x4c4   : > { %5253 = vmatpush3.msra.mxu0 %v3987_v42  ;;  %5311 = vmatpush3.msra.mxu1 %v3987_v42  ;;  %v3986_v16 = vld [vmem:[#allocation11 + $0x8] sm:$0xff] }
 0x4c5   : > { %5254 = vmatprep.subr.mxu0 %v3986_v16  ;;  %5296 = vmatprep.subr.mxu1 %v3986_v16 }
 0x4c6   : > { %5255 = vmatpush3.msra.mxu0 %v3986_v16  ;;  %5312 = vmatpush3.msra.mxu1 %v3986_v16 }
 0x4c7   : > { %5464 = vset.pattern.permute.xlu0 %v6024_v48  ;;  %5463 = vset.pattern.permute.xlu1 %v6024_v48 }
 0x4c9   : > { %v3985_v62 = vld [vmem:[#allocation11] sm:$0xff] }
 0x4ca   : > { %5256 = vmatprep.subr.mxu0 %v3985_v62  ;;  %5297 = vmatprep.subr.mxu1 %v3985_v62 }
 0x4cb   : > { %5257 = vmatpush3.msra.mxu0 %v3985_v62  ;;  %5313 = vmatpush3.msra.mxu1 %v3985_v62 }
 0x4cc   : > { %5259 = vmatmul.mubr.f32.vlgmr.msra.gmra.mxu0 %v3970_v52  ;;  %5274 = vmatmul.mubr.f32.vlgmr.msra.gmra.mxu1 %v3980_v51  ;;  %v4013_v52 = vld [vmem:[%s8229_s9 + $0x60] sm:$0xff] }
 0x4cd   : > { %5261 = vmatprep.mubr.f32.mxu0 %v3971_v41  ;;  %5276 = vmatprep.mubr.f32.mxu1 %v3981_v33 }
 0x4d0   : > { %5262 = vmatmul.mubr.f32.gmra.mxu0 %v3972_v53  ;;  %5277 = vmatmul.mubr.f32.gmra.mxu1 %v3982_v19 }
 0x4d1   : > { %5264 = vmatprep.mubr.f32.mxu0 %v3973_v32  ;;  %5279 = vmatprep.mubr.f32.mxu1 %v3983_v11  ;;  %v4008_v11 = vld [vmem:[%s8229_s9 + $0x38] sm:$0xff] }
 0x4d4   : > { %5265 = vmatmul.mubr.f32.gmra.mxu0 %v3974_v40  ;;  %5280 = vmatmul.mubr.f32.gmra.mxu1 %v3984_v45 }
 0x4d5   : > { %5267 = vmatprep.mubr.f32.mxu0 %v3975_v44 }
 0x4d8   : > { %5268 = vmatmul.mubr.f32.gmra.mxu0 %v3976_v12 }
 0x4d9   : > { %5270 = vmatprep.mubr.f32.mxu0 %v3977_v4 }
 0x4dc   : > { %5271 = vmatmul.mubr.f32.gmra.mxu0 %v3978_v10 }
 0x58c   : > { %v5260_v39 = vpop.f32.mrf.mxu0  ;;  %v5275_v6 = vpop.f32.mrf.mxu1 }
 0x58d   : > { %v4089_v25 = vadd.f32 %v5260_v39, %v4002_v63  ;;  %v4139_v9 = vadd.f32 %v5275_v6, %v4012_v7 }
 0x58e   : > { %v4083_v46 = vpop.f32.mrf.mxu0  ;;  %v4133_v15 = vpop.f32.mrf.mxu1 }
 0x58f   : > { %v5114_v61 = vmul.f32 -1.442695, %v4089_v25  ;;  %v5124_v29 = vmul.f32 -1.442695, %v4139_v9  ;;  %v4084_v56 = vadd.f32 %v4083_v46, %v4001_v58  ;;  %v4134_v54 = vadd.f32 %v4133_v15, %v4011_v43  ;;  %v4010_v25 = vld [vmem:[%s8229_s9 + $0x48] sm:$0xff]  ;;  %v4005_v46 = vld [vmem:[%s8229_s9 + $0x20] sm:$0xff] }
 0x590   : > { %v5263_v37 = vpop.f32.mrf.mxu0  ;;  %v5278_v0 = vpop.f32.mrf.mxu1 }
 0x591   : > { %5535 = vpow2.f32 %v5114_v61  ;;  %v5113_v17 = vmul.f32 -1.442695, %v4084_v56  ;;  %v4099_v57 = vadd.f32 %v5263_v37, %v4004_v31  ;;  %v4149_v14 = vadd.f32 %v5278_v0, %v4014_v28 }
 0x592   : > { %5537 = vpow2.f32 %v5124_v29  ;;  %v5123_v13 = vmul.f32 -1.442695, %v4134_v54  ;;  %v4093_v22 = vpop.f32.mrf.mxu0  ;;  %v4143_v8 = vpop.f32.mrf.mxu1 }
 0x593   : > { %5539 = vpow2.f32 %v5113_v17  ;;  %v5116_v38 = vmul.f32 -1.442695, %v4099_v57  ;;  %v5126_v59 = vmul.f32 -1.442695, %v4149_v14  ;;  %v4094_v26 = vadd.f32 %v4093_v22, %v4003_v30 }
 0x594   : > { %v5266_v23 = vpop.f32.mrf.mxu0  ;;  %v5281_v50 = vpop.f32.mrf.mxu1  ;;  %v4144_v44 = vadd.f32 %v4143_v8, %v4013_v52 }
 0x595   : > { %5541 = vpow2.f32 %v5116_v38  ;;  %v4109_v1 = vadd.f32 %v5266_v23, %v4006_v3  ;;  %v5115_v21 = vmul.f32 -1.442695, %v4094_v26  ;;  %v4159_v42 = vadd.f32 %v5281_v50, %v4016_v55  ;;  %v4015_v38 = vld [vmem:[%s8229_s9 + $0x70] sm:$0xff] }
 0x596   : > { %5543 = vpow2.f32 %v5123_v13  ;;  %v4103_v16 = vpop.f32.mrf.mxu0  ;;  %v5125_v10 = vmul.f32 -1.442695, %v4144_v44  ;;  %v4153_v0 = vpop.f32.mrf.mxu1 }
 0x597   : > { %5545 = vpow2.f32 %v5126_v59  ;;  %v5118_v33 = vmul.f32 -1.442695, %v4109_v1  ;;  %v5128_v32 = vmul.f32 -1.442695, %v4159_v42  ;;  %v4104_v29 = vadd.f32 %v4103_v16, %v4005_v46  ;;  %v4007_v42 = vld [vmem:[%s8229_s9 + $0x30] sm:$0xff] }
 0x598   : > { %5547 = vpow2.f32 %v5115_v21  ;;  %v5269_v40 = vpop.f32.mrf.mxu0  ;;  %v4154_v8 = vadd.f32 %v4153_v0, %v4015_v38 }
 0x599   : > { %v4119_v12 = vadd.f32 %v5269_v40, %v4008_v11  ;;  %v5117_v13 = vmul.f32 -1.442695, %v4104_v29  ;;  %v4009_v11 = vld [vmem:[%s8229_s9 + $0x40] sm:$0xff] }
 0x59a   : > { %v4113_v48 = vpop.f32.mrf.mxu0  ;;  %v5127_v55 = vmul.f32 -1.442695, %v4154_v8 }
 0x59b   : > { %v5120_v7 = vmul.f32 -1.442695, %v4119_v12  ;;  %v4114_v52 = vadd.f32 %v4113_v48, %v4007_v42  ;;  %v4295_v42 = vsub.s32 6, %v6456_v5 }
 0x59c   : > { %v5272_v9 = vpop.f32.mrf.mxu0 }
 0x59d   : > { %v4129_v43 = vadd.f32 %v5272_v9, %v4010_v25 }
 0x59e   : > { %v5536_v62 = vpop.eup %5535 }
 0x59f   : > { %v5538_v51 = vpop.eup %5537  ;;  %v4211_v41 = vadd.f32 1.0, %v5536_v62  ;;  %v5122_v54 = vmul.f32 -1.442695, %v4129_v43 }
 0x5a0   : > { %v5540_v53 = vpop.eup %5539  ;;  %v4221_v19 = vadd.f32 1.0, %v5538_v51 }
 0x5a1   : > { %5549 = vrcp.f32 %v4211_v41  ;;  %v4210_v45 = vadd.f32 1.0, %v5540_v53  ;;  %v5119_v53 = vmul.f32 -1.442695, %v4114_v52 }
 0x5a2   : > { %5551 = vrcp.f32 %v4221_v19  ;;  %v5542_v4 = vpop.eup %5541 }
 0x5a3   : > { %5553 = vpow2.f32 %v5118_v33  ;;  %v5544_v63 = vpop.eup %5543  ;;  %v4213_v39 = vadd.f32 1.0, %v5542_v4 }
 0x5a4   : > { %5555 = vpow2.f32 %v5128_v32  ;;  %v5546_v6 = vpop.eup %5545  ;;  %v4220_v58 = vadd.f32 1.0, %v5544_v63  ;;  %v4123_v32 = vpop.f32.mrf.mxu0 }
 0x5a5   : > { %5557 = vrcp.f32 %v4210_v45  ;;  %v4223_v15 = vadd.f32 1.0, %v5546_v6  ;;  %v5548_v31 = vpop.eup %5547 }
 0x5a6   : > { %5559 = vpow2.f32 %v5125_v10  ;;  %v4212_v28 = vadd.f32 1.0, %v5548_v31  ;;  %v4124_v10 = vadd.f32 %v4123_v32, %v4009_v11 }
 0x5a7   : > { %5561 = vpow2.f32 %v5120_v7 }
 0x5a8   : > { %5563 = vrcp.f32 %v4213_v39  ;;  %v5121_v39 = vmul.f32 -1.442695, %v4124_v10 }
 0x5a9   : > { %5565 = vrcp.f32 %v4220_v58 }
 0x5aa   : > { %5567 = vrcp.f32 %v4223_v15 }
 0x5ab   : > { %5569 = vpow2.f32 %v5122_v54 }
 0x5ac   : > { %5571 = vrcp.f32 %v4212_v28 }
 0x5ad   : > { %5573 = vpow2.f32 %v5117_v13 }
 0x5ae   : > { %v5550_v61 = vpop.eup %5549 }
 0x5af   : > { %v5552_v56 = vpop.eup %5551  ;;  %4385 = vperm.xlu1 %5463, %v5550_v61   ;;  %v4356_v59 = vadd.f32 1.0, %v5550_v61 }
 0x5b0   : > { %v5554_v37 = vpop.eup %5553  ;;  %4610 = vperm.xlu0 %5464, %v5552_v56   ;;  %v4558_v17 = vadd.f32 1.0, %v5552_v56 }
 0x5b1   : > { %v5556_v57 = vpop.eup %5555  ;;  %v4215_v22 = vadd.f32 1.0, %v5554_v37 }
 0x5b2   : > { %v5558_v14 = vpop.eup %5557  ;;  %v4225_v30 = vadd.f32 1.0, %v5556_v57 }
 0x5b3   : > { %4324 = vperm.xlu1 %5463, %v5558_v14   ;;  %v5560_v26 = vpop.eup %5559  ;;  %v4267_v3 = vadd.f32 1.0, %v5558_v14  ;;  %5575 = vrcp.f32 %v4215_v22 }
 0x5b4   : > { %4574 = vperm.xlu0 %5464, %v4558_v17   ;;  %v5562_v23 = vpop.eup %5561  ;;  %5577 = vrcp.f32 %v4225_v30  ;;  %v4222_v1 = vadd.f32 1.0, %v5560_v26 }
 0x5b5   : > { %v5564_v50 = vpop.eup %5563  ;;  %v4217_v16 = vadd.f32 1.0, %v5562_v23  ;;  %5579 = vpow2.f32 %v5127_v55  ;;  %v4283_v23 = vsub.s32 3, %v6456_v5  ;;  %v4287_v55 = vsub.s32 4, %v6456_v5 }
 0x5b6   : > { %v5566_v21 = vpop.eup %5565  ;;  %5581 = vrcp.f32 %v4222_v1  ;;  %v4413_v4 = vadd.f32 1.0, %v5564_v50  ;;  %v7896_v1 = vld [vmem:[#allocation10 + $0x1] ss:$0 sm:$0xff] }
 0x5b7   : > { %4371 = vperm.xlu1 %5463, %v4356_v59   ;;  %v5568_v62 = vpop.eup %5567  ;;  %v4557_v51 = vadd.f32 1.0, %v5566_v21  ;;  %5583 = vrcp.f32 %v4217_v16  ;;  %v4279_v59 = vsub.s32 2, %v6456_v5  ;;  %v4299_v16 = vsub.s32 7, %v6456_v5 }
 0x5b8   : > { %4311 = vperm.xlu0 %5464, %v4267_v3   ;;  %v4560_v41 = vadd.f32 1.0, %v5568_v62  ;;  %v5570_v33 = vpop.eup %5569  ;;  %5585 = vpow2.f32 %v5119_v53  ;;  %v4351_v3 = vld [vmem:[#allocation9] ss:$2 sm:$0x3]  ;;  %v4284_v32 = vrot.slane %v7824_v2, %v4283_v23 }
 0x5b9   : > { %v5572_v19 = vpop.eup %5571  ;;  %v4219_v44 = vadd.f32 1.0, %v5570_v33  ;;  %v7902_v52 = vrot.slane %v4351_v3, %v8325_v20  ;;  %v4280_v33 = vrot.slane %v7824_v2, %v4279_v59 }
 0x5ba   : > { %v5574_v40 = vpop.eup %5573  ;;  %v4357_v9 = vadd.f32 1.0, %v5572_v19 }
 0x5bb   : > { %4605 = vperm.xlu1 %5463, %v5566_v21   ;;  %v4214_v48 = vadd.f32 1.0, %v5574_v40  ;;  %5587 = vrcp.f32 %v4219_v44  ;;  %v4296_v44 = vrot.slane %v7824_v2, %v4295_v42 }
 0x5bc   : > { %4450 = vperm.xlu0 %5464, %v5564_v50   ;;  %v4291_v50 = vsub.s32 5, %v6456_v5  ;;  %v4288_v5 = vrot.slane %v7824_v2, %v4287_v55 }
 0x5bd   : > { %5589 = vrcp.f32 %v4214_v48 }
 0x5be   : > { %5591 = vpow2.f32 %v5121_v39  ;;  %v4292_v11 = vrot.slane %v7824_v2, %v4291_v50 }
 0x5bf   : > { %4569 = vperm.xlu1 %5463, %v4557_v51   ;;  %v7905_v51 = vrot.slane %v4351_v3, %v7715_v60 }
 0x5c0   : > { %4620 = vperm.xlu0 %5464, %v5568_v62   ;;  %v5576_v45 = vpop.eup %5575 }
 0x5c1   : > { %v5578_v12 = vpop.eup %5577  ;;  %v4415_v31 = vadd.f32 1.0, %v5576_v45 }
 0x5c2   : > { %v4562_v63 = vadd.f32 1.0, %v5578_v12  ;;  %v5580_v7 = vpop.eup %5579 }
 0x5c3   : > { %4390 = vperm.xlu1 %5463, %v5572_v19   ;;  %v5582_v6 = vpop.eup %5581  ;;  %v4224_v25 = vadd.f32 1.0, %v5580_v7 }
 0x5c4   : > { %4584 = vperm.xlu0 %5464, %v4560_v41   ;;  %v5584_v58 = vpop.eup %5583  ;;  %v4559_v15 = vadd.f32 1.0, %v5582_v6  ;;  %v4272_v41 = vrot.slane %v7824_v2, %v8325_v20 }
 0x5c5   : > { %v4487_v46 = vadd.f32 1.0, %v5584_v58  ;;  %5593 = vrcp.f32 %v4224_v25  ;;  %v5586_v43 = vpop.eup %5585 }
 0x5c6   : > { %v4216_v29 = vadd.f32 1.0, %v5586_v43 }
 0x5c7   : > { %4429 = vperm.xlu1 %5463, %v4413_v4  }
 0x5c8   : > { %4460 = vperm.xlu0 %5464, %v5576_v45   ;;  %v5588_v61 = vpop.eup %5587  ;;  %5595 = vrcp.f32 %v4216_v29 }
 0x5c9   : > { %v4489_v56 = vadd.f32 1.0, %v5588_v61 }
 0x5ca   : > { %v5590_v37 = vpop.eup %5589 }
 0x5cb   : > { %4615 = vperm.xlu1 %5463, %v5582_v6   ;;  %v5592_v17 = vpop.eup %5591  ;;  %v4414_v57 = vadd.f32 1.0, %v5590_v37 }
 0x5cc   : > { %4594 = vperm.xlu0 %5464, %v4562_v63   ;;  %v4218_v54 = vadd.f32 1.0, %v5592_v17 }
 0x5ce   : > { %5597 = vrcp.f32 %v4218_v54 }
 0x5cf   : > { %4376 = vperm.xlu1 %5463, %v4357_v9  }
 0x5d0   : > { %4525 = vperm.xlu0 %5464, %v5584_v58  }
 0x5d2   : > { %v5594_v28 = vpop.eup %5593 }
 0x5d3   : > { %4579 = vperm.xlu1 %5463, %v4559_v15   ;;  %v4561_v0 = vadd.f32 1.0, %v5594_v28 }
 0x5d4   : > { %4501 = vperm.xlu0 %5464, %v4487_v46  }
 0x5d5   : > { %v5596_v38 = vpop.eup %5595 }
 0x5d6   : > { %v4486_v14 = vadd.f32 1.0, %v5596_v38 }
 0x5d7   : > { %4439 = vperm.xlu1 %5463, %v4415_v31  }
 0x5d8   : > { %4535 = vperm.xlu0 %5464, %v5588_v61  }
 0x5db   : > { %4455 = vperm.xlu1 %5463, %v5590_v37   ;;  %v5598_v13 = vpop.eup %5597 }
 0x5dc   : > { %4511 = vperm.xlu0 %5464, %v4489_v56   ;;  %v4488_v22 = vadd.f32 1.0, %v5598_v13 }
 0x5df   : > { %4434 = vperm.xlu1 %5463, %v4414_v57  }
 0x5e0   : > { %4630 = vperm.xlu0 %5464, %v5578_v12   ;;  %v4300_v12 = vrot.slane %v7824_v2, %v4299_v16  ;;  %v5600_v2 = vld [vmem:[%s6406_s24] sm:$0xff] }
 0x5e3   : > { %4589 = vperm.xlu1 %5463, %v4561_v0  }
 0x5e7   : > { %4520 = vperm.xlu1 %5463, %v5596_v38   ;;  %v5602_v38 = vld [vmem:[%s6461_s2] sm:$0xff] }
 0x5eb   : > { %4496 = vperm.xlu1 %5463, %v4486_v14  }
 0x5ef   : > { %4530 = vperm.xlu1 %5463, %v5598_v13   ;;  %v5603_v13 = vld [vmem:[%s6461_s2 + $0x8] sm:$0xff] }
 0x5f3   : > { %4506 = vperm.xlu1 %5463, %v4488_v22  }
 0x5f7   : > { %4625 = vperm.xlu1 %5463, %v5594_v28  }
 0x62a   : > { %v4386_v30 = vpop.permute.xlu1 %4385 }
 0x62b   : > { %v4611_v8 = vpop.permute.xlu0 %4610 }
 0x62e   : > { %v4325_v26 = vpop.permute.xlu1 %4324 }
 0x62f   : > { %v4575_v21 = vpop.permute.xlu0 %4574 }
 0x630   : > { %v4598_v62 = vmul.f32 %v7896_v1, %v4575_v21 }
 0x632   : > { %v4634_v53 = vadd.f32 %v4611_v8, %v4598_v62  ;;  %v4372_v19 = vpop.permute.xlu1 %4371 }
 0x633   : > { %v4379_v40 = vmul.f32 %v4372_v19, %v7902_v52  ;;  %v4380_v45 = vmul.f32 %v4372_v19, %v7905_v51  ;;  %v4312_v4 = vpop.permute.xlu0 %4311 }
 0x634   : > { %v4640_v10 = vmul.f32 %v4634_v53, %v7753_v27  ;;  %v4314_v48 = vmul.f32 %v4312_v4, %v4272_v41  ;;  %v4315_v63 = vmul.f32 %v4312_v4, %v4276_v34  ;;  %v4316_v7 = vmul.f32 %v4312_v4, %v4280_v33  ;;  %v5601_v34 = vld [vmem:[%s6406_s24 + $0x8] sm:$0xff] }
 0x635   : > { %v4393_v39 = vadd.f32 %v4386_v30, %v4379_v40  ;;  %v4394_v6 = vadd.f32 %v4386_v30, %v4380_v45  ;;  %v4317_v58 = vmul.f32 %v4312_v4, %v4284_v32  ;;  %v4318_v25 = vmul.f32 %v4312_v4, %v4288_v5 }
 0x636   : > { %4646 = vst.msk [vmem:[%s7923_s29 + $0x8] sm:$0xff] %vm3572_vm12, %v4640_v10  ;;  %v4319_v9 = vmul.f32 %v4312_v4, %v4292_v11  ;;  %v4320_v27 = vmul.f32 %v4312_v4, %v4296_v44  ;;  %v4321_v46 = vmul.f32 %v4312_v4, %v4300_v12  ;;  %v4327_v15 = vadd.f32 %v4325_v26, %v4314_v48  ;;  %v4606_v43 = vpop.permute.xlu1 %4605 }
 0x637   : > { %v4397_v31 = vmul.f32 %v5600_v2, %v4393_v39  ;;  %v4398_v61 = vmul.f32 %v5601_v34, %v4394_v6  ;;  %v4328_v29 = vadd.f32 %v4325_v26, %v4315_v63  ;;  %v4329_v56 = vadd.f32 %v4325_v26, %v4316_v7  ;;  %v7929_v37 = vpop.permute.xlu0 %4450 }
 0x638   : > { %v4330_v17 = vadd.f32 %v4325_v26, %v4317_v58  ;;  %v4331_v54 = vadd.f32 %v4325_v26, %v4318_v25  ;;  %v4332_v57 = vadd.f32 %v4325_v26, %v4319_v9  ;;  %v4333_v28 = vadd.f32 %v4325_v26, %v4320_v27 }
 0x639   : > { %4401 = vst [vmem:[%s7933_s20] sm:$0xff] %v4397_v31  ;;  %4402 = vst [vmem:[%s7933_s20 + $0x8] sm:$0xff] %v4398_v61  ;;  %v4334_v0 = vadd.f32 %v4325_v26, %v4321_v46  ;;  %v4335_v14 = vmul.f32 %v5602_v38, %v4327_v15  ;;  %v4336_v22 = vmul.f32 %v5603_v13, %v4328_v29 }
 0x63a   : > { %v4337_v30 = vmul.f32 %v4329_v56, %v7764_v49  ;;  %v4338_v8 = vmul.f32 %v4330_v17, %v7775_v35  ;;  %v4339_v59 = vmul.f32 %v4331_v54, %v7789_v47  ;;  %v4340_v3 = vmul.f32 %v4332_v57, %v7798_v24  ;;  %v4570_v55 = vpop.permute.xlu1 %4569  ;;  %v4551_v35 = vld [vmem:[%s6431_s14] sm:$0xff] }
 0x63b   : > { %v4341_v23 = vmul.f32 %v4333_v28, %v7805_v18  ;;  %v4342_v50 = vmul.f32 %v4334_v0, %v7812_v36  ;;  %4343 = vst [vmem:[%s695_s7] sm:$0xff] %v4335_v14  ;;  %4344 = vst [vmem:[%s695_s7 + $0x8] sm:$0xff] %v4336_v22  ;;  %v4597_v26 = vmul.f32 %v7896_v1, %v4570_v55  ;;  %v4621_v49 = vpop.permute.xlu0 %4620  ;;  %v4406_v18 = vld [vmem:[#allocation9 + $0x1] ss:$2 sm:$0x3] }
 0x63c   : > { %4345 = vst [vmem:[%s695_s7 + $0x10] sm:$0xff] %v4337_v30  ;;  %4346 = vst [vmem:[%s695_s7 + $0x18] sm:$0xff] %v4338_v8 }
 0x63d   : > { %4347 = vst [vmem:[%s695_s7 + $0x20] sm:$0xff] %v4339_v59  ;;  %4348 = vst [vmem:[%s695_s7 + $0x28] sm:$0xff] %v4340_v3  ;;  %v4633_v47 = vadd.f32 %v4606_v43, %v4597_v26 }
 0x63e   : > { %4349 = vst [vmem:[%s695_s7 + $0x30] sm:$0xff] %v4341_v23  ;;  %4350 = vst [vmem:[%s695_s7 + $0x38] sm:$0xff] %v4342_v50  ;;  %v4391_v24 = vpop.permute.xlu1 %4390 }
 0x63f   : > { %5811 = shalt.err (!%p5808_p3)
}
 0x640   : > { %s5812_s15 = scalar_lea.hbm %s7949_s22, 1024  ;;  %s5816_s2 = scalar_lea.hbm %s8331_s25, 2048 }
 0x641   : > { %p5813_p2 = scmp.ne.s32.totalorder %s7949_s22, %s5812_s15  ;;  %p5817_p12 = scmp.lt.s32.totalorder %s7949_s22, %s8331_s25 }
 0x642   : > { %p5818_p8 = scmp.lt.s32.totalorder %s5816_s2, %s5812_s15 }
 0x643   : > { %p5814_p11 = pnand %p5813_p2, %p8332_p1 }
 0x644   : > { %p5819_p9 = por %p5818_p8, %p5817_p12 }
 0x645   : > { %p5815_p7 = pneg %p5814_p11 }
 0x647   : > { %p5820_p10 = pnand %p5819_p9, %p5815_p7 }
 0x649   : > { %5823 = shalt.err (!%p5820_p10)
}
 0x64a   : > { %5341 = dma.vmem_to_hbm [thread:$0]  (%p8332_p1), %s7951_s8, 1024, %s7949_s22, %s4652_s30   ;;  %v4639_v36 = vmul.f32 %v4633_v47, %v4551_v35  ;;  %v4585_v21 = vpop.permute.xlu0 %4584  ;;  %v4554_v16 = vld [vmem:[%s6431_s14 + $0x18] sm:$0xff]  ;;  %v7980_v62 = vrot.slane %v4406_v18, %v8325_v20  ;;  %v7983_v41 = vrot.slane %v4406_v18, %v7715_v60  ;;  %v4430_v53 = vpop.permute.xlu1 %4429  ;;  %v5604_v20 = vld [vmem:[%s6420_s26] sm:$0xff]  ;;  %v5605_v12 = vld [vmem:[%s6420_s26 + $0x8] sm:$0xff] }
 0x64b   : > { %v4600_v42 = vmul.f32 %v7896_v1, %v4585_v21  ;;  %s7998_s8 = scalar_lea.vmem [#allocation28], %s6416_s17  ;;  %s4699_s22 = sshll.u32 %s7933_s20, 4  ;;  %v5607_v9 = vld [vmem:[%s6406_s24 + $0x18] sm:$0xff]  ;;  %v4553_v2 = vld [vmem:[%s6431_s14 + $0x10] sm:$0xff]  ;;  %v4483_v61 = vld [vmem:[%s6427_s12 + $0x8] sm:$0xff]  ;;  %s8006_s22 = int_to_ptr.vmem [resolvable:$true] %s4699_s22 }
 0x64c   : > { %4645 = vst.msk [vmem:[%s7923_s29] sm:$0xff] %vm3572_vm12, %v4639_v36  ;;  %v4442_v19 = vmul.f32 %v4430_v53, %v7980_v62  ;;  %v4443_v32 = vmul.f32 %v4430_v53, %v7983_v41  ;;  %s8272_s30 = sshll.u32 %s6138_s23, 9  ;;  %s8333_s19 = sld [smem:[#allocation56_spill]]  ;;  %v8018_v15 = vld [vmem:[#allocation10] ss:$0 sm:$0xff] }
 0x64d   : > { %v4636_v33 = vadd.f32 %v4621_v49, %v4600_v42  ;;  %s4657_s15 = scalar_lea.sflag [#allocation27], %s6413_s18  ;;  %s5824_s13 = scalar_lea.vmem %s8006_s22, 512 }
 0x64e   : > { %v7987_v5 = vpop.permute.xlu0 %4460  ;;  %v4463_v40 = vadd.f32 %v7929_v37, %v4442_v19  ;;  %v4464_v45 = vadd.f32 %v7929_v37, %v4443_v32  ;;  %v4616_v60 = vpop.permute.xlu1 %4615  ;;  %p5825_p5 = scmp.ne.s32.totalorder %s8006_s22, %s5824_s13 }
 0x64f   : > { %v4642_v11 = vmul.f32 %v4636_v33, %v4554_v16 }
 0x650   : > { %v4469_v44 = vmul.f32 %v5604_v20, %v4463_v40  ;;  %v4470_v4 = vmul.f32 %v5605_v12, %v4464_v45  ;;  %p5826_p4 = pnand %p5825_p5, %p8332_p1 }
 0x651   : > { %4648 = vst.msk [vmem:[%s7923_s29 + $0x18] sm:$0xff] %vm3572_vm12, %v4642_v11 }
 0x652   : > { %v7995_v10 = vpop.permute.xlu0 %4594  ;;  %4475 = vst [vmem:[%s7998_s8] sm:$0xff] %v4469_v44  ;;  %4476 = vst [vmem:[%s7998_s8 + $0x8] sm:$0xff] %v4470_v4  ;;  %v4377_v48 = vpop.permute.xlu1 %4376  ;;  %s8013_s11 = scalar_lea.hbm %s8333_s19, %s8272_s30  ;;  %p5827_p0 = pneg %p5826_p4 }
 0x653   : > { %v4381_v63 = vmul.f32 %v4377_v48, %v7902_v52  ;;  %v4382_v7 = vmul.f32 %v4377_v48, %v7905_v51  ;;  %v5606_v52 = vld [vmem:[%s6406_s24 + $0x10] sm:$0xff]  ;;  %s6026_s24 = smov [#allocation26]  }
 0x654   : > { %s5828_s7 = sshll.u32 %s6026_s24, 4  ;;  %s5829_s7 = int_to_ptr.vmem [resolvable:$false] %s5828_s7 }
 0x655   : > { %v4395_v6 = vadd.f32 %v4391_v24, %v4381_v63  ;;  %v4396_v58 = vadd.f32 %v4391_v24, %v4382_v7  ;;  %s5830_s2 = scalar_lea.vmem %s5829_s7, 1024  ;;  %p5831_p6 = scmp.lt.s32.totalorder %s8006_s22, %s5829_s7 }
 0x656   : > { %v4526_v39 = vpop.permute.xlu0 %4525  ;;  %v4580_v25 = vpop.permute.xlu1 %4579  ;;  %p5832_p13 = scmp.lt.s32.totalorder %s5830_s2, %s5824_s13 }
 0x657   : > { %v4399_v51 = vmul.f32 %v5606_v52, %v4395_v6  ;;  %v4400_v27 = vmul.f32 %v5607_v9, %v4396_v58  ;;  %v4599_v46 = vmul.f32 %v7896_v1, %v4580_v25 }
 0x658   : > { %p5833_p3 = por %p5832_p13, %p5831_p6 }
 0x659   : > { %4403 = vst [vmem:[%s7933_s20 + $0x10] sm:$0xff] %v4399_v51  ;;  %4404 = vst [vmem:[%s7933_s20 + $0x18] sm:$0xff] %v4400_v27  ;;  %v4635_v34 = vadd.f32 %v4616_v60, %v4599_v46 }
 0x65a   : > { %v4502_v43 = vpop.permute.xlu0 %4501  ;;  %v4440_v56 = vpop.permute.xlu1 %4439  ;;  %p5834_p2 = pnand %p5833_p3, %p5827_p0 }
 0x65b   : > { %v4515_v31 = vmul.f32 %v8018_v15, %v4502_v43 }
 0x65d   : > { %v4539_v29 = vadd.f32 %v4526_v39, %v4515_v31 }
 0x65e   : > { %5837 = shalt.err (!%p5834_p2)
}
 0x65f   : > { %s5838_s20 = scalar_lea.hbm %s8013_s11, 512  ;;  %s5842_s17 = scalar_lea.hbm %s8333_s19, 1024 }
 0x660   : > { %p5839_p11 = scmp.ne.s32.totalorder %s8013_s11, %s5838_s20  ;;  %p5843_p8 = scmp.lt.s32.totalorder %s8013_s11, %s8333_s19 }
 0x661   : > { %p5844_p9 = scmp.lt.s32.totalorder %s5842_s17, %s5838_s20 }
 0x662   : > { %p5840_p7 = pnand %p5839_p11, %p8332_p1 }
 0x663   : > { %p5845_p10 = por %p5844_p9, %p5843_p8 }
 0x664   : > { %p5841_p12 = pneg %p5840_p7 }
 0x666   : > { %p5846_p5 = pnand %p5845_p10, %p5841_p12 }
 0x668   : > { %5849 = shalt.err (!%p5846_p5)
}
 0x669   : > { %s6027_s13 = smov 256   ;;  %s6028_s7 = smov 16   ;;  %v4641_v37 = vmul.f32 %v4635_v34, %v4553_v2  ;;  %v4446_v17 = vmul.f32 %v4440_v56, %v7980_v62  ;;  %v4447_v54 = vmul.f32 %v4440_v56, %v7983_v41  ;;  %v4536_v57 = vpop.permute.xlu0 %4535  ;;  %v4543_v28 = vmul.f32 %v4539_v29, %v4483_v61  ;;  %v4411_v0 = vld [vmem:[%s6420_s26 + $0x20] sm:$0xff]  ;;  %v4412_v38 = vld [vmem:[%s6420_s26 + $0x28] sm:$0xff]  ;;  %v4456_v22 = vpop.permute.xlu1 %4455  ;;  %v4409_v36 = vld [vmem:[%s6420_s26 + $0x10] sm:$0xff] }
 0x66a   : > { %5342 = dma.vmem_to_hbm [thread:$0]  (%p8332_p1), %s8006_s22, 512, %s8013_s11, %s4657_s15, %s6027_s13, %s6027_s13, %s6028_s7   ;;  %v4602_v55 = vmul.f32 %v7896_v1, %v7995_v10 }
 0x66b   : > { %4647 = vst.msk [vmem:[%s7923_s29 + $0x10] sm:$0xff] %vm3572_vm12, %v4641_v37  ;;  %v4467_v14 = vadd.f32 %v7987_v5, %v4446_v17  ;;  %v4468_v13 = vadd.f32 %v7987_v5, %v4447_v54  ;;  %s8060_s22 = scalar_lea.vmem [#allocation29], %s6402_s6  ;;  %v4485_v23 = vld [vmem:[%s6427_s12 + $0x18] sm:$0xff]  ;;  %s8271_s6 = smul.u32 768, %s6138_s23 }
 0x66c   : > { %4547 = vst.msk [vmem:[%s8060_s22 + $0x8] sm:$0xff] %vm3572_vm12, %v4543_v28  ;;  %v4556_v47 = vld [vmem:[%s6431_s14 + $0x28] sm:$0xff]  ;;  %s4715_s11 = sshll.u32 %s7998_s8, 4  ;;  %v4410_v21 = vld [vmem:[%s6420_s26 + $0x18] sm:$0xff]  ;;  %s8334_s27 = sld [smem:[#allocation57_spill]]  ;;  %s8079_s11 = int_to_ptr.vmem [resolvable:$true] %s4715_s11 }
 0x66d   : > { %v4473_v30 = vmul.f32 %v4467_v14, %v4411_v0  ;;  %v4474_v8 = vmul.f32 %v4468_v13, %v4412_v38  ;;  %v4512_v59 = vpop.permute.xlu0 %4511  ;;  %v4435_v26 = vpop.permute.xlu1 %4434  ;;  %s5850_s1 = scalar_lea.vmem %s8079_s11, 768  ;;  %s6029_s17 = smov [#allocation28]  }
 0x66e   : > { %v4517_v3 = vmul.f32 %v8018_v15, %v4512_v59  ;;  %v4444_v49 = vmul.f32 %v4435_v26, %v7980_v62  ;;  %v4445_v35 = vmul.f32 %v4435_v26, %v7983_v41  ;;  %p5851_p4 = scmp.ne.s32.totalorder %s8079_s11, %s5850_s1  ;;  %s5854_s28 = sshll.u32 %s6029_s17, 4  ;;  %s5855_s28 = int_to_ptr.vmem [resolvable:$false] %s5854_s28 }
 0x66f   : > { %4479 = vst [vmem:[%s7998_s8 + $0x20] sm:$0xff] %v4473_v30  ;;  %4480 = vst [vmem:[%s7998_s8 + $0x28] sm:$0xff] %v4474_v8  ;;  %s5856_s24 = scalar_lea.vmem %s5855_s28, 1536  ;;  %p5857_p13 = scmp.lt.s32.totalorder %s8079_s11, %s5855_s28 }
 0x670   : > { %v4541_v50 = vadd.f32 %v4536_v57, %v4517_v3  ;;  %v4465_v16 = vadd.f32 %v4456_v22, %v4444_v49  ;;  %v4466_v33 = vadd.f32 %v4456_v22, %v4445_v35  ;;  %p5852_p0 = pnand %p5851_p4, %p8332_p1  ;;  %p5858_p3 = scmp.lt.s32.totalorder %s5856_s24, %s5850_s1 }
 0x671   : > { %v4631_v24 = vpop.permute.xlu0 %4630  ;;  %v4590_v53 = vpop.permute.xlu1 %4589 }
 0x672   : > { %v4545_v18 = vmul.f32 %v4541_v50, %v4485_v23  ;;  %v4638_v42 = vadd.f32 %v4631_v24, %v4602_v55  ;;  %v4471_v41 = vmul.f32 %v4465_v16, %v4409_v36  ;;  %v4472_v19 = vmul.f32 %v4466_v33, %v4410_v21  ;;  %s8086_s26 = scalar_lea.hbm %s8334_s27, %s8271_s6  ;;  %p5853_p6 = pneg %p5852_p0 }
 0x673   : > { %p5859_p2 = por %p5858_p3, %p5857_p13 }
 0x674   : > { %4549 = vst.msk [vmem:[%s8060_s22 + $0x18] sm:$0xff] %vm3572_vm12, %v4545_v18  ;;  %v4644_v62 = vmul.f32 %v4638_v42, %v4556_v47  ;;  %4477 = vst [vmem:[%s7998_s8 + $0x10] sm:$0xff] %v4471_v41 }
 0x675   : > { %4478 = vst [vmem:[%s7998_s8 + $0x18] sm:$0xff] %v4472_v19  ;;  %v4521_v32 = vpop.permute.xlu1 %4520  ;;  %p5860_p11 = pnand %p5859_p2, %p5853_p6 }
 0x676   : > { %4650 = vst.msk [vmem:[%s7923_s29 + $0x28] sm:$0xff] %vm3572_vm12, %v4644_v62 }
 0x677   : > { %5863 = shalt.err (!%p5860_p11)
}
 0x678   : > { %s5864_s8 = scalar_lea.hbm %s8086_s26, 768  ;;  %s5868_s17 = scalar_lea.hbm %s8334_s27, 1536 }
 0x679   : > { %p5865_p7 = scmp.ne.s32.totalorder %s8086_s26, %s5864_s8  ;;  %p5869_p9 = scmp.lt.s32.totalorder %s8086_s26, %s8334_s27 }
 0x67a   : > { %p5870_p10 = scmp.lt.s32.totalorder %s5868_s17, %s5864_s8 }
 0x67b   : > { %p5866_p12 = pnand %p5865_p7, %p8332_p1 }
 0x67c   : > { %p5871_p5 = por %p5870_p10, %p5869_p9 }
 0x67d   : > { %p5867_p8 = pneg %p5866_p12 }
 0x67f   : > { %p5872_p4 = pnand %p5871_p5, %p5867_p8 }
 0x681   : > { %5875 = shalt.err (!%p5872_p4)
}
 0x682   : > { %5343 = dma.vmem_to_hbm [thread:$0]  (%p8332_p1), %s8079_s11, 768, %s8086_s26, %s4657_s15, %s6027_s13, %s6027_s13, %s6028_s7   ;;  %v4497_v5 = vpop.permute.xlu1 %4496  ;;  %v4601_v10 = vmul.f32 %v7896_v1, %v4590_v53 }
 0x683   : > { %v4514_v11 = vmul.f32 %v8018_v15, %v4497_v5  ;;  %v4482_v40 = vld [vmem:[%s6427_s12] sm:$0xff]  ;;  %s4731_s30 = sshll.u32 %s8060_s22, 4  ;;  %v4484_v4 = vld [vmem:[%s6427_s12 + $0x10] sm:$0xff]  ;;  %s4747_s6 = sshll.u32 %s7923_s29, 4  ;;  %s8134_s30 = int_to_ptr.vmem [resolvable:$true] %s4731_s30  ;;  %s8136_s6 = int_to_ptr.vmem [resolvable:$true] %s4747_s6 }
 0x684   : > { %v4555_v63 = vld [vmem:[%s6431_s14 + $0x20] sm:$0xff]  ;;  %s8335_s15 = sshll.u32 %s6138_s23, 9  ;;  %s8336_s11 = sld [smem:[#allocation58_spill]] }
 0x685   : > { %v4538_v45 = vadd.f32 %v4521_v32, %v4514_v11  ;;  %s8337_s12 = smul.u32 768, %s6138_s23  ;;  %s8338_s28 = sld [smem:[#allocation59_spill]] }
 0x686   : > { %v4531_v60 = vpop.permute.xlu1 %4530  ;;  %s4667_s8 = scalar_lea.sflag [#allocation30], %s6413_s18  ;;  %s5876_s2 = scalar_lea.vmem %s8134_s30, 512 }
 0x687   : > { %v4542_v20 = vmul.f32 %v4538_v45, %v4482_v40  ;;  %p5877_p0 = scmp.ne.s32.totalorder %s8134_s30, %s5876_s2  ;;  %s6030_s20 = smov [#allocation29]  }
 0x688   : > { %s5880_s17 = sshll.u32 %s6030_s20, 4  ;;  %s5881_s17 = int_to_ptr.vmem [resolvable:$false] %s5880_s17 }
 0x689   : > { %4546 = vst.msk [vmem:[%s8060_s22] sm:$0xff] %vm3572_vm12, %v4542_v20  ;;  %p5878_p6 = pnand %p5877_p0, %p8332_p1  ;;  %p5883_p3 = scmp.lt.s32.totalorder %s8134_s30, %s5881_s17 }
 0x68a   : > { %v4507_v44 = vpop.permute.xlu1 %4506  ;;  %s8132_s26 = scalar_lea.hbm %s8336_s11, %s8335_s15  ;;  %s5882_s15 = scalar_lea.vmem %s5881_s17, 1024 }
 0x68b   : > { %v4516_v12 = vmul.f32 %v8018_v15, %v4507_v44  ;;  %s8145_s24 = scalar_lea.hbm %s8338_s28, %s8337_s12  ;;  %p5879_p13 = pneg %p5878_p6 }
 0x68c   : > { %p5884_p2 = scmp.lt.s32.totalorder %s5882_s15, %s5876_s2 }
 0x68d   : > { %v4540_v48 = vadd.f32 %v4531_v60, %v4516_v12 }
 0x68e   : > { %v4626_v7 = vpop.permute.xlu1 %4625  ;;  %p5885_p11 = por %p5884_p2, %p5883_p3 }
 0x68f   : > { %v4544_v39 = vmul.f32 %v4540_v48, %v4484_v4  ;;  %v4637_v6 = vadd.f32 %v4626_v7, %v4601_v10 }
 0x690   : > { %p5886_p7 = pnand %p5885_p11, %p5879_p13 }
 0x691   : > { %4548 = vst.msk [vmem:[%s8060_s22 + $0x10] sm:$0xff] %vm3572_vm12, %v4544_v39  ;;  %v4643_v1 = vmul.f32 %v4637_v6, %v4555_v63 }
 0x692   : > { %5889 = shalt.err (!%p5886_p7)
}
 0x693   : > { %s5890_s23 = scalar_lea.hbm %s8132_s26, 512  ;;  %s5894_s7 = scalar_lea.hbm %s8336_s11, 1024 }
 0x694   : > { %p5891_p12 = scmp.ne.s32.totalorder %s8132_s26, %s5890_s23  ;;  %p5895_p10 = scmp.lt.s32.totalorder %s8132_s26, %s8336_s11 }
 0x695   : > { %p5896_p5 = scmp.lt.s32.totalorder %s5894_s7, %s5890_s23 }
 0x696   : > { %p5892_p8 = pnand %p5891_p12, %p8332_p1 }
 0x697   : > { %p5897_p4 = por %p5896_p5, %p5895_p10 }
 0x698   : > { %p5893_p9 = pneg %p5892_p8 }
 0x69a   : > { %p5898_p0 = pnand %p5897_p4, %p5893_p9 }
 0x69c   : > { %5901 = shalt.err (!%p5898_p0)
}
 0x69d   : > { %s6031_s1 = smov 128   ;;  %s6032_s2 = smov 8   ;;  %4649 = vst.msk [vmem:[%s7923_s29 + $0x20] sm:$0xff] %vm3572_vm12, %v4643_v1 }
 0x69e   : > { %5344 = dma.vmem_to_hbm [thread:$0]  (%p8332_p1), %s8134_s30, 512, %s8132_s26, %s4667_s8, %s6031_s1, %s6031_s1, %s6032_s2  }
 0x69f   : > { %s5902_s20 = scalar_lea.vmem %s8136_s6, 768  ;;  %s6033_s17 = smov [#allocation31]  }
 0x6a0   : > { %p5903_p6 = scmp.ne.s32.totalorder %s8136_s6, %s5902_s20  ;;  %s5906_s15 = sshll.u32 %s6033_s17, 4  ;;  %s5907_s15 = int_to_ptr.vmem [resolvable:$false] %s5906_s15 }
 0x6a1   : > { %s5908_s23 = scalar_lea.vmem %s5907_s15, 1536  ;;  %p5909_p2 = scmp.lt.s32.totalorder %s8136_s6, %s5907_s15 }
 0x6a2   : > { %p5904_p13 = pnand %p5903_p6, %p8332_p1  ;;  %p5910_p11 = scmp.lt.s32.totalorder %s5908_s23, %s5902_s20 }
 0x6a4   : > { %p5905_p3 = pneg %p5904_p13  ;;  %p5911_p7 = por %p5910_p11, %p5909_p2 }
 0x6a6   : > { %p5912_p12 = pnand %p5911_p7, %p5905_p3 }
 0x6a8   : > { %5915 = shalt.err (!%p5912_p12)
}
 0x6a9   : > { %s5916_s30 = scalar_lea.hbm %s8145_s24, 768  ;;  %s5920_s22 = scalar_lea.hbm %s8338_s28, 1536 }
 0x6aa   : > { %p5917_p8 = scmp.ne.s32.totalorder %s8145_s24, %s5916_s30  ;;  %p5921_p5 = scmp.lt.s32.totalorder %s8145_s24, %s8338_s28 }
 0x6ab   : > { %p5922_p4 = scmp.lt.s32.totalorder %s5920_s22, %s5916_s30 }
 0x6ac   : > { %p5918_p9 = pnand %p5917_p8, %p8332_p1 }
 0x6ad   : > { %p5923_p0 = por %p5922_p4, %p5921_p5 }
 0x6ae   : > { %p5919_p10 = pneg %p5918_p9 }
 0x6b0   : > { %p5924_p6 = pnand %p5923_p0, %p5919_p10 }
 0x6b2   : > { %5927 = shalt.err (!%p5924_p6)
}
 0x6b3   : > { %5345 = dma.vmem_to_hbm [thread:$0]  (%p8332_p1), %s8136_s6, 768, %s8145_s24, %s4667_s8, %s6031_s1, %s6031_s1, %s6032_s2  }
 0x6b4 PF: > { %s8339_s12 = sld [smem:[#allocation40_spill]]  ;;  %p8342_p3 = scmp.ge.s32.totalorder %s5990_s10, 2 }
 0x6b5   : > { %s8340_s14 = sld [smem:[#allocation44_spill]] }
 0x6ba   : > { %s4762_s20 = sand.u32 1, %s8339_s12  }
 0x6bb   : > { %p8341_p13 = scmp.ne.s32.totalorder %s8340_s14, 0  ;;  %s4763_s17 = scalar_lea.sflag [#allocation15], %s4762_s20 }
 0x6bd   : > { %p5375_p2 = pnand %p8342_p3, %p8341_p13 }
 0x6bf   : > { %p5376_p11 = pneg %p5375_p2 }
 0x6c1   : > { %5965 = dma.done.wait (%p5376_p11), %s4763_s17, 1024  }
 0x6c2   : > { %5967 = vsyncadd (%p5376_p11), %s4763_s17, 4294966272  ;;  %s8343_s16 = sadd.s32 4294967294, %s5990_s10  }
 0x6c3   : > { %s4771_s15 = sand.u32 1, %s8343_s16  }
 0x6c4   : > { %s4772_s23 = scalar_lea.sflag [#allocation27], %s4771_s15 }
 0x6c5   : > { %5969 = dma.done.wait (%p5376_p11), %s4772_s23, 1280  }
 0x6c6   : > { %5971 = vsyncadd (%p5376_p11), %s4772_s23, 4294966016  ;;  %s4790_s18 = scalar_lea.sflag [#allocation30], %s4771_s15 }
 0x6c7   : > { %5973 = dma.done.wait (%p5376_p11), %s4790_s18, 1280  }
 0x6c8   : > { %5975 = vsyncadd (%p5376_p11), %s4790_s18, 4294966016  ;;  %s8344_s10 = sld [smem:[#allocation42_spill]]  ;;  %s8347_s20 = smov %s5982_s21 }
 0x6c9   : > { %s8345_s6 = sld [smem:[#allocation41_spill]] }
 0x6ca   : > { %s8346_s22 = sld [smem:[#allocation43_spill]] }
 0x6ce   : > { %p43_p1 = scmp.ge.s32.totalorder %s8344_s10, 4  }
 0x6cf   : > { %s8348_s21 = smov %s8345_s6 }
 0x6d0   :  { %45 = sbr.rel (!%p43_p1) target bundleno = 26 (0x1a), region = 232 }
 0x6d5   :  { %4804 = vsyncpa [#allocation14], 1 }
 0x6d6   :  { %4806 = vsyncpa [#allocation14 + $0x1], 1 }
 0x6d7   :  { %4807 = vsyncpa [#allocation17], 1 }
 0x6d8   :  { %4809 = vsyncpa [#allocation17 + $0x1], 1 }
 0x6d9   :  { %4810 = vsyncpa [#allocation20], 1 }
 0x6da   :  { %4812 = vsyncpa [#allocation20 + $0x1], 1 }
 0x6db   :  { %4813 = vsyncpa [#allocation23], 1 }
 0x6dc   :  { %4814 = vsyncpa [#allocation15], 1 }
 0x6dd   :  { %4816 = vsyncpa [#allocation15 + $0x1], 1 }
 0x6de   :  { %4817 = vsyncpa [#allocation27], 1 }
 0x6df   :  { %4819 = vsyncpa [#allocation27 + $0x1], 1 }
 0x6e0   :  { %4820 = vsyncpa [#allocation30], 1 }
 0x6e1   :  { %4822 = vsyncpa [#allocation30 + $0x1], 1 }

</bundles_post_ra>
